<compile_context>
chip_gen: v5e
topology: v5e:2x2
jax: 0.10.0
libtpu: 0.0.40
codegen_flags: <defaults>
</compile_context>

<pallas_src>
import jax
import jax.numpy as jnp
from jax import lax
from jax.experimental import pallas as pl
from jax.experimental.pallas import tpu as pltpu

# ---------------- configuration (small, consistent with the module) ---------
HIDDEN = 32            # hidden_size
N_FILTER_BANK = 8
DEEPNESS = 2
COMPRESSION = 1
FRAME_SIZE = 256
T = 8                  # number of frames (GRU sequence length)
B = 2                  # batch of independent sequences (folded into rows)
ROWS = T * B           # 16 rows processed in one grid-less kernel invocation
PARAM_PER_ENV = FRAME_SIZE // (2 * N_FILTER_BANK * COMPRESSION)   # = 16
OUT_DIM = 16 * PARAM_PER_ENV                                       # = 256
IN_PAD = 16            # padded input feature width (1 sc + 8 loudness -> 16)
VEC_W = 2 * OUT_DIM    # lane width of the packed vector table (512)
VEC_ROWS = 24


# ---------------- kernel ----------------------------------------------------
def ddsp_kernel(x_ref, w1_ref, w64_ref, wgru_ref, wap_ref, wdec_ref, vec_ref,
                out_ref, z_ref):
    H = HIDDEN
    BF = jnp.bfloat16

    def vrow(row, width):
        # Single packed (1, width) parameter vector; broadcast on use.
        return vec_ref[row:row + 1, :width]

    def ln_lrelu(y, g, beta):
        """LayerNorm(eps=1e-5, biased var) + LeakyReLU(0.01).

        var = E[y^2] - mean^2 so the two cross-lane reductions are independent.
        """
        mean = jnp.mean(y, axis=-1, keepdims=True)
        msq = jnp.mean(y * y, axis=-1, keepdims=True)
        var = msq - mean * mean
        y = (y - mean) * lax.rsqrt(var + 1e-5)
        y = y * g + beta
        return jnp.maximum(y, 0.01 * y)

    def ln_pair(y, r0):
        """Per-half LN+LeakyReLU of a (rows, 64) value; gamma/beta at rows r0..r0+3."""
        left = ln_lrelu(y[:, :H], vrow(r0, H), vrow(r0 + 1, H))
        right = ln_lrelu(y[:, H:], vrow(r0 + 2, H), vrow(r0 + 3, H))
        return jnp.concatenate([left, right], axis=-1)

    # ---- encoders: fused f/l layer-1 and layer-2 (block-diagonal weights) --
    x = x_ref[...].astype(BF)                                            # (16,16)
    h1 = jnp.dot(x, w1_ref[...],
                 preferred_element_type=jnp.float32) + vrow(0, 2 * H)    # (16,64)
    h1 = ln_pair(h1, 1)
    fl = jnp.dot(h1.astype(BF), w64_ref[0:2 * H, :],
                 preferred_element_type=jnp.float32) + vrow(5, 2 * H)    # (16,64)
    fl = ln_pair(fl, 6)                                                  # [f | l]
    fl_b = fl.astype(BF)

    # ---- GRU (single layer, PyTorch gate order r, z, n) --------------------
    # Input projection hoisted out of the recurrence.
    gi_all = jnp.dot(fl_b, wgru_ref[0:2 * H, :],
                     preferred_element_type=jnp.float32) + vrow(10, 3 * H)  # (16,96)
    w_hh = wgru_ref[2 * H:3 * H, :]                                      # (32,96) bf16
    b_hh = vrow(11, 3 * H)                                               # (1,96)

    h = jnp.zeros((B, H), jnp.float32)
    for t in range(T):                                                   # static unroll
        gi = gi_all[t * B:(t + 1) * B, :]
        gh = jnp.dot(h.astype(BF), w_hh,
                     preferred_element_type=jnp.float32) + b_hh
        r = jax.nn.sigmoid(gi[:, 0 * H:1 * H] + gh[:, 0 * H:1 * H])
        u = jax.nn.sigmoid(gi[:, 1 * H:2 * H] + gh[:, 1 * H:2 * H])
        n = jnp.tanh(gi[:, 2 * H:3 * H] + r * gh[:, 2 * H:3 * H])
        h = (1.0 - u) * n + u * h
        z_ref[t * B:(t + 1) * B, :] = h                                  # off crit-path store
    z = z_ref[...]                                                       # (16,32)

    # ---- decoders -----------------------------------------------------------
    # latent = [fl | z] never materialized: split the layer-1 dot instead.
    ap = (jnp.dot(fl_b, wap_ref[0:2 * H, :],
                  preferred_element_type=jnp.float32)
          + jnp.dot(z.astype(BF), wap_ref[2 * H:3 * H, :],
                    preferred_element_type=jnp.float32)
          + vrow(12, 2 * H))                                             # (16,64)=[a1|p1]
    ap = ln_pair(ap, 13)
    ap2 = jnp.dot(ap.astype(BF), w64_ref[2 * H:4 * H, :],
                  preferred_element_type=jnp.float32) + vrow(17, 2 * H)  # block-diag L2
    ap2 = ln_pair(ap2, 18)

    fin = jnp.dot(ap2.astype(BF), wdec_ref[...],
                  preferred_element_type=jnp.float32) + vrow(22, 2 * OUT_DIM)  # (16,512)
    a = jax.nn.sigmoid(fin[:, :OUT_DIM])
    p = (2.0 * jnp.pi) * jax.nn.sigmoid(fin[:, OUT_DIM:])

    out_ref[:, :OUT_DIM] = a * jnp.cos(p)
    out_ref[:, OUT_DIM:] = a * jnp.sin(p)


# ---------------- parameter construction (deterministic, synthetic) ---------
def _linear(key, fan_in, fan_out, scale=0.1):
    k1, k2 = jax.random.split(key)
    W = jax.random.normal(k1, (fan_in, fan_out), jnp.float32) * scale
    b = jax.random.normal(k2, (fan_out,), jnp.float32) * scale
    return W, b


def _block_diag(a, b):
    ra, ca = a.shape
    rb, cb = b.shape
    out = jnp.zeros((ra + rb, ca + cb), jnp.float32)
    out = out.at[:ra, :ca].set(a)
    out = out.at[ra:, ca:].set(b)
    return out


def _pad_row(v, width=VEC_W):
    v = jnp.asarray(v, jnp.float32).reshape(-1)
    return jnp.pad(v, (0, width - v.shape[0]))


def build_packed_params(key):
    """Pack all module parameters into 6 operands: 5 bf16 weight slabs grouped
    by shape/fusion, plus one f32 vector table for biases / LN gamma / beta."""
    ks = jax.random.split(key, 12)
    # encoders
    fW1, fb1 = _linear(ks[0], 1, HIDDEN)
    fW2, fb2 = _linear(ks[1], HIDDEN, HIDDEN)
    lW1, lb1 = _linear(ks[2], N_FILTER_BANK, HIDDEN)
    lW2, lb2 = _linear(ks[3], HIDDEN, HIDDEN)
    # GRU: weights stored transposed [in, 3H], gate order (r, z, n)
    w_ih = jax.random.normal(ks[4], (2 * HIDDEN, 3 * HIDDEN), jnp.float32) * 0.1
    w_hh = jax.random.normal(ks[5], (HIDDEN, 3 * HIDDEN), jnp.float32) * 0.1
    b_ih = jax.random.normal(ks[6], (3 * HIDDEN,), jnp.float32) * 0.1
    b_hh = jax.random.normal(ks[7], (3 * HIDDEN,), jnp.float32) * 0.1
    # decoders
    a1W1, a1b1 = _linear(ks[8], 3 * HIDDEN, HIDDEN)
    a1W2, a1b2 = _linear(ks[9], HIDDEN, HIDDEN)
    p1W1, p1b1 = _linear(ks[10], 3 * HIDDEN, HIDDEN)
    p1W2, p1b2 = _linear(ks[11], HIDDEN, HIDDEN)
    kA, kP = jax.random.split(jax.random.fold_in(key, 7))
    a2W, a2b = _linear(kA, HIDDEN, OUT_DIM)
    p2W, p2b = _linear(kP, HIDDEN, OUT_DIM)

    ones = jnp.ones((HIDDEN,), jnp.float32)    # LayerNorm gamma (PyTorch default)
    zeros = jnp.zeros((HIDDEN,), jnp.float32)  # LayerNorm beta  (PyTorch default)

    # Fused layer-1 weight: input = [sc | loudness | zero-pad] (16 cols).
    W1 = jnp.zeros((IN_PAD, 2 * HIDDEN), jnp.float32)
    W1 = W1.at[0:1, 0:HIDDEN].set(fW1)
    W1 = W1.at[1:1 + N_FILTER_BANK, HIDDEN:2 * HIDDEN].set(lW1)

    W64 = jnp.concatenate([_block_diag(fW2, lW2),
                           _block_diag(a1W2, p1W2)], axis=0)          # (128, 64)
    WGRU = jnp.concatenate([w_ih, w_hh], axis=0)                      # (96, 96)
    WAP = jnp.concatenate([a1W1, p1W1], axis=1)                       # (96, 64)
    WDEC = _block_diag(a2W, p2W)                                      # (64, 512)

    rows = [
        jnp.concatenate([fb1, lb1]),                                  # 0  fused L1 bias
        ones, zeros, ones, zeros,                                     # 1-4  f/l L1 LN
        jnp.concatenate([fb2, lb2]),                                  # 5  fused L2 bias
        ones, zeros, ones, zeros,                                     # 6-9  f/l L2 LN
        b_ih, b_hh,                                                   # 10-11 GRU biases
        jnp.concatenate([a1b1, p1b1]),                                # 12 fused a/p L1 bias
        ones, zeros, ones, zeros,                                     # 13-16 a/p L1 LN
        jnp.concatenate([a1b2, p1b2]),                                # 17 fused a/p L2 bias
        ones, zeros, ones, zeros,                                     # 18-21 a/p L2 LN
        jnp.concatenate([a2b, p2b]),                                  # 22 final biases
        jnp.zeros((VEC_W,), jnp.float32),                             # 23 pad
    ]
    VEC = jnp.stack([_pad_row(r) for r in rows], axis=0)              # (24, 512) f32

    bf = jnp.bfloat16
    return (W1.astype(bf), W64.astype(bf), WGRU.astype(bf),
            WAP.astype(bf), WDEC.astype(bf), VEC)


# ---------------- wrapper ----------------------------------------------------
def ddsp_forward(spectral_centroid, loudness, packed):
    W1, W64, WGRU, WAP, WDEC, VEC = packed
    bsz, seq = spectral_centroid.shape[0], spectral_centroid.shape[1]

    # Fold batch into rows, time-major (row = t*B + b); pad features to IN_PAD.
    x = jnp.concatenate([spectral_centroid, loudness], axis=-1)       # (B, T, 9)
    x = jnp.pad(x, ((0, 0), (0, 0), (0, IN_PAD - x.shape[-1])))       # (B, T, 16)
    x = jnp.transpose(x, (1, 0, 2)).reshape(seq * bsz, IN_PAD)        # (T*B, 16)

    out = pl.pallas_call(
        ddsp_kernel,
        out_shape=jax.ShapeDtypeStruct((seq * bsz, 2 * OUT_DIM), jnp.float32),
        scratch_shapes=[pltpu.VMEM((seq * bsz, HIDDEN), jnp.float32)],
    )(x, W1, W64, WGRU, WAP, WDEC, VEC)

    out = out.reshape(seq, bsz, 2 * OUT_DIM).transpose(1, 0, 2)        # (B, T, 512)
    return out[..., :OUT_DIM], out[..., OUT_DIM:]


if __name__ == "__main__":
    key = jax.random.PRNGKey(0)
    k_sc, k_ld, k_par = jax.random.split(key, 3)

    spectral_centroid = jax.random.uniform(k_sc, (B, T, 1), jnp.float32)
    loudness = jax.random.uniform(k_ld, (B, T, N_FILTER_BANK), jnp.float32)
    packed = build_packed_params(k_par)

    real_param, imag_param = ddsp_forward(spectral_centroid, loudness, packed)
    jax.block_until_ready((real_param, imag_param))

    assert real_param.shape == (B, T, OUT_DIM)
    assert imag_param.shape == (B, T, OUT_DIM)
    assert bool(jnp.all(jnp.isfinite(real_param)))
    assert bool(jnp.all(jnp.isfinite(imag_param)))
    # amplitude a = |real + i*imag| must be in (0, 1) since a = sigmoid(.)
    mag = jnp.sqrt(real_param ** 2 + imag_param ** 2)
    assert bool(jnp.all(mag <= 1.0 + 1e-3))
    print("KERNEL_OK")
</pallas_src>

<mosaic_0001>
module attributes {stable_mosaic.version = 11 : i64} {
  func.func @ddsp_kernel(%arg0: memref<16x16xf32, #tpu.memory_space<vmem>>, %arg1: memref<16x64xbf16, #tpu.memory_space<vmem>>, %arg2: memref<128x64xbf16, #tpu.memory_space<vmem>>, %arg3: memref<96x96xbf16, #tpu.memory_space<vmem>>, %arg4: memref<96x64xbf16, #tpu.memory_space<vmem>>, %arg5: memref<64x512xbf16, #tpu.memory_space<vmem>>, %arg6: memref<24x512xf32, #tpu.memory_space<vmem>>, %arg7: memref<16x512xf32, #tpu.memory_space<vmem>>, %arg8: memref<16x32xf32, #tpu.memory_space<vmem>>) attributes {dimension_semantics = [], scalar_prefetch = 0 : i64, scratch_operands = 1 : i64, tpu.core_type = #tpu.core_type<tc>} {
    %c0 = arith.constant 0 : index
    %c0_0 = arith.constant 0 : index
    %0 = vector.load %arg0[%c0, %c0_0] : memref<16x16xf32, #tpu.memory_space<vmem>>, vector<16x16xf32>
    %1 = arith.truncf %0 : vector<16x16xf32> to vector<16x16xbf16>
    %c0_1 = arith.constant 0 : index
    %c0_2 = arith.constant 0 : index
    %2 = vector.load %arg1[%c0_1, %c0_2] : memref<16x64xbf16, #tpu.memory_space<vmem>>, vector<16x64xbf16>
    %cst = arith.constant dense<0.000000e+00> : vector<16x64xf32>
    %3 = tpu.matmul %1, %2, %cst {dimension_numbers = #tpu.dot_dimension_numbers<[1], [0], [0], [1], [0, 0, 1, 1], [], []>} : vector<16x16xbf16>, vector<16x64xbf16>, vector<16x64xf32> -> vector<16x64xf32>
    %c0_3 = arith.constant 0 : index
    %c0_4 = arith.constant 0 : index
    %4 = vector.load %arg6[%c0_3, %c0_4] : memref<24x512xf32, #tpu.memory_space<vmem>>, vector<1x64xf32>
    %5 = vector.broadcast %4 : vector<1x64xf32> to vector<16x64xf32>
    %6 = arith.addf %3, %5 : vector<16x64xf32>
    %7 = vector.extract_strided_slice %6 {offsets = [0, 0], sizes = [16, 32], strides = [1, 1]} : vector<16x64xf32> to vector<16x32xf32>
    %c1 = arith.constant 1 : index
    %c0_5 = arith.constant 0 : index
    %8 = vector.load %arg6[%c1, %c0_5] : memref<24x512xf32, #tpu.memory_space<vmem>>, vector<1x32xf32>
    %c2 = arith.constant 2 : index
    %c0_6 = arith.constant 0 : index
    %9 = vector.load %arg6[%c2, %c0_6] : memref<24x512xf32, #tpu.memory_space<vmem>>, vector<1x32xf32>
    %cst_7 = arith.constant dense<0.000000e+00> : vector<16xf32>
    %10 = vector.multi_reduction <add>, %7, %cst_7 [1] : vector<16x32xf32> to vector<16xf32>
    %11 = vector.shape_cast %10 : vector<16xf32> to vector<16x1xf32>
    %cst_8 = arith.constant 3.200000e+01 : f32
    %12 = vector.broadcast %cst_8 : f32 to vector<16x1xf32>
    %13 = arith.divf %11, %12 : vector<16x1xf32>
    %14 = arith.mulf %7, %7 : vector<16x32xf32>
    %cst_9 = arith.constant dense<0.000000e+00> : vector<16xf32>
    %15 = vector.multi_reduction <add>, %14, %cst_9 [1] : vector<16x32xf32> to vector<16xf32>
    %16 = vector.shape_cast %15 : vector<16xf32> to vector<16x1xf32>
    %cst_10 = arith.constant 3.200000e+01 : f32
    %17 = vector.broadcast %cst_10 : f32 to vector<16x1xf32>
    %18 = arith.divf %16, %17 : vector<16x1xf32>
    %19 = arith.mulf %13, %13 : vector<16x1xf32>
    %20 = arith.subf %18, %19 : vector<16x1xf32>
    %21 = vector.broadcast %13 : vector<16x1xf32> to vector<16x32xf32>
    %22 = arith.subf %7, %21 : vector<16x32xf32>
    %cst_11 = arith.constant 9.99999974E-6 : f32
    %23 = vector.broadcast %cst_11 : f32 to vector<16x1xf32>
    %24 = arith.addf %20, %23 : vector<16x1xf32>
    %25 = math.rsqrt %24 : vector<16x1xf32>
    %26 = vector.broadcast %25 : vector<16x1xf32> to vector<16x32xf32>
    %27 = arith.mulf %22, %26 : vector<16x32xf32>
    %28 = vector.broadcast %8 : vector<1x32xf32> to vector<16x32xf32>
    %29 = arith.mulf %27, %28 : vector<16x32xf32>
    %30 = vector.broadcast %9 : vector<1x32xf32> to vector<16x32xf32>
    %31 = arith.addf %29, %30 : vector<16x32xf32>
    %cst_12 = arith.constant 0.00999999977 : f32
    %32 = vector.broadcast %cst_12 : f32 to vector<16x32xf32>
    %33 = arith.mulf %32, %31 : vector<16x32xf32>
    %34 = arith.maximumf %31, %33 : vector<16x32xf32>
    %35 = vector.extract_strided_slice %6 {offsets = [0, 32], sizes = [16, 32], strides = [1, 1]} : vector<16x64xf32> to vector<16x32xf32>
    %c3 = arith.constant 3 : index
    %c0_13 = arith.constant 0 : index
    %36 = vector.load %arg6[%c3, %c0_13] : memref<24x512xf32, #tpu.memory_space<vmem>>, vector<1x32xf32>
    %c4 = arith.constant 4 : index
    %c0_14 = arith.constant 0 : index
    %37 = vector.load %arg6[%c4, %c0_14] : memref<24x512xf32, #tpu.memory_space<vmem>>, vector<1x32xf32>
    %cst_15 = arith.constant dense<0.000000e+00> : vector<16xf32>
    %38 = vector.multi_reduction <add>, %35, %cst_15 [1] : vector<16x32xf32> to vector<16xf32>
    %39 = vector.shape_cast %38 : vector<16xf32> to vector<16x1xf32>
    %cst_16 = arith.constant 3.200000e+01 : f32
    %40 = vector.broadcast %cst_16 : f32 to vector<16x1xf32>
    %41 = arith.divf %39, %40 : vector<16x1xf32>
    %42 = arith.mulf %35, %35 : vector<16x32xf32>
    %cst_17 = arith.constant dense<0.000000e+00> : vector<16xf32>
    %43 = vector.multi_reduction <add>, %42, %cst_17 [1] : vector<16x32xf32> to vector<16xf32>
    %44 = vector.shape_cast %43 : vector<16xf32> to vector<16x1xf32>
    %cst_18 = arith.constant 3.200000e+01 : f32
    %45 = vector.broadcast %cst_18 : f32 to vector<16x1xf32>
    %46 = arith.divf %44, %45 : vector<16x1xf32>
    %47 = arith.mulf %41, %41 : vector<16x1xf32>
    %48 = arith.subf %46, %47 : vector<16x1xf32>
    %49 = vector.broadcast %41 : vector<16x1xf32> to vector<16x32xf32>
    %50 = arith.subf %35, %49 : vector<16x32xf32>
    %cst_19 = arith.constant 9.99999974E-6 : f32
    %51 = vector.broadcast %cst_19 : f32 to vector<16x1xf32>
    %52 = arith.addf %48, %51 : vector<16x1xf32>
    %53 = math.rsqrt %52 : vector<16x1xf32>
    %54 = vector.broadcast %53 : vector<16x1xf32> to vector<16x32xf32>
    %55 = arith.mulf %50, %54 : vector<16x32xf32>
    %56 = vector.broadcast %36 : vector<1x32xf32> to vector<16x32xf32>
    %57 = arith.mulf %55, %56 : vector<16x32xf32>
    %58 = vector.broadcast %37 : vector<1x32xf32> to vector<16x32xf32>
    %59 = arith.addf %57, %58 : vector<16x32xf32>
    %cst_20 = arith.constant 0.00999999977 : f32
    %60 = vector.broadcast %cst_20 : f32 to vector<16x32xf32>
    %61 = arith.mulf %60, %59 : vector<16x32xf32>
    %62 = arith.maximumf %59, %61 : vector<16x32xf32>
    %63 = tpu.concatenate %34, %62 in 1 : vector<16x32xf32>, vector<16x32xf32> -> vector<16x64xf32>
    %64 = arith.truncf %63 : vector<16x64xf32> to vector<16x64xbf16>
    %c0_21 = arith.constant 0 : index
    %c0_22 = arith.constant 0 : index
    %65 = vector.load %arg2[%c0_21, %c0_22] : memref<128x64xbf16, #tpu.memory_space<vmem>>, vector<64x64xbf16>
    %cst_23 = arith.constant dense<0.000000e+00> : vector<16x64xf32>
    %66 = tpu.matmul %64, %65, %cst_23 {dimension_numbers = #tpu.dot_dimension_numbers<[1], [0], [0], [1], [0, 0, 1, 1], [], []>} : vector<16x64xbf16>, vector<64x64xbf16>, vector<16x64xf32> -> vector<16x64xf32>
    %c5 = arith.constant 5 : index
    %c0_24 = arith.constant 0 : index
    %67 = vector.load %arg6[%c5, %c0_24] : memref<24x512xf32, #tpu.memory_space<vmem>>, vector<1x64xf32>
    %68 = vector.broadcast %67 : vector<1x64xf32> to vector<16x64xf32>
    %69 = arith.addf %66, %68 : vector<16x64xf32>
    %70 = vector.extract_strided_slice %69 {offsets = [0, 0], sizes = [16, 32], strides = [1, 1]} : vector<16x64xf32> to vector<16x32xf32>
    %c6 = arith.constant 6 : index
    %c0_25 = arith.constant 0 : index
    %71 = vector.load %arg6[%c6, %c0_25] : memref<24x512xf32, #tpu.memory_space<vmem>>, vector<1x32xf32>
    %c7 = arith.constant 7 : index
    %c0_26 = arith.constant 0 : index
    %72 = vector.load %arg6[%c7, %c0_26] : memref<24x512xf32, #tpu.memory_space<vmem>>, vector<1x32xf32>
    %cst_27 = arith.constant dense<0.000000e+00> : vector<16xf32>
    %73 = vector.multi_reduction <add>, %70, %cst_27 [1] : vector<16x32xf32> to vector<16xf32>
    %74 = vector.shape_cast %73 : vector<16xf32> to vector<16x1xf32>
    %cst_28 = arith.constant 3.200000e+01 : f32
    %75 = vector.broadcast %cst_28 : f32 to vector<16x1xf32>
    %76 = arith.divf %74, %75 : vector<16x1xf32>
    %77 = arith.mulf %70, %70 : vector<16x32xf32>
    %cst_29 = arith.constant dense<0.000000e+00> : vector<16xf32>
    %78 = vector.multi_reduction <add>, %77, %cst_29 [1] : vector<16x32xf32> to vector<16xf32>
    %79 = vector.shape_cast %78 : vector<16xf32> to vector<16x1xf32>
    %cst_30 = arith.constant 3.200000e+01 : f32
    %80 = vector.broadcast %cst_30 : f32 to vector<16x1xf32>
    %81 = arith.divf %79, %80 : vector<16x1xf32>
    %82 = arith.mulf %76, %76 : vector<16x1xf32>
    %83 = arith.subf %81, %82 : vector<16x1xf32>
    %84 = vector.broadcast %76 : vector<16x1xf32> to vector<16x32xf32>
    %85 = arith.subf %70, %84 : vector<16x32xf32>
    %cst_31 = arith.constant 9.99999974E-6 : f32
    %86 = vector.broadcast %cst_31 : f32 to vector<16x1xf32>
    %87 = arith.addf %83, %86 : vector<16x1xf32>
    %88 = math.rsqrt %87 : vector<16x1xf32>
    %89 = vector.broadcast %88 : vector<16x1xf32> to vector<16x32xf32>
    %90 = arith.mulf %85, %89 : vector<16x32xf32>
    %91 = vector.broadcast %71 : vector<1x32xf32> to vector<16x32xf32>
    %92 = arith.mulf %90, %91 : vector<16x32xf32>
    %93 = vector.broadcast %72 : vector<1x32xf32> to vector<16x32xf32>
    %94 = arith.addf %92, %93 : vector<16x32xf32>
    %cst_32 = arith.constant 0.00999999977 : f32
    %95 = vector.broadcast %cst_32 : f32 to vector<16x32xf32>
    %96 = arith.mulf %95, %94 : vector<16x32xf32>
    %97 = arith.maximumf %94, %96 : vector<16x32xf32>
    %98 = vector.extract_strided_slice %69 {offsets = [0, 32], sizes = [16, 32], strides = [1, 1]} : vector<16x64xf32> to vector<16x32xf32>
    %c8 = arith.constant 8 : index
    %c0_33 = arith.constant 0 : index
    %99 = vector.load %arg6[%c8, %c0_33] : memref<24x512xf32, #tpu.memory_space<vmem>>, vector<1x32xf32>
    %c9 = arith.constant 9 : index
    %c0_34 = arith.constant 0 : index
    %100 = vector.load %arg6[%c9, %c0_34] : memref<24x512xf32, #tpu.memory_space<vmem>>, vector<1x32xf32>
    %cst_35 = arith.constant dense<0.000000e+00> : vector<16xf32>
    %101 = vector.multi_reduction <add>, %98, %cst_35 [1] : vector<16x32xf32> to vector<16xf32>
    %102 = vector.shape_cast %101 : vector<16xf32> to vector<16x1xf32>
    %cst_36 = arith.constant 3.200000e+01 : f32
    %103 = vector.broadcast %cst_36 : f32 to vector<16x1xf32>
    %104 = arith.divf %102, %103 : vector<16x1xf32>
    %105 = arith.mulf %98, %98 : vector<16x32xf32>
    %cst_37 = arith.constant dense<0.000000e+00> : vector<16xf32>
    %106 = vector.multi_reduction <add>, %105, %cst_37 [1] : vector<16x32xf32> to vector<16xf32>
    %107 = vector.shape_cast %106 : vector<16xf32> to vector<16x1xf32>
    %cst_38 = arith.constant 3.200000e+01 : f32
    %108 = vector.broadcast %cst_38 : f32 to vector<16x1xf32>
    %109 = arith.divf %107, %108 : vector<16x1xf32>
    %110 = arith.mulf %104, %104 : vector<16x1xf32>
    %111 = arith.subf %109, %110 : vector<16x1xf32>
    %112 = vector.broadcast %104 : vector<16x1xf32> to vector<16x32xf32>
    %113 = arith.subf %98, %112 : vector<16x32xf32>
    %cst_39 = arith.constant 9.99999974E-6 : f32
    %114 = vector.broadcast %cst_39 : f32 to vector<16x1xf32>
    %115 = arith.addf %111, %114 : vector<16x1xf32>
    %116 = math.rsqrt %115 : vector<16x1xf32>
    %117 = vector.broadcast %116 : vector<16x1xf32> to vector<16x32xf32>
    %118 = arith.mulf %113, %117 : vector<16x32xf32>
    %119 = vector.broadcast %99 : vector<1x32xf32> to vector<16x32xf32>
    %120 = arith.mulf %118, %119 : vector<16x32xf32>
    %121 = vector.broadcast %100 : vector<1x32xf32> to vector<16x32xf32>
    %122 = arith.addf %120, %121 : vector<16x32xf32>
    %cst_40 = arith.constant 0.00999999977 : f32
    %123 = vector.broadcast %cst_40 : f32 to vector<16x32xf32>
    %124 = arith.mulf %123, %122 : vector<16x32xf32>
    %125 = arith.maximumf %122, %124 : vector<16x32xf32>
    %126 = tpu.concatenate %97, %125 in 1 : vector<16x32xf32>, vector<16x32xf32> -> vector<16x64xf32>
    %127 = arith.truncf %126 : vector<16x64xf32> to vector<16x64xbf16>
    %c0_41 = arith.constant 0 : index
    %c0_42 = arith.constant 0 : index
    %128 = vector.load %arg3[%c0_41, %c0_42] : memref<96x96xbf16, #tpu.memory_space<vmem>>, vector<64x96xbf16>
    %cst_43 = arith.constant dense<0.000000e+00> : vector<16x96xf32>
    %129 = tpu.matmul %127, %128, %cst_43 {dimension_numbers = #tpu.dot_dimension_numbers<[1], [0], [0], [1], [0, 0, 1, 1], [], []>} : vector<16x64xbf16>, vector<64x96xbf16>, vector<16x96xf32> -> vector<16x96xf32>
    %c10 = arith.constant 10 : index
    %c0_44 = arith.constant 0 : index
    %130 = vector.load %arg6[%c10, %c0_44] : memref<24x512xf32, #tpu.memory_space<vmem>>, vector<1x96xf32>
    %131 = vector.broadcast %130 : vector<1x96xf32> to vector<16x96xf32>
    %132 = arith.addf %129, %131 : vector<16x96xf32>
    %c64 = arith.constant 64 : index
    %c0_45 = arith.constant 0 : index
    %133 = vector.load %arg3[%c64, %c0_45] : memref<96x96xbf16, #tpu.memory_space<vmem>>, vector<32x96xbf16>
    %c11 = arith.constant 11 : index
    %c0_46 = arith.constant 0 : index
    %134 = vector.load %arg6[%c11, %c0_46] : memref<24x512xf32, #tpu.memory_space<vmem>>, vector<1x96xf32>
    %cst_47 = arith.constant 0.000000e+00 : f32
    %135 = vector.broadcast %cst_47 : f32 to vector<2x32xf32>
    %136 = vector.extract_strided_slice %132 {offsets = [0, 0], sizes = [2, 96], strides = [1, 1]} : vector<16x96xf32> to vector<2x96xf32>
    %137 = arith.truncf %135 : vector<2x32xf32> to vector<2x32xbf16>
    %cst_48 = arith.constant dense<0.000000e+00> : vector<2x96xf32>
    %138 = tpu.matmul %137, %133, %cst_48 {dimension_numbers = #tpu.dot_dimension_numbers<[1], [0], [0], [1], [0, 0, 1, 1], [], []>} : vector<2x32xbf16>, vector<32x96xbf16>, vector<2x96xf32> -> vector<2x96xf32>
    %139 = vector.broadcast %134 : vector<1x96xf32> to vector<2x96xf32>
    %140 = arith.addf %138, %139 : vector<2x96xf32>
    %141 = vector.extract_strided_slice %136 {offsets = [0, 0], sizes = [2, 32], strides = [1, 1]} : vector<2x96xf32> to vector<2x32xf32>
    %142 = vector.extract_strided_slice %140 {offsets = [0, 0], sizes = [2, 32], strides = [1, 1]} : vector<2x96xf32> to vector<2x32xf32>
    %143 = arith.addf %141, %142 : vector<2x32xf32>
    %144 = arith.negf %143 : vector<2x32xf32>
    %145 = math.exp %144 : vector<2x32xf32>
    %cst_49 = arith.constant 1.000000e+00 : f32
    %146 = vector.broadcast %cst_49 : f32 to vector<2x32xf32>
    %147 = arith.addf %146, %145 : vector<2x32xf32>
    %148 = arith.divf %146, %147 : vector<2x32xf32>
    %149 = vector.extract_strided_slice %136 {offsets = [0, 32], sizes = [2, 32], strides = [1, 1]} : vector<2x96xf32> to vector<2x32xf32>
    %150 = vector.extract_strided_slice %140 {offsets = [0, 32], sizes = [2, 32], strides = [1, 1]} : vector<2x96xf32> to vector<2x32xf32>
    %151 = arith.addf %149, %150 : vector<2x32xf32>
    %152 = arith.negf %151 : vector<2x32xf32>
    %153 = math.exp %152 : vector<2x32xf32>
    %cst_50 = arith.constant 1.000000e+00 : f32
    %154 = vector.broadcast %cst_50 : f32 to vector<2x32xf32>
    %155 = arith.addf %154, %153 : vector<2x32xf32>
    %156 = arith.divf %154, %155 : vector<2x32xf32>
    %157 = vector.extract_strided_slice %136 {offsets = [0, 64], sizes = [2, 32], strides = [1, 1]} : vector<2x96xf32> to vector<2x32xf32>
    %158 = vector.extract_strided_slice %140 {offsets = [0, 64], sizes = [2, 32], strides = [1, 1]} : vector<2x96xf32> to vector<2x32xf32>
    %159 = arith.mulf %148, %158 : vector<2x32xf32>
    %160 = arith.addf %157, %159 : vector<2x32xf32>
    %161 = math.tanh %160 : vector<2x32xf32>
    %cst_51 = arith.constant 1.000000e+00 : f32
    %162 = vector.broadcast %cst_51 : f32 to vector<2x32xf32>
    %163 = arith.subf %162, %156 : vector<2x32xf32>
    %164 = arith.mulf %163, %161 : vector<2x32xf32>
    %165 = arith.mulf %156, %135 : vector<2x32xf32>
    %166 = arith.addf %164, %165 : vector<2x32xf32>
    %c0_52 = arith.constant 0 : index
    %c0_53 = arith.constant 0 : index
    %167 = vector.load %arg8[%c0_52, %c0_53] : memref<16x32xf32, #tpu.memory_space<vmem>>, vector<2x32xf32>
    tpu.vector_store %arg8[%c0_52, %c0_53], %166 {strides = array<i32>} : memref<16x32xf32, #tpu.memory_space<vmem>>, vector<2x32xf32>,
    %168 = vector.extract_strided_slice %132 {offsets = [2, 0], sizes = [2, 96], strides = [1, 1]} : vector<16x96xf32> to vector<2x96xf32>
    %169 = arith.truncf %166 : vector<2x32xf32> to vector<2x32xbf16>
    %cst_54 = arith.constant dense<0.000000e+00> : vector<2x96xf32>
    %170 = tpu.matmul %169, %133, %cst_54 {dimension_numbers = #tpu.dot_dimension_numbers<[1], [0], [0], [1], [0, 0, 1, 1], [], []>} : vector<2x32xbf16>, vector<32x96xbf16>, vector<2x96xf32> -> vector<2x96xf32>
    %171 = vector.broadcast %134 : vector<1x96xf32> to vector<2x96xf32>
    %172 = arith.addf %170, %171 : vector<2x96xf32>
    %173 = vector.extract_strided_slice %168 {offsets = [0, 0], sizes = [2, 32], strides = [1, 1]} : vector<2x96xf32> to vector<2x32xf32>
    %174 = vector.extract_strided_slice %172 {offsets = [0, 0], sizes = [2, 32], strides = [1, 1]} : vector<2x96xf32> to vector<2x32xf32>
    %175 = arith.addf %173, %174 : vector<2x32xf32>
    %176 = arith.negf %175 : vector<2x32xf32>
    %177 = math.exp %176 : vector<2x32xf32>
    %cst_55 = arith.constant 1.000000e+00 : f32
    %178 = vector.broadcast %cst_55 : f32 to vector<2x32xf32>
    %179 = arith.addf %178, %177 : vector<2x32xf32>
    %180 = arith.divf %178, %179 : vector<2x32xf32>
    %181 = vector.extract_strided_slice %168 {offsets = [0, 32], sizes = [2, 32], strides = [1, 1]} : vector<2x96xf32> to vector<2x32xf32>
    %182 = vector.extract_strided_slice %172 {offsets = [0, 32], sizes = [2, 32], strides = [1, 1]} : vector<2x96xf32> to vector<2x32xf32>
    %183 = arith.addf %181, %182 : vector<2x32xf32>
    %184 = arith.negf %183 : vector<2x32xf32>
    %185 = math.exp %184 : vector<2x32xf32>
    %cst_56 = arith.constant 1.000000e+00 : f32
    %186 = vector.broadcast %cst_56 : f32 to vector<2x32xf32>
    %187 = arith.addf %186, %185 : vector<2x32xf32>
    %188 = arith.divf %186, %187 : vector<2x32xf32>
    %189 = vector.extract_strided_slice %168 {offsets = [0, 64], sizes = [2, 32], strides = [1, 1]} : vector<2x96xf32> to vector<2x32xf32>
    %190 = vector.extract_strided_slice %172 {offsets = [0, 64], sizes = [2, 32], strides = [1, 1]} : vector<2x96xf32> to vector<2x32xf32>
    %191 = arith.mulf %180, %190 : vector<2x32xf32>
    %192 = arith.addf %189, %191 : vector<2x32xf32>
    %193 = math.tanh %192 : vector<2x32xf32>
    %cst_57 = arith.constant 1.000000e+00 : f32
    %194 = vector.broadcast %cst_57 : f32 to vector<2x32xf32>
    %195 = arith.subf %194, %188 : vector<2x32xf32>
    %196 = arith.mulf %195, %193 : vector<2x32xf32>
    %197 = arith.mulf %188, %166 : vector<2x32xf32>
    %198 = arith.addf %196, %197 : vector<2x32xf32>
    %c2_58 = arith.constant 2 : index
    %c0_59 = arith.constant 0 : index
    %199 = vector.load %arg8[%c2_58, %c0_59] : memref<16x32xf32, #tpu.memory_space<vmem>>, vector<2x32xf32>
    tpu.vector_store %arg8[%c2_58, %c0_59], %198 {strides = array<i32>} : memref<16x32xf32, #tpu.memory_space<vmem>>, vector<2x32xf32>,
    %200 = vector.extract_strided_slice %132 {offsets = [4, 0], sizes = [2, 96], strides = [1, 1]} : vector<16x96xf32> to vector<2x96xf32>
    %201 = arith.truncf %198 : vector<2x32xf32> to vector<2x32xbf16>
    %cst_60 = arith.constant dense<0.000000e+00> : vector<2x96xf32>
    %202 = tpu.matmul %201, %133, %cst_60 {dimension_numbers = #tpu.dot_dimension_numbers<[1], [0], [0], [1], [0, 0, 1, 1], [], []>} : vector<2x32xbf16>, vector<32x96xbf16>, vector<2x96xf32> -> vector<2x96xf32>
    %203 = vector.broadcast %134 : vector<1x96xf32> to vector<2x96xf32>
    %204 = arith.addf %202, %203 : vector<2x96xf32>
    %205 = vector.extract_strided_slice %200 {offsets = [0, 0], sizes = [2, 32], strides = [1, 1]} : vector<2x96xf32> to vector<2x32xf32>
    %206 = vector.extract_strided_slice %204 {offsets = [0, 0], sizes = [2, 32], strides = [1, 1]} : vector<2x96xf32> to vector<2x32xf32>
    %207 = arith.addf %205, %206 : vector<2x32xf32>
    %208 = arith.negf %207 : vector<2x32xf32>
    %209 = math.exp %208 : vector<2x32xf32>
    %cst_61 = arith.constant 1.000000e+00 : f32
    %210 = vector.broadcast %cst_61 : f32 to vector<2x32xf32>
    %211 = arith.addf %210, %209 : vector<2x32xf32>
    %212 = arith.divf %210, %211 : vector<2x32xf32>
    %213 = vector.extract_strided_slice %200 {offsets = [0, 32], sizes = [2, 32], strides = [1, 1]} : vector<2x96xf32> to vector<2x32xf32>
    %214 = vector.extract_strided_slice %204 {offsets = [0, 32], sizes = [2, 32], strides = [1, 1]} : vector<2x96xf32> to vector<2x32xf32>
    %215 = arith.addf %213, %214 : vector<2x32xf32>
    %216 = arith.negf %215 : vector<2x32xf32>
    %217 = math.exp %216 : vector<2x32xf32>
    %cst_62 = arith.constant 1.000000e+00 : f32
    %218 = vector.broadcast %cst_62 : f32 to vector<2x32xf32>
    %219 = arith.addf %218, %217 : vector<2x32xf32>
    %220 = arith.divf %218, %219 : vector<2x32xf32>
    %221 = vector.extract_strided_slice %200 {offsets = [0, 64], sizes = [2, 32], strides = [1, 1]} : vector<2x96xf32> to vector<2x32xf32>
    %222 = vector.extract_strided_slice %204 {offsets = [0, 64], sizes = [2, 32], strides = [1, 1]} : vector<2x96xf32> to vector<2x32xf32>
    %223 = arith.mulf %212, %222 : vector<2x32xf32>
    %224 = arith.addf %221, %223 : vector<2x32xf32>
    %225 = math.tanh %224 : vector<2x32xf32>
    %cst_63 = arith.constant 1.000000e+00 : f32
    %226 = vector.broadcast %cst_63 : f32 to vector<2x32xf32>
    %227 = arith.subf %226, %220 : vector<2x32xf32>
    %228 = arith.mulf %227, %225 : vector<2x32xf32>
    %229 = arith.mulf %220, %198 : vector<2x32xf32>
    %230 = arith.addf %228, %229 : vector<2x32xf32>
    %c4_64 = arith.constant 4 : index
    %c0_65 = arith.constant 0 : index
    %231 = vector.load %arg8[%c4_64, %c0_65] : memref<16x32xf32, #tpu.memory_space<vmem>>, vector<2x32xf32>
    tpu.vector_store %arg8[%c4_64, %c0_65], %230 {strides = array<i32>} : memref<16x32xf32, #tpu.memory_space<vmem>>, vector<2x32xf32>,
    %232 = vector.extract_strided_slice %132 {offsets = [6, 0], sizes = [2, 96], strides = [1, 1]} : vector<16x96xf32> to vector<2x96xf32>
    %233 = arith.truncf %230 : vector<2x32xf32> to vector<2x32xbf16>
    %cst_66 = arith.constant dense<0.000000e+00> : vector<2x96xf32>
    %234 = tpu.matmul %233, %133, %cst_66 {dimension_numbers = #tpu.dot_dimension_numbers<[1], [0], [0], [1], [0, 0, 1, 1], [], []>} : vector<2x32xbf16>, vector<32x96xbf16>, vector<2x96xf32> -> vector<2x96xf32>
    %235 = vector.broadcast %134 : vector<1x96xf32> to vector<2x96xf32>
    %236 = arith.addf %234, %235 : vector<2x96xf32>
    %237 = vector.extract_strided_slice %232 {offsets = [0, 0], sizes = [2, 32], strides = [1, 1]} : vector<2x96xf32> to vector<2x32xf32>
    %238 = vector.extract_strided_slice %236 {offsets = [0, 0], sizes = [2, 32], strides = [1, 1]} : vector<2x96xf32> to vector<2x32xf32>
    %239 = arith.addf %237, %238 : vector<2x32xf32>
    %240 = arith.negf %239 : vector<2x32xf32>
    %241 = math.exp %240 : vector<2x32xf32>
    %cst_67 = arith.constant 1.000000e+00 : f32
    %242 = vector.broadcast %cst_67 : f32 to vector<2x32xf32>
    %243 = arith.addf %242, %241 : vector<2x32xf32>
    %244 = arith.divf %242, %243 : vector<2x32xf32>
    %245 = vector.extract_strided_slice %232 {offsets = [0, 32], sizes = [2, 32], strides = [1, 1]} : vector<2x96xf32> to vector<2x32xf32>
    %246 = vector.extract_strided_slice %236 {offsets = [0, 32], sizes = [2, 32], strides = [1, 1]} : vector<2x96xf32> to vector<2x32xf32>
    %247 = arith.addf %245, %246 : vector<2x32xf32>
    %248 = arith.negf %247 : vector<2x32xf32>
    %249 = math.exp %248 : vector<2x32xf32>
    %cst_68 = arith.constant 1.000000e+00 : f32
    %250 = vector.broadcast %cst_68 : f32 to vector<2x32xf32>
    %251 = arith.addf %250, %249 : vector<2x32xf32>
    %252 = arith.divf %250, %251 : vector<2x32xf32>
    %253 = vector.extract_strided_slice %232 {offsets = [0, 64], sizes = [2, 32], strides = [1, 1]} : vector<2x96xf32> to vector<2x32xf32>
    %254 = vector.extract_strided_slice %236 {offsets = [0, 64], sizes = [2, 32], strides = [1, 1]} : vector<2x96xf32> to vector<2x32xf32>
    %255 = arith.mulf %244, %254 : vector<2x32xf32>
    %256 = arith.addf %253, %255 : vector<2x32xf32>
    %257 = math.tanh %256 : vector<2x32xf32>
    %cst_69 = arith.constant 1.000000e+00 : f32
    %258 = vector.broadcast %cst_69 : f32 to vector<2x32xf32>
    %259 = arith.subf %258, %252 : vector<2x32xf32>
    %260 = arith.mulf %259, %257 : vector<2x32xf32>
    %261 = arith.mulf %252, %230 : vector<2x32xf32>
    %262 = arith.addf %260, %261 : vector<2x32xf32>
    %c6_70 = arith.constant 6 : index
    %c0_71 = arith.constant 0 : index
    %263 = vector.load %arg8[%c6_70, %c0_71] : memref<16x32xf32, #tpu.memory_space<vmem>>, vector<2x32xf32>
    tpu.vector_store %arg8[%c6_70, %c0_71], %262 {strides = array<i32>} : memref<16x32xf32, #tpu.memory_space<vmem>>, vector<2x32xf32>,
    %264 = vector.extract_strided_slice %132 {offsets = [8, 0], sizes = [2, 96], strides = [1, 1]} : vector<16x96xf32> to vector<2x96xf32>
    %265 = arith.truncf %262 : vector<2x32xf32> to vector<2x32xbf16>
    %cst_72 = arith.constant dense<0.000000e+00> : vector<2x96xf32>
    %266 = tpu.matmul %265, %133, %cst_72 {dimension_numbers = #tpu.dot_dimension_numbers<[1], [0], [0], [1], [0, 0, 1, 1], [], []>} : vector<2x32xbf16>, vector<32x96xbf16>, vector<2x96xf32> -> vector<2x96xf32>
    %267 = vector.broadcast %134 : vector<1x96xf32> to vector<2x96xf32>
    %268 = arith.addf %266, %267 : vector<2x96xf32>
    %269 = vector.extract_strided_slice %264 {offsets = [0, 0], sizes = [2, 32], strides = [1, 1]} : vector<2x96xf32> to vector<2x32xf32>
    %270 = vector.extract_strided_slice %268 {offsets = [0, 0], sizes = [2, 32], strides = [1, 1]} : vector<2x96xf32> to vector<2x32xf32>
    %271 = arith.addf %269, %270 : vector<2x32xf32>
    %272 = arith.negf %271 : vector<2x32xf32>
    %273 = math.exp %272 : vector<2x32xf32>
    %cst_73 = arith.constant 1.000000e+00 : f32
    %274 = vector.broadcast %cst_73 : f32 to vector<2x32xf32>
    %275 = arith.addf %274, %273 : vector<2x32xf32>
    %276 = arith.divf %274, %275 : vector<2x32xf32>
    %277 = vector.extract_strided_slice %264 {offsets = [0, 32], sizes = [2, 32], strides = [1, 1]} : vector<2x96xf32> to vector<2x32xf32>
    %278 = vector.extract_strided_slice %268 {offsets = [0, 32], sizes = [2, 32], strides = [1, 1]} : vector<2x96xf32> to vector<2x32xf32>
    %279 = arith.addf %277, %278 : vector<2x32xf32>
    %280 = arith.negf %279 : vector<2x32xf32>
    %281 = math.exp %280 : vector<2x32xf32>
    %cst_74 = arith.constant 1.000000e+00 : f32
    %282 = vector.broadcast %cst_74 : f32 to vector<2x32xf32>
    %283 = arith.addf %282, %281 : vector<2x32xf32>
    %284 = arith.divf %282, %283 : vector<2x32xf32>
    %285 = vector.extract_strided_slice %264 {offsets = [0, 64], sizes = [2, 32], strides = [1, 1]} : vector<2x96xf32> to vector<2x32xf32>
    %286 = vector.extract_strided_slice %268 {offsets = [0, 64], sizes = [2, 32], strides = [1, 1]} : vector<2x96xf32> to vector<2x32xf32>
    %287 = arith.mulf %276, %286 : vector<2x32xf32>
    %288 = arith.addf %285, %287 : vector<2x32xf32>
    %289 = math.tanh %288 : vector<2x32xf32>
    %cst_75 = arith.constant 1.000000e+00 : f32
    %290 = vector.broadcast %cst_75 : f32 to vector<2x32xf32>
    %291 = arith.subf %290, %284 : vector<2x32xf32>
    %292 = arith.mulf %291, %289 : vector<2x32xf32>
    %293 = arith.mulf %284, %262 : vector<2x32xf32>
    %294 = arith.addf %292, %293 : vector<2x32xf32>
    %c8_76 = arith.constant 8 : index
    %c0_77 = arith.constant 0 : index
    %295 = vector.load %arg8[%c8_76, %c0_77] : memref<16x32xf32, #tpu.memory_space<vmem>>, vector<2x32xf32>
    tpu.vector_store %arg8[%c8_76, %c0_77], %294 {strides = array<i32>} : memref<16x32xf32, #tpu.memory_space<vmem>>, vector<2x32xf32>,
    %296 = vector.extract_strided_slice %132 {offsets = [10, 0], sizes = [2, 96], strides = [1, 1]} : vector<16x96xf32> to vector<2x96xf32>
    %297 = arith.truncf %294 : vector<2x32xf32> to vector<2x32xbf16>
    %cst_78 = arith.constant dense<0.000000e+00> : vector<2x96xf32>
    %298 = tpu.matmul %297, %133, %cst_78 {dimension_numbers = #tpu.dot_dimension_numbers<[1], [0], [0], [1], [0, 0, 1, 1], [], []>} : vector<2x32xbf16>, vector<32x96xbf16>, vector<2x96xf32> -> vector<2x96xf32>
    %299 = vector.broadcast %134 : vector<1x96xf32> to vector<2x96xf32>
    %300 = arith.addf %298, %299 : vector<2x96xf32>
    %301 = vector.extract_strided_slice %296 {offsets = [0, 0], sizes = [2, 32], strides = [1, 1]} : vector<2x96xf32> to vector<2x32xf32>
    %302 = vector.extract_strided_slice %300 {offsets = [0, 0], sizes = [2, 32], strides = [1, 1]} : vector<2x96xf32> to vector<2x32xf32>
    %303 = arith.addf %301, %302 : vector<2x32xf32>
    %304 = arith.negf %303 : vector<2x32xf32>
    %305 = math.exp %304 : vector<2x32xf32>
    %cst_79 = arith.constant 1.000000e+00 : f32
    %306 = vector.broadcast %cst_79 : f32 to vector<2x32xf32>
    %307 = arith.addf %306, %305 : vector<2x32xf32>
    %308 = arith.divf %306, %307 : vector<2x32xf32>
    %309 = vector.extract_strided_slice %296 {offsets = [0, 32], sizes = [2, 32], strides = [1, 1]} : vector<2x96xf32> to vector<2x32xf32>
    %310 = vector.extract_strided_slice %300 {offsets = [0, 32], sizes = [2, 32], strides = [1, 1]} : vector<2x96xf32> to vector<2x32xf32>
    %311 = arith.addf %309, %310 : vector<2x32xf32>
    %312 = arith.negf %311 : vector<2x32xf32>
    %313 = math.exp %312 : vector<2x32xf32>
    %cst_80 = arith.constant 1.000000e+00 : f32
    %314 = vector.broadcast %cst_80 : f32 to vector<2x32xf32>
    %315 = arith.addf %314, %313 : vector<2x32xf32>
    %316 = arith.divf %314, %315 : vector<2x32xf32>
    %317 = vector.extract_strided_slice %296 {offsets = [0, 64], sizes = [2, 32], strides = [1, 1]} : vector<2x96xf32> to vector<2x32xf32>
    %318 = vector.extract_strided_slice %300 {offsets = [0, 64], sizes = [2, 32], strides = [1, 1]} : vector<2x96xf32> to vector<2x32xf32>
    %319 = arith.mulf %308, %318 : vector<2x32xf32>
    %320 = arith.addf %317, %319 : vector<2x32xf32>
    %321 = math.tanh %320 : vector<2x32xf32>
    %cst_81 = arith.constant 1.000000e+00 : f32
    %322 = vector.broadcast %cst_81 : f32 to vector<2x32xf32>
    %323 = arith.subf %322, %316 : vector<2x32xf32>
    %324 = arith.mulf %323, %321 : vector<2x32xf32>
    %325 = arith.mulf %316, %294 : vector<2x32xf32>
    %326 = arith.addf %324, %325 : vector<2x32xf32>
    %c10_82 = arith.constant 10 : index
    %c0_83 = arith.constant 0 : index
    %327 = vector.load %arg8[%c10_82, %c0_83] : memref<16x32xf32, #tpu.memory_space<vmem>>, vector<2x32xf32>
    tpu.vector_store %arg8[%c10_82, %c0_83], %326 {strides = array<i32>} : memref<16x32xf32, #tpu.memory_space<vmem>>, vector<2x32xf32>,
    %328 = vector.extract_strided_slice %132 {offsets = [12, 0], sizes = [2, 96], strides = [1, 1]} : vector<16x96xf32> to vector<2x96xf32>
    %329 = arith.truncf %326 : vector<2x32xf32> to vector<2x32xbf16>
    %cst_84 = arith.constant dense<0.000000e+00> : vector<2x96xf32>
    %330 = tpu.matmul %329, %133, %cst_84 {dimension_numbers = #tpu.dot_dimension_numbers<[1], [0], [0], [1], [0, 0, 1, 1], [], []>} : vector<2x32xbf16>, vector<32x96xbf16>, vector<2x96xf32> -> vector<2x96xf32>
    %331 = vector.broadcast %134 : vector<1x96xf32> to vector<2x96xf32>
    %332 = arith.addf %330, %331 : vector<2x96xf32>
    %333 = vector.extract_strided_slice %328 {offsets = [0, 0], sizes = [2, 32], strides = [1, 1]} : vector<2x96xf32> to vector<2x32xf32>
    %334 = vector.extract_strided_slice %332 {offsets = [0, 0], sizes = [2, 32], strides = [1, 1]} : vector<2x96xf32> to vector<2x32xf32>
    %335 = arith.addf %333, %334 : vector<2x32xf32>
    %336 = arith.negf %335 : vector<2x32xf32>
    %337 = math.exp %336 : vector<2x32xf32>
    %cst_85 = arith.constant 1.000000e+00 : f32
    %338 = vector.broadcast %cst_85 : f32 to vector<2x32xf32>
    %339 = arith.addf %338, %337 : vector<2x32xf32>
    %340 = arith.divf %338, %339 : vector<2x32xf32>
    %341 = vector.extract_strided_slice %328 {offsets = [0, 32], sizes = [2, 32], strides = [1, 1]} : vector<2x96xf32> to vector<2x32xf32>
    %342 = vector.extract_strided_slice %332 {offsets = [0, 32], sizes = [2, 32], strides = [1, 1]} : vector<2x96xf32> to vector<2x32xf32>
    %343 = arith.addf %341, %342 : vector<2x32xf32>
    %344 = arith.negf %343 : vector<2x32xf32>
    %345 = math.exp %344 : vector<2x32xf32>
    %cst_86 = arith.constant 1.000000e+00 : f32
    %346 = vector.broadcast %cst_86 : f32 to vector<2x32xf32>
    %347 = arith.addf %346, %345 : vector<2x32xf32>
    %348 = arith.divf %346, %347 : vector<2x32xf32>
    %349 = vector.extract_strided_slice %328 {offsets = [0, 64], sizes = [2, 32], strides = [1, 1]} : vector<2x96xf32> to vector<2x32xf32>
    %350 = vector.extract_strided_slice %332 {offsets = [0, 64], sizes = [2, 32], strides = [1, 1]} : vector<2x96xf32> to vector<2x32xf32>
    %351 = arith.mulf %340, %350 : vector<2x32xf32>
    %352 = arith.addf %349, %351 : vector<2x32xf32>
    %353 = math.tanh %352 : vector<2x32xf32>
    %cst_87 = arith.constant 1.000000e+00 : f32
    %354 = vector.broadcast %cst_87 : f32 to vector<2x32xf32>
    %355 = arith.subf %354, %348 : vector<2x32xf32>
    %356 = arith.mulf %355, %353 : vector<2x32xf32>
    %357 = arith.mulf %348, %326 : vector<2x32xf32>
    %358 = arith.addf %356, %357 : vector<2x32xf32>
    %c12 = arith.constant 12 : index
    %c0_88 = arith.constant 0 : index
    %359 = vector.load %arg8[%c12, %c0_88] : memref<16x32xf32, #tpu.memory_space<vmem>>, vector<2x32xf32>
    tpu.vector_store %arg8[%c12, %c0_88], %358 {strides = array<i32>} : memref<16x32xf32, #tpu.memory_space<vmem>>, vector<2x32xf32>,
    %360 = vector.extract_strided_slice %132 {offsets = [14, 0], sizes = [2, 96], strides = [1, 1]} : vector<16x96xf32> to vector<2x96xf32>
    %361 = arith.truncf %358 : vector<2x32xf32> to vector<2x32xbf16>
    %cst_89 = arith.constant dense<0.000000e+00> : vector<2x96xf32>
    %362 = tpu.matmul %361, %133, %cst_89 {dimension_numbers = #tpu.dot_dimension_numbers<[1], [0], [0], [1], [0, 0, 1, 1], [], []>} : vector<2x32xbf16>, vector<32x96xbf16>, vector<2x96xf32> -> vector<2x96xf32>
    %363 = vector.broadcast %134 : vector<1x96xf32> to vector<2x96xf32>
    %364 = arith.addf %362, %363 : vector<2x96xf32>
    %365 = vector.extract_strided_slice %360 {offsets = [0, 0], sizes = [2, 32], strides = [1, 1]} : vector<2x96xf32> to vector<2x32xf32>
    %366 = vector.extract_strided_slice %364 {offsets = [0, 0], sizes = [2, 32], strides = [1, 1]} : vector<2x96xf32> to vector<2x32xf32>
    %367 = arith.addf %365, %366 : vector<2x32xf32>
    %368 = arith.negf %367 : vector<2x32xf32>
    %369 = math.exp %368 : vector<2x32xf32>
    %cst_90 = arith.constant 1.000000e+00 : f32
    %370 = vector.broadcast %cst_90 : f32 to vector<2x32xf32>
    %371 = arith.addf %370, %369 : vector<2x32xf32>
    %372 = arith.divf %370, %371 : vector<2x32xf32>
    %373 = vector.extract_strided_slice %360 {offsets = [0, 32], sizes = [2, 32], strides = [1, 1]} : vector<2x96xf32> to vector<2x32xf32>
    %374 = vector.extract_strided_slice %364 {offsets = [0, 32], sizes = [2, 32], strides = [1, 1]} : vector<2x96xf32> to vector<2x32xf32>
    %375 = arith.addf %373, %374 : vector<2x32xf32>
    %376 = arith.negf %375 : vector<2x32xf32>
    %377 = math.exp %376 : vector<2x32xf32>
    %cst_91 = arith.constant 1.000000e+00 : f32
    %378 = vector.broadcast %cst_91 : f32 to vector<2x32xf32>
    %379 = arith.addf %378, %377 : vector<2x32xf32>
    %380 = arith.divf %378, %379 : vector<2x32xf32>
    %381 = vector.extract_strided_slice %360 {offsets = [0, 64], sizes = [2, 32], strides = [1, 1]} : vector<2x96xf32> to vector<2x32xf32>
    %382 = vector.extract_strided_slice %364 {offsets = [0, 64], sizes = [2, 32], strides = [1, 1]} : vector<2x96xf32> to vector<2x32xf32>
    %383 = arith.mulf %372, %382 : vector<2x32xf32>
    %384 = arith.addf %381, %383 : vector<2x32xf32>
    %385 = math.tanh %384 : vector<2x32xf32>
    %cst_92 = arith.constant 1.000000e+00 : f32
    %386 = vector.broadcast %cst_92 : f32 to vector<2x32xf32>
    %387 = arith.subf %386, %380 : vector<2x32xf32>
    %388 = arith.mulf %387, %385 : vector<2x32xf32>
    %389 = arith.mulf %380, %358 : vector<2x32xf32>
    %390 = arith.addf %388, %389 : vector<2x32xf32>
    %c14 = arith.constant 14 : index
    %c0_93 = arith.constant 0 : index
    %391 = vector.load %arg8[%c14, %c0_93] : memref<16x32xf32, #tpu.memory_space<vmem>>, vector<2x32xf32>
    tpu.vector_store %arg8[%c14, %c0_93], %390 {strides = array<i32>} : memref<16x32xf32, #tpu.memory_space<vmem>>, vector<2x32xf32>,
    %c0_94 = arith.constant 0 : index
    %c0_95 = arith.constant 0 : index
    %392 = vector.load %arg8[%c0_94, %c0_95] : memref<16x32xf32, #tpu.memory_space<vmem>>, vector<16x32xf32>
    %c0_96 = arith.constant 0 : index
    %c0_97 = arith.constant 0 : index
    %393 = vector.load %arg4[%c0_96, %c0_97] : memref<96x64xbf16, #tpu.memory_space<vmem>>, vector<64x64xbf16>
    %cst_98 = arith.constant dense<0.000000e+00> : vector<16x64xf32>
    %394 = tpu.matmul %127, %393, %cst_98 {dimension_numbers = #tpu.dot_dimension_numbers<[1], [0], [0], [1], [0, 0, 1, 1], [], []>} : vector<16x64xbf16>, vector<64x64xbf16>, vector<16x64xf32> -> vector<16x64xf32>
    %395 = arith.truncf %392 : vector<16x32xf32> to vector<16x32xbf16>
    %c64_99 = arith.constant 64 : index
    %c0_100 = arith.constant 0 : index
    %396 = vector.load %arg4[%c64_99, %c0_100] : memref<96x64xbf16, #tpu.memory_space<vmem>>, vector<32x64xbf16>
    %cst_101 = arith.constant dense<0.000000e+00> : vector<16x64xf32>
    %397 = tpu.matmul %395, %396, %cst_101 {dimension_numbers = #tpu.dot_dimension_numbers<[1], [0], [0], [1], [0, 0, 1, 1], [], []>} : vector<16x32xbf16>, vector<32x64xbf16>, vector<16x64xf32> -> vector<16x64xf32>
    %398 = arith.addf %394, %397 : vector<16x64xf32>
    %c12_102 = arith.constant 12 : index
    %c0_103 = arith.constant 0 : index
    %399 = vector.load %arg6[%c12_102, %c0_103] : memref<24x512xf32, #tpu.memory_space<vmem>>, vector<1x64xf32>
    %400 = vector.broadcast %399 : vector<1x64xf32> to vector<16x64xf32>
    %401 = arith.addf %398, %400 : vector<16x64xf32>
    %402 = vector.extract_strided_slice %401 {offsets = [0, 0], sizes = [16, 32], strides = [1, 1]} : vector<16x64xf32> to vector<16x32xf32>
    %c13 = arith.constant 13 : index
    %c0_104 = arith.constant 0 : index
    %403 = vector.load %arg6[%c13, %c0_104] : memref<24x512xf32, #tpu.memory_space<vmem>>, vector<1x32xf32>
    %c14_105 = arith.constant 14 : index
    %c0_106 = arith.constant 0 : index
    %404 = vector.load %arg6[%c14_105, %c0_106] : memref<24x512xf32, #tpu.memory_space<vmem>>, vector<1x32xf32>
    %cst_107 = arith.constant dense<0.000000e+00> : vector<16xf32>
    %405 = vector.multi_reduction <add>, %402, %cst_107 [1] : vector<16x32xf32> to vector<16xf32>
    %406 = vector.shape_cast %405 : vector<16xf32> to vector<16x1xf32>
    %cst_108 = arith.constant 3.200000e+01 : f32
    %407 = vector.broadcast %cst_108 : f32 to vector<16x1xf32>
    %408 = arith.divf %406, %407 : vector<16x1xf32>
    %409 = arith.mulf %402, %402 : vector<16x32xf32>
    %cst_109 = arith.constant dense<0.000000e+00> : vector<16xf32>
    %410 = vector.multi_reduction <add>, %409, %cst_109 [1] : vector<16x32xf32> to vector<16xf32>
    %411 = vector.shape_cast %410 : vector<16xf32> to vector<16x1xf32>
    %cst_110 = arith.constant 3.200000e+01 : f32
    %412 = vector.broadcast %cst_110 : f32 to vector<16x1xf32>
    %413 = arith.divf %411, %412 : vector<16x1xf32>
    %414 = arith.mulf %408, %408 : vector<16x1xf32>
    %415 = arith.subf %413, %414 : vector<16x1xf32>
    %416 = vector.broadcast %408 : vector<16x1xf32> to vector<16x32xf32>
    %417 = arith.subf %402, %416 : vector<16x32xf32>
    %cst_111 = arith.constant 9.99999974E-6 : f32
    %418 = vector.broadcast %cst_111 : f32 to vector<16x1xf32>
    %419 = arith.addf %415, %418 : vector<16x1xf32>
    %420 = math.rsqrt %419 : vector<16x1xf32>
    %421 = vector.broadcast %420 : vector<16x1xf32> to vector<16x32xf32>
    %422 = arith.mulf %417, %421 : vector<16x32xf32>
    %423 = vector.broadcast %403 : vector<1x32xf32> to vector<16x32xf32>
    %424 = arith.mulf %422, %423 : vector<16x32xf32>
    %425 = vector.broadcast %404 : vector<1x32xf32> to vector<16x32xf32>
    %426 = arith.addf %424, %425 : vector<16x32xf32>
    %cst_112 = arith.constant 0.00999999977 : f32
    %427 = vector.broadcast %cst_112 : f32 to vector<16x32xf32>
    %428 = arith.mulf %427, %426 : vector<16x32xf32>
    %429 = arith.maximumf %426, %428 : vector<16x32xf32>
    %430 = vector.extract_strided_slice %401 {offsets = [0, 32], sizes = [16, 32], strides = [1, 1]} : vector<16x64xf32> to vector<16x32xf32>
    %c15 = arith.constant 15 : index
    %c0_113 = arith.constant 0 : index
    %431 = vector.load %arg6[%c15, %c0_113] : memref<24x512xf32, #tpu.memory_space<vmem>>, vector<1x32xf32>
    %c16 = arith.constant 16 : index
    %c0_114 = arith.constant 0 : index
    %432 = vector.load %arg6[%c16, %c0_114] : memref<24x512xf32, #tpu.memory_space<vmem>>, vector<1x32xf32>
    %cst_115 = arith.constant dense<0.000000e+00> : vector<16xf32>
    %433 = vector.multi_reduction <add>, %430, %cst_115 [1] : vector<16x32xf32> to vector<16xf32>
    %434 = vector.shape_cast %433 : vector<16xf32> to vector<16x1xf32>
    %cst_116 = arith.constant 3.200000e+01 : f32
    %435 = vector.broadcast %cst_116 : f32 to vector<16x1xf32>
    %436 = arith.divf %434, %435 : vector<16x1xf32>
    %437 = arith.mulf %430, %430 : vector<16x32xf32>
    %cst_117 = arith.constant dense<0.000000e+00> : vector<16xf32>
    %438 = vector.multi_reduction <add>, %437, %cst_117 [1] : vector<16x32xf32> to vector<16xf32>
    %439 = vector.shape_cast %438 : vector<16xf32> to vector<16x1xf32>
    %cst_118 = arith.constant 3.200000e+01 : f32
    %440 = vector.broadcast %cst_118 : f32 to vector<16x1xf32>
    %441 = arith.divf %439, %440 : vector<16x1xf32>
    %442 = arith.mulf %436, %436 : vector<16x1xf32>
    %443 = arith.subf %441, %442 : vector<16x1xf32>
    %444 = vector.broadcast %436 : vector<16x1xf32> to vector<16x32xf32>
    %445 = arith.subf %430, %444 : vector<16x32xf32>
    %cst_119 = arith.constant 9.99999974E-6 : f32
    %446 = vector.broadcast %cst_119 : f32 to vector<16x1xf32>
    %447 = arith.addf %443, %446 : vector<16x1xf32>
    %448 = math.rsqrt %447 : vector<16x1xf32>
    %449 = vector.broadcast %448 : vector<16x1xf32> to vector<16x32xf32>
    %450 = arith.mulf %445, %449 : vector<16x32xf32>
    %451 = vector.broadcast %431 : vector<1x32xf32> to vector<16x32xf32>
    %452 = arith.mulf %450, %451 : vector<16x32xf32>
    %453 = vector.broadcast %432 : vector<1x32xf32> to vector<16x32xf32>
    %454 = arith.addf %452, %453 : vector<16x32xf32>
    %cst_120 = arith.constant 0.00999999977 : f32
    %455 = vector.broadcast %cst_120 : f32 to vector<16x32xf32>
    %456 = arith.mulf %455, %454 : vector<16x32xf32>
    %457 = arith.maximumf %454, %456 : vector<16x32xf32>
    %458 = tpu.concatenate %429, %457 in 1 : vector<16x32xf32>, vector<16x32xf32> -> vector<16x64xf32>
    %459 = arith.truncf %458 : vector<16x64xf32> to vector<16x64xbf16>
    %c64_121 = arith.constant 64 : index
    %c0_122 = arith.constant 0 : index
    %460 = vector.load %arg2[%c64_121, %c0_122] : memref<128x64xbf16, #tpu.memory_space<vmem>>, vector<64x64xbf16>
    %cst_123 = arith.constant dense<0.000000e+00> : vector<16x64xf32>
    %461 = tpu.matmul %459, %460, %cst_123 {dimension_numbers = #tpu.dot_dimension_numbers<[1], [0], [0], [1], [0, 0, 1, 1], [], []>} : vector<16x64xbf16>, vector<64x64xbf16>, vector<16x64xf32> -> vector<16x64xf32>
    %c17 = arith.constant 17 : index
    %c0_124 = arith.constant 0 : index
    %462 = vector.load %arg6[%c17, %c0_124] : memref<24x512xf32, #tpu.memory_space<vmem>>, vector<1x64xf32>
    %463 = vector.broadcast %462 : vector<1x64xf32> to vector<16x64xf32>
    %464 = arith.addf %461, %463 : vector<16x64xf32>
    %465 = vector.extract_strided_slice %464 {offsets = [0, 0], sizes = [16, 32], strides = [1, 1]} : vector<16x64xf32> to vector<16x32xf32>
    %c18 = arith.constant 18 : index
    %c0_125 = arith.constant 0 : index
    %466 = vector.load %arg6[%c18, %c0_125] : memref<24x512xf32, #tpu.memory_space<vmem>>, vector<1x32xf32>
    %c19 = arith.constant 19 : index
    %c0_126 = arith.constant 0 : index
    %467 = vector.load %arg6[%c19, %c0_126] : memref<24x512xf32, #tpu.memory_space<vmem>>, vector<1x32xf32>
    %cst_127 = arith.constant dense<0.000000e+00> : vector<16xf32>
    %468 = vector.multi_reduction <add>, %465, %cst_127 [1] : vector<16x32xf32> to vector<16xf32>
    %469 = vector.shape_cast %468 : vector<16xf32> to vector<16x1xf32>
    %cst_128 = arith.constant 3.200000e+01 : f32
    %470 = vector.broadcast %cst_128 : f32 to vector<16x1xf32>
    %471 = arith.divf %469, %470 : vector<16x1xf32>
    %472 = arith.mulf %465, %465 : vector<16x32xf32>
    %cst_129 = arith.constant dense<0.000000e+00> : vector<16xf32>
    %473 = vector.multi_reduction <add>, %472, %cst_129 [1] : vector<16x32xf32> to vector<16xf32>
    %474 = vector.shape_cast %473 : vector<16xf32> to vector<16x1xf32>
    %cst_130 = arith.constant 3.200000e+01 : f32
    %475 = vector.broadcast %cst_130 : f32 to vector<16x1xf32>
    %476 = arith.divf %474, %475 : vector<16x1xf32>
    %477 = arith.mulf %471, %471 : vector<16x1xf32>
    %478 = arith.subf %476, %477 : vector<16x1xf32>
    %479 = vector.broadcast %471 : vector<16x1xf32> to vector<16x32xf32>
    %480 = arith.subf %465, %479 : vector<16x32xf32>
    %cst_131 = arith.constant 9.99999974E-6 : f32
    %481 = vector.broadcast %cst_131 : f32 to vector<16x1xf32>
    %482 = arith.addf %478, %481 : vector<16x1xf32>
    %483 = math.rsqrt %482 : vector<16x1xf32>
    %484 = vector.broadcast %483 : vector<16x1xf32> to vector<16x32xf32>
    %485 = arith.mulf %480, %484 : vector<16x32xf32>
    %486 = vector.broadcast %466 : vector<1x32xf32> to vector<16x32xf32>
    %487 = arith.mulf %485, %486 : vector<16x32xf32>
    %488 = vector.broadcast %467 : vector<1x32xf32> to vector<16x32xf32>
    %489 = arith.addf %487, %488 : vector<16x32xf32>
    %cst_132 = arith.constant 0.00999999977 : f32
    %490 = vector.broadcast %cst_132 : f32 to vector<16x32xf32>
    %491 = arith.mulf %490, %489 : vector<16x32xf32>
    %492 = arith.maximumf %489, %491 : vector<16x32xf32>
    %493 = vector.extract_strided_slice %464 {offsets = [0, 32], sizes = [16, 32], strides = [1, 1]} : vector<16x64xf32> to vector<16x32xf32>
    %c20 = arith.constant 20 : index
    %c0_133 = arith.constant 0 : index
    %494 = vector.load %arg6[%c20, %c0_133] : memref<24x512xf32, #tpu.memory_space<vmem>>, vector<1x32xf32>
    %c21 = arith.constant 21 : index
    %c0_134 = arith.constant 0 : index
    %495 = vector.load %arg6[%c21, %c0_134] : memref<24x512xf32, #tpu.memory_space<vmem>>, vector<1x32xf32>
    %cst_135 = arith.constant dense<0.000000e+00> : vector<16xf32>
    %496 = vector.multi_reduction <add>, %493, %cst_135 [1] : vector<16x32xf32> to vector<16xf32>
    %497 = vector.shape_cast %496 : vector<16xf32> to vector<16x1xf32>
    %cst_136 = arith.constant 3.200000e+01 : f32
    %498 = vector.broadcast %cst_136 : f32 to vector<16x1xf32>
    %499 = arith.divf %497, %498 : vector<16x1xf32>
    %500 = arith.mulf %493, %493 : vector<16x32xf32>
    %cst_137 = arith.constant dense<0.000000e+00> : vector<16xf32>
    %501 = vector.multi_reduction <add>, %500, %cst_137 [1] : vector<16x32xf32> to vector<16xf32>
    %502 = vector.shape_cast %501 : vector<16xf32> to vector<16x1xf32>
    %cst_138 = arith.constant 3.200000e+01 : f32
    %503 = vector.broadcast %cst_138 : f32 to vector<16x1xf32>
    %504 = arith.divf %502, %503 : vector<16x1xf32>
    %505 = arith.mulf %499, %499 : vector<16x1xf32>
    %506 = arith.subf %504, %505 : vector<16x1xf32>
    %507 = vector.broadcast %499 : vector<16x1xf32> to vector<16x32xf32>
    %508 = arith.subf %493, %507 : vector<16x32xf32>
    %cst_139 = arith.constant 9.99999974E-6 : f32
    %509 = vector.broadcast %cst_139 : f32 to vector<16x1xf32>
    %510 = arith.addf %506, %509 : vector<16x1xf32>
    %511 = math.rsqrt %510 : vector<16x1xf32>
    %512 = vector.broadcast %511 : vector<16x1xf32> to vector<16x32xf32>
    %513 = arith.mulf %508, %512 : vector<16x32xf32>
    %514 = vector.broadcast %494 : vector<1x32xf32> to vector<16x32xf32>
    %515 = arith.mulf %513, %514 : vector<16x32xf32>
    %516 = vector.broadcast %495 : vector<1x32xf32> to vector<16x32xf32>
    %517 = arith.addf %515, %516 : vector<16x32xf32>
    %cst_140 = arith.constant 0.00999999977 : f32
    %518 = vector.broadcast %cst_140 : f32 to vector<16x32xf32>
    %519 = arith.mulf %518, %517 : vector<16x32xf32>
    %520 = arith.maximumf %517, %519 : vector<16x32xf32>
    %521 = tpu.concatenate %492, %520 in 1 : vector<16x32xf32>, vector<16x32xf32> -> vector<16x64xf32>
    %522 = arith.truncf %521 : vector<16x64xf32> to vector<16x64xbf16>
    %c0_141 = arith.constant 0 : index
    %c0_142 = arith.constant 0 : index
    %523 = vector.load %arg5[%c0_141, %c0_142] : memref<64x512xbf16, #tpu.memory_space<vmem>>, vector<64x512xbf16>
    %cst_143 = arith.constant dense<0.000000e+00> : vector<16x512xf32>
    %524 = tpu.matmul %522, %523, %cst_143 {dimension_numbers = #tpu.dot_dimension_numbers<[1], [0], [0], [1], [0, 0, 1, 1], [], []>} : vector<16x64xbf16>, vector<64x512xbf16>, vector<16x512xf32> -> vector<16x512xf32>
    %c22 = arith.constant 22 : index
    %c0_144 = arith.constant 0 : index
    %525 = vector.load %arg6[%c22, %c0_144] : memref<24x512xf32, #tpu.memory_space<vmem>>, vector<1x512xf32>
    %526 = vector.broadcast %525 : vector<1x512xf32> to vector<16x512xf32>
    %527 = arith.addf %524, %526 : vector<16x512xf32>
    %528 = vector.extract_strided_slice %527 {offsets = [0, 0], sizes = [16, 256], strides = [1, 1]} : vector<16x512xf32> to vector<16x256xf32>
    %529 = arith.negf %528 : vector<16x256xf32>
    %530 = math.exp %529 : vector<16x256xf32>
    %cst_145 = arith.constant 1.000000e+00 : f32
    %531 = vector.broadcast %cst_145 : f32 to vector<16x256xf32>
    %532 = arith.addf %531, %530 : vector<16x256xf32>
    %533 = arith.divf %531, %532 : vector<16x256xf32>
    %534 = vector.extract_strided_slice %527 {offsets = [0, 256], sizes = [16, 256], strides = [1, 1]} : vector<16x512xf32> to vector<16x256xf32>
    %535 = arith.negf %534 : vector<16x256xf32>
    %536 = math.exp %535 : vector<16x256xf32>
    %cst_146 = arith.constant 1.000000e+00 : f32
    %537 = vector.broadcast %cst_146 : f32 to vector<16x256xf32>
    %538 = arith.addf %537, %536 : vector<16x256xf32>
    %539 = arith.divf %537, %538 : vector<16x256xf32>
    %cst_147 = arith.constant 6.28318548 : f32
    %540 = vector.broadcast %cst_147 : f32 to vector<16x256xf32>
    %541 = arith.mulf %540, %539 : vector<16x256xf32>
    %542 = math.cos %541 : vector<16x256xf32>
    %543 = arith.mulf %533, %542 : vector<16x256xf32>
    %c0_148 = arith.constant 0 : index
    %c0_149 = arith.constant 0 : index
    %544 = vector.load %arg7[%c0_148, %c0_149] : memref<16x512xf32, #tpu.memory_space<vmem>>, vector<16x256xf32>
    tpu.vector_store %arg7[%c0_148, %c0_149], %543 {strides = array<i32>} : memref<16x512xf32, #tpu.memory_space<vmem>>, vector<16x256xf32>,
    %545 = math.sin %541 : vector<16x256xf32>
    %546 = arith.mulf %533, %545 : vector<16x256xf32>
    %c0_150 = arith.constant 0 : index
    %c256 = arith.constant 256 : index
    %547 = vector.load %arg7[%c0_150, %c256] : memref<16x512xf32, #tpu.memory_space<vmem>>, vector<16x256xf32>
    tpu.vector_store %arg7[%c0_150, %c256], %546 {strides = array<i32>} : memref<16x512xf32, #tpu.memory_space<vmem>>, vector<16x256xf32>,
    return
  }
}

</mosaic_0001>

<bundles_post_ra>
// kernel: tpu_custom_call.1
= control target key start
LH: loop header
LB: loop body
LE: loop exit
PB: predicated region body
PF: predicated region fallthrough
CT: control target
= control target key end

     0   :  { %12 = vsyncpa [#allocation4], 0  ;;  %s4886_s0 = inlined_call_operand.vmem [shape: f32[16,16], index: 0, kind: input, shape index: {}]   ;;  %s4887_s1 = inlined_call_operand.hbm [shape: bf16[16,64], index: 1, kind: input, shape index: {}]   ;;  %s4888_s2 = inlined_call_operand.vmem [shape: bf16[128,64], index: 2, kind: input, shape index: {}]   ;;  %s4889_s3 = inlined_call_operand.hbm [shape: bf16[96,96], index: 3, kind: input, shape index: {}]   ;;  %s4890_s4 = inlined_call_operand.vmem [shape: bf16[96,64], index: 4, kind: input, shape index: {}]   ;;  %s4891_s5 = inlined_call_operand.vmem [shape: bf16[64,512], index: 5, kind: input, shape index: {}]   ;;  %s4892_s6 = inlined_call_operand.hbm [shape: f32[24,512], index: 6, kind: input, shape index: {}]   ;;  %s4893_s7 = inlined_call_operand.hbm [shape: f32[16,512], index: 7, kind: output, shape index: {}]  }
   0x1   :  { %13 = vsyncpa [#allocation7], 0 }
   0x2   :  { %14 = vsyncpa [#allocation5], 0  ;;  %s36_s26 = sshll.u32 %s4889_s3, 4  ;;  %s3542_s27 = smov [#allocation6]   ;;  %s37_s26 = int_to_ptr.hbm [resolvable:$true] %s36_s26 }
   0x3   :  { %s38_s28 = sshll.u32 %s3542_s27, 4  ;;  %s21_s8 = sshll.u32 %s4887_s1, 4  ;;  %s39_s28 = int_to_ptr.vmem [resolvable:$true] %s38_s28  ;;  %s22_s8 = int_to_ptr.hbm [resolvable:$true] %s21_s8 }
   0x4   :  { %s3543_s9 = smov 64   ;;  %s3544_s10 = smov 4  }
   0x5   :  { %44 = dma.hbm_to_vmem [thread:$0]  %s37_s26, 768, %s39_s28, [#allocation7], %s3543_s9, %s3543_s9, %s3544_s10  }
   0x6   :  { %s3545_s11 = smov [#allocation3]   ;;  %s53_s3 = sshll.u32 %s4892_s6, 4  ;;  %s54_s3 = int_to_ptr.hbm [resolvable:$true] %s53_s3 }
   0x7   :  { %s23_s12 = sshll.u32 %s3545_s11, 4  ;;  %s3546_s15 = smov [#allocation8]   ;;  %s24_s12 = int_to_ptr.vmem [resolvable:$true] %s23_s12 }
   0x8   :  { %29 = dma.hbm_to_vmem [thread:$0]  %s22_s8, 128, %s24_s12, [#allocation4], %s3543_s9, %s3543_s9, %s3544_s10  }
   0x9   :  { %s55_s16 = sshll.u32 %s3546_s15, 4  ;;  %s3547_s1 = smov 512   ;;  %s56_s16 = int_to_ptr.vmem [resolvable:$true] %s55_s16 }
   0xa   :  { %s3548_s17 = smov 32  }
   0xb   :  { %61 = dma.hbm_to_vmem [thread:$0]  %s54_s3, 1536, %s56_s16, [#allocation7], %s3547_s1, %s3547_s1, %s3548_s17  }
   0xc   :  { %3536 = dma.done.wait [#allocation4], 128  }
   0xd   :  { %3537 = vsyncadd [#allocation4], 4294967168 }
   0xe   :  { %3538 = dma.done.wait [#allocation7], 2304  }
   0xf   :  { %3539 = vsyncadd [#allocation7], 4294964992  ;;  %v3272_v0 = vld [vmem:[#allocation3] sm:$0xff]  ;;  %v75_v1 = vld [vmem:[%s4886_s0] sm:$0xff]  ;;  %vm87_vm0 = vcmask 130048   ;;  %vm107_vm1 = vcmask 261120  }
  0x10   :  { %v76_v2 = vld [vmem:[%s4886_s0 + $0x8] sm:$0xff]  ;;  %98 = vmatpush.bf16.msra.mxu0 %v3272_v0  ;;  %s3549_s21 = smov 96   ;;  %v3550_v26 = vmov 32.0   ;;  %v3276_v46 = vld [vmem:[%s4888_s2 + $0x18] sm:$0xff]  ;;  %v3275_v55 = vld [vmem:[%s4888_s2 + $0x10] sm:$0xff]  ;;  %vm287_vm15 = vcmask 523264  }
  0x11   :  { %v77_v3 = vpack.c.bf16 %v76_v2, %v75_v1  ;;  %v80_v4 = vld [vmem:[#allocation8] ss:$0 sm:$0xff]  ;;  %v172_v23 = vld [vmem:[#allocation8 + $0x4] ss:$0 sm:$0xff]  ;;  %v171_v24 = vld [vmem:[#allocation8 + $0x3] ss:$0 sm:$0xff]  ;;  %3326 = vrcp.f32 %v3550_v26  ;;  %295 = vmatpush.bf16.msra.mxu1 %v3276_v46 }
  0x12   :  { %v3274_v60 = vld [vmem:[%s4888_s2 + $0x8] sm:$0xff]  ;;  %s3053_s13 = sshll.u32 %s4893_s7, 4  ;;  %s3054_s13 = int_to_ptr.hbm [resolvable:$true] %s3053_s13 }
  0x13   :  { %3071 = vmatmul.msk.bf16.vlgmr.msra.gmra.mxu0 %vm87_vm0, %v77_v3 }
  0x15   :  { %296 = vmatpush.bf16.msra.mxu1 %v3275_v55 }
  0x17   :  { %v3327_v27 = vpop.eup %3326 }
  0x18   :  { %v115_v29 = vmul.f32 32.0, %v3327_v27  ;;  %vm119_vm2 = vweird.f32 %v3327_v27 }
  0x19   :  { %297 = vmatpush.bf16.msra.mxu1 %v3274_v60 }
  0x1a   :  { %v116_v30 = vsub.f32 1.0, %v115_v29 }
  0x1c   :  { %v117_v31 = vmul.f32 %v3327_v27, %v116_v30 }
  0x1e   :  { %v118_v33 = vadd.f32 %v3327_v27, %v117_v31 }
  0x20   :  { %v3647_v34 = vsel %vm119_vm2, %v3327_v27, %v118_v33 }
  0x90   :  { %v100_v5 = vpop.f32.mrf.mxu0 }
  0x91   :  { %v3621_v6 = vadd.f32 %v100_v5, %v80_v4 }
  0x93   :  { %175 = vrot.lane.b32.xlu0 %v3621_v6, %s3549_s21  ;;  %v108_v7 = vsel %vm107_vm1, %v3621_v6, 0.0  ;;  %v123_v8 = vmul.f32 %v3621_v6, %v3621_v6 }
  0x94   :  { %109 = vadd.xlane.f32.xlu2 %v108_v7 }
  0x95   :  { %191 = vrot.lane.b32.xlu1 %v123_v8, %s3549_s21  ;;  %v125_v13 = vsel %vm107_vm1, %v123_v8, 0.0 }
  0x98   :  { %v102_v9 = vpop.f32.mrf.mxu0 }
  0x99   :  { %v3630_v10 = vadd.f32 %v102_v9, %v80_v4  ;;  %v3273_v4 = vld [vmem:[%s4888_s2] sm:$0xff] }
  0x9a   :  { %298 = vmatpush.bf16.msra.mxu1 %v3273_v4 }
  0x9b   :  { %177 = vrot.lane.b32.xlu0 %v3630_v10, %s3549_s21  ;;  %v111_v11 = vsel %vm107_vm1, %v3630_v10, 0.0  ;;  %v124_v12 = vmul.f32 %v3630_v10, %v3630_v10 }
  0x9c   :  { %112 = vadd.xlane.f32.xlu2 %v111_v11 }
  0x9d   :  { %193 = vrot.lane.b32.xlu1 %v124_v12, %s3549_s21  ;;  %v128_v14 = vsel %vm107_vm1, %v124_v12, 0.0 }
  0xa4   :  { %126 = vadd.xlane.f32.xlu2 %v125_v13 }
  0xac   :  { %129 = vadd.xlane.f32.xlu2 %v128_v14 }
 0x105   :  { %v176_v15 = vpop.permute.xlu0 %175 }
 0x106   :  { %v181_v16 = vsel %vm107_vm1, %v176_v15, 0.0 }
 0x107   :  { %182 = vadd.xlane.f32.xlu0 %v181_v16  ;;  %v192_v17 = vpop.permute.xlu1 %191  ;;  %v110_v25 = vpop.xlane.xlu2 %109 }
 0x108   :  { %v197_v18 = vsel %vm107_vm1, %v192_v17, 0.0  ;;  %v3650_v35 = vmul.f32 %v3647_v34, %v110_v25 }
 0x109   :  { %198 = vadd.xlane.f32.xlu2 %v197_v18  ;;  %v363_v18 = vld [vmem:[#allocation8 + $0x20] ss:$0 sm:$0xff] }
 0x10a   :  { %v133_v40 = vmul.f32 %v3650_v35, %v3650_v35  ;;  %v137_v25 = vsub.f32 %v3621_v6, %v3650_v35 }
 0x10d   :  { %v178_v19 = vpop.permute.xlu0 %177 }
 0x10e   :  { %v184_v20 = vsel %vm107_vm1, %v178_v19, 0.0 }
 0x10f   :  { %185 = vadd.xlane.f32.xlu1 %v184_v20  ;;  %v194_v21 = vpop.permute.xlu1 %193  ;;  %v113_v28 = vpop.xlane.xlu2 %112 }
 0x110   :  { %v200_v22 = vsel %vm107_vm1, %v194_v21, 0.0  ;;  %v3653_v37 = vmul.f32 %v3647_v34, %v113_v28 }
 0x111   :  { %201 = vadd.xlane.f32.xlu2 %v200_v22 }
 0x112   :  { %v134_v41 = vmul.f32 %v3653_v37, %v3653_v37  ;;  %v138_v26 = vsub.f32 %v3630_v10, %v3653_v37  ;;  %v106_v37 = vld [vmem:[#allocation8 + $0x2] ss:$0 sm:$0xff] }
 0x117   :  { %v127_v32 = vpop.xlane.xlu2 %126 }
 0x118   :  { %v131_v38 = vmul.f32 %v127_v32, %v3647_v34 }
 0x11a   :  { %v135_v42 = vsub.f32 %v131_v38, %v133_v40  ;;  %v105_v38 = vld [vmem:[#allocation8 + $0x1] ss:$0 sm:$0xff] }
 0x11b   :  { %242 = vrot.lane.b32.xlu0 %v172_v23, %s3548_s17 }
 0x11c   :  { %v139_v44 = vadd.f32 1e-05, %v135_v42 }
 0x11e   :  { %3328 = vrsqrt.f32 %v139_v44  ;;  %vm147_vm5 = vweird.f32 %v139_v44 }
 0x11f   :  { %v130_v36 = vpop.xlane.xlu2 %129 }
 0x120   :  { %v132_v39 = vmul.f32 %v130_v36, %v3647_v34 }
 0x122   :  { %v136_v43 = vsub.f32 %v132_v39, %v134_v41 }
 0x124   :  { %v140_v45 = vadd.f32 1e-05, %v136_v43  ;;  %v3329_v47 = vpop.eup %3328 }
 0x125   :  { %v142_v52 = vmul.f32 %v3329_v47, %v139_v44  ;;  %vm148_vm3 = vweird.f32 %v3329_v47 }
 0x126   :  { %3330 = vrsqrt.f32 %v140_v45  ;;  %vm3677_vm6 = vmor %vm147_vm5, %vm148_vm3  ;;  %vm157_vm7 = vweird.f32 %v140_v45 }
 0x127   :  { %v143_v58 = vmul.f32 %v3329_v47, %v142_v52 }
 0x129   :  { %236 = vrot.lane.b32.xlu2 %v171_v24, %s3548_s17  ;;  %v144_v1 = vmul.f32 0.5, %v143_v58 }
 0x12b   :  { %v145_v9 = vsub.f32 1.5, %v144_v1 }
 0x12c   :  { %v3331_v49 = vpop.eup %3330 }
 0x12d   :  { %v152_v56 = vmul.f32 %v3331_v49, %v140_v45  ;;  %v146_v15 = vmul.f32 %v3329_v47, %v145_v9  ;;  %vm158_vm4 = vweird.f32 %v3331_v49 }
 0x12e   :  { %vm159_vm9 = vmor %vm157_vm7, %vm158_vm4 }
 0x12f   :  { %v153_v61 = vmul.f32 %v3331_v49, %v152_v56  ;;  %v150_v21 = vsel %vm3677_vm6, %v3329_v47, %v146_v15 }
 0x130   :  { %v161_v31 = vmul.f32 %v150_v21, %v137_v25  ;;  %v3723_v21 = vld [vmem:[#allocation6 + $0x20] sm:$0xff] }
 0x131   :  { %v154_v5 = vmul.f32 0.5, %v153_v61  ;;  %v262_v61 = vld [vmem:[#allocation8 + $0x5] ss:$0 sm:$0xff] }
 0x132   :  { %v163_v42 = vmul.f32 %v161_v31, %v105_v38 }
 0x133   :  { %v155_v12 = vsub.f32 1.5, %v154_v5 }
 0x134   :  { %v165_v47 = vadd.f32 %v163_v42, %v106_v37  ;;  %v3280_v42 = vld [vmem:[#allocation6 + $0x18] sm:$0xff] }
 0x135   :  { %v156_v16 = vmul.f32 %v3331_v49, %v155_v12  ;;  %486 = vmatpush.bf16.msra.mxu2 %v3280_v42 }
 0x136   :  { %v167_v52 = vmul.f32 0.01, %v165_v47 }
 0x137   :  { %v160_v22 = vsel %vm159_vm9, %v3331_v49, %v156_v16 }
 0x138   :  { %v162_v32 = vmul.f32 %v160_v22, %v138_v26  ;;  %v3551_v22 = vmov 0  }
 0x13a   :  { %v164_v35 = vmul.f32 %v162_v32, %v105_v38 }
 0x17a   :  { %v183_v48 = vpop.xlane.xlu0 %182 }
 0x17b   :  { %v187_v50 = vmul.f32 %v183_v48, %v3647_v34  ;;  %v166_v48 = vadd.f32 %v164_v35, %v106_v37 }
 0x17c   :  { %v199_v51 = vpop.xlane.xlu2 %198 }
 0x17d   :  { %v205_v53 = vmul.f32 %v187_v50, %v187_v50  ;;  %v203_v54 = vmul.f32 %v199_v51, %v3647_v34  ;;  %v209_v27 = vsub.f32 %v3621_v6, %v187_v50 }
 0x17f   :  { %v207_v57 = vsub.f32 %v203_v54, %v205_v53  ;;  %v168_v53 = vmul.f32 0.01, %v166_v48 }
 0x181   :  { %v211_v59 = vadd.f32 1e-05, %v207_v57  ;;  %v169_v57 = vmax.f32 %v165_v47, %v167_v52  ;;  %v170_v58 = vmax.f32 %v166_v48, %v168_v53 }
 0x182   :  { %v186_v62 = vpop.xlane.xlu1 %185 }
 0x183   :  { %3332 = vrsqrt.f32 %v211_v59  ;;  %v188_v63 = vmul.f32 %v186_v62, %v3647_v34  ;;  %vm219_vm10 = vweird.f32 %v211_v59 }
 0x184   :  { %v202_v0 = vpop.xlane.xlu2 %201 }
 0x185   :  { %v206_v2 = vmul.f32 %v188_v63, %v188_v63  ;;  %v204_v3 = vmul.f32 %v202_v0, %v3647_v34  ;;  %v210_v6 = vsub.f32 %v3630_v10, %v188_v63 }
 0x187   :  { %v208_v7 = vsub.f32 %v204_v3, %v206_v2 }
 0x189   :  { %v3333_v8 = vpop.eup %3332  ;;  %v212_v11 = vadd.f32 1e-05, %v208_v7 }
 0x18a   :  { %v214_v13 = vmul.f32 %v3333_v8, %v211_v59  ;;  %vm220_vm8 = vweird.f32 %v3333_v8 }
 0x18b   :  { %3334 = vrsqrt.f32 %v212_v11  ;;  %vm221_vm11 = vmor %vm219_vm10, %vm220_vm8  ;;  %vm229_vm13 = vweird.f32 %v212_v11 }
 0x18c   :  { %v215_v14 = vmul.f32 %v3333_v8, %v214_v13  ;;  %v237_v30 = vpop.permute.xlu2 %236 }
 0x18d   :  { %v243_v41 = vpop.permute.xlu0 %242 }
 0x18e   :  { %v216_v17 = vmul.f32 0.5, %v215_v14 }
 0x190   :  { %v217_v19 = vsub.f32 1.5, %v216_v17 }
 0x191   :  { %v3335_v20 = vpop.eup %3334 }
 0x192   :  { %v224_v23 = vmul.f32 %v3335_v20, %v212_v11  ;;  %v218_v24 = vmul.f32 %v3333_v8, %v217_v19  ;;  %vm230_vm12 = vweird.f32 %v3335_v20  ;;  %v3717_v19 = vld [vmem:[#allocation6 + $0x28] sm:$0xff] }
 0x193   :  { %vm231_vm14 = vmor %vm229_vm13, %vm230_vm12  ;;  %522 = vmatpush.bf16.msra.mxu3 %v3717_v19  ;;  %587 = vmatpush.bf16.msrb.mxu0 %v3717_v19 }
 0x194   :  { %v225_v28 = vmul.f32 %v3335_v20, %v224_v23  ;;  %v222_v29 = vsel %vm221_vm11, %v3333_v8, %v218_v24  ;;  %727 = vmatpush.bf16.msrb.mxu1 %v3717_v19 }
 0x195   :  { %v233_v33 = vmul.f32 %v222_v29, %v209_v27 }
 0x196   :  { %v226_v36 = vmul.f32 0.5, %v225_v28 }
 0x197   :  { %v239_v39 = vmul.f32 %v237_v30, %v233_v33  ;;  %523 = vmatpush.bf16.msra.mxu3 %v3723_v21  ;;  %588 = vmatpush.bf16.msrb.mxu0 %v3723_v21 }
 0x198   :  { %v227_v40 = vsub.f32 1.5, %v226_v36  ;;  %728 = vmatpush.bf16.msrb.mxu1 %v3723_v21 }
 0x199   :  { %v245_v44 = vadd.f32 %v243_v41, %v239_v39 }
 0x19a   :  { %v228_v43 = vmul.f32 %v3335_v20, %v227_v40  ;;  %524 = vmatmul.bf16.vlgmr.msra.gmra.mxu3 %v3551_v22 }
 0x19b   :  { %v247_v50 = vmul.f32 0.01, %v245_v44  ;;  %657 = vmatpush.bf16.msrb.mxu3 %v3717_v19  ;;  %863 = vmatpush.bf16.msra.mxu0 %v3717_v19 }
 0x19c   :  { %v232_v45 = vsel %vm231_vm14, %v3335_v20, %v228_v43  ;;  %v364_v20 = vld [vmem:[#allocation8 + $0x21] ss:$0 sm:$0xff] }
 0x19d   :  { %v234_v46 = vmul.f32 %v232_v45, %v210_v6  ;;  %v249_v55 = vmax.f32 %v245_v44, %v247_v50  ;;  %v3278_v50 = vld [vmem:[#allocation6 + $0x8] sm:$0xff] }
 0x19f   :  { %v240_v49 = vmul.f32 %v237_v30, %v234_v46  ;;  %v251_v59 = vsel %vm107_vm1, %v169_v57, %v249_v55  ;;  %658 = vmatpush.bf16.msrb.mxu3 %v3723_v21  ;;  %864 = vmatpush.bf16.msra.mxu0 %v3723_v21  ;;  %v3279_v46 = vld [vmem:[#allocation6 + $0x10] sm:$0xff] }
 0x1a0   :  { %487 = vmatpush.bf16.msra.mxu2 %v3279_v46 }
 0x1a1   :  { %v246_v51 = vadd.f32 %v243_v41, %v240_v49 }
 0x1a3   :  { %v248_v54 = vmul.f32 0.01, %v246_v51  ;;  %932 = vmatpush.bf16.msra.mxu3 %v3717_v19 }
 0x1a4   :  { %488 = vmatpush.bf16.msra.mxu2 %v3278_v50 }
 0x1a5   :  { %v250_v56 = vmax.f32 %v246_v51, %v248_v54 }
 0x1a7   :  { %v252_v10 = vsel %vm107_vm1, %v170_v58, %v250_v56  ;;  %933 = vmatpush.bf16.msra.mxu3 %v3723_v21  ;;  %v3277_v58 = vld [vmem:[#allocation6] sm:$0xff] }
 0x1a8   :  { %v253_v60 = vpack.c.bf16 %v252_v10, %v251_v59  ;;  %489 = vmatpush.bf16.msra.mxu2 %v3277_v58 }
 0x1aa   :  { %3088 = vmatmul.msk.bf16.vlgmr.msra.gmra.mxu1 %vm287_vm15, %v253_v60 }
 0x1ab   :  { %1001 = vmatpush.bf16.msra.mxu1 %v3717_v19 }
 0x1ac   :  { %797 = vmatpush.bf16.msrb.mxu2 %v3717_v19 }
 0x1af   :  { %1002 = vmatpush.bf16.msra.mxu1 %v3723_v21 }
 0x1b0   :  { %798 = vmatpush.bf16.msrb.mxu2 %v3723_v21 }
 0x227   :  { %v300_v62 = vpop.f32.mrf.mxu1 }
 0x228   :  { %v3692_v63 = vadd.f32 %v300_v62, %v262_v61 }
 0x22a   :  { %367 = vrot.lane.b32.xlu1 %v3692_v63, %s3549_s21  ;;  %v315_v0 = vmul.f32 %v3692_v63, %v3692_v63  ;;  %v307_v4 = vsel %vm107_vm1, %v3692_v63, 0.0 }
 0x22c   :  { %383 = vrot.lane.b32.xlu0 %v315_v0, %s3549_s21  ;;  %v317_v5 = vsel %vm107_vm1, %v315_v0, 0.0 }
 0x22f   :  { %v302_v1 = vpop.f32.mrf.mxu1 }
 0x230   :  { %v3699_v2 = vadd.f32 %v302_v1, %v262_v61 }
 0x232   :  { %369 = vrot.lane.b32.xlu2 %v3699_v2, %s3549_s21  ;;  %v316_v3 = vmul.f32 %v3699_v2, %v3699_v2  ;;  %v310_v7 = vsel %vm107_vm1, %v3699_v2, 0.0 }
 0x234   :  { %v320_v8 = vsel %vm107_vm1, %v316_v3, 0.0 }
 0x23a   :  { %385 = vrot.lane.b32.xlu2 %v316_v3, %s3549_s21 }
 0x254   :  { %308 = vadd.xlane.f32.xlu1 %v307_v4 }
 0x256   :  { %318 = vadd.xlane.f32.xlu0 %v317_v5 }
 0x25e   :  { %311 = vadd.xlane.f32.xlu0 %v310_v7 }
 0x263   :  { %321 = vadd.xlane.f32.xlu2 %v320_v8 }
 0x28c   :  { %v370_v9 = vpop.permute.xlu2 %369 }
 0x28d   :  { %v376_v17 = vsel %vm107_vm1, %v370_v9, 0.0 }
 0x294   :  { %v386_v11 = vpop.permute.xlu2 %385 }
 0x295   :  { %v392_v12 = vsel %vm107_vm1, %v386_v11, 0.0 }
 0x296   :  { %393 = vadd.xlane.f32.xlu0 %v392_v12 }
 0x29c   :  { %v368_v13 = vpop.permute.xlu1 %367 }
 0x29d   :  { %v373_v14 = vsel %vm107_vm1, %v368_v13, 0.0 }
 0x29e   :  { %374 = vadd.xlane.f32.xlu2 %v373_v14  ;;  %v384_v15 = vpop.permute.xlu0 %383 }
 0x29f   :  { %v389_v16 = vsel %vm107_vm1, %v384_v15, 0.0 }
 0x2a0   :  { %390 = vadd.xlane.f32.xlu1 %v389_v16 }
 0x2a8   :  { %377 = vadd.xlane.f32.xlu1 %v376_v17 }
 0x2b6   :  { %428 = vrot.lane.b32.xlu2 %v363_v18, %s3548_s17 }
 0x2c1   :  { %434 = vrot.lane.b32.xlu1 %v364_v20, %s3548_s17 }
 0x2c7   :  { %v309_v24 = vpop.xlane.xlu1 %308 }
 0x2c8   :  { %v3738_v25 = vmul.f32 %v309_v24, %v3647_v34 }
 0x2c9   :  { %v319_v23 = vpop.xlane.xlu0 %318 }
 0x2ca   :  { %v325_v29 = vmul.f32 %v3738_v25, %v3738_v25  ;;  %v323_v30 = vmul.f32 %v319_v23, %v3647_v34  ;;  %v329_v17 = vsub.f32 %v3692_v63, %v3738_v25 }
 0x2cc   :  { %v327_v33 = vsub.f32 %v323_v30, %v325_v29  ;;  %v305_v29 = vld [vmem:[#allocation8 + $0x6] ss:$0 sm:$0xff] }
 0x2ce   :  { %v331_v38 = vadd.f32 1e-05, %v327_v33 }
 0x2d0   :  { %3336 = vrsqrt.f32 %v331_v38  ;;  %vm339_vm2 = vweird.f32 %v331_v38 }
 0x2d1   :  { %v312_v26 = vpop.xlane.xlu0 %311 }
 0x2d2   :  { %v3741_v28 = vmul.f32 %v312_v26, %v3647_v34 }
 0x2d4   :  { %v326_v32 = vmul.f32 %v3741_v28, %v3741_v28  ;;  %v330_v18 = vsub.f32 %v3699_v2, %v3741_v28 }
 0x2d6   :  { %v322_v27 = vpop.xlane.xlu2 %321  ;;  %v3337_v35 = vpop.eup %3336 }
 0x2d7   :  { %v324_v31 = vmul.f32 %v322_v27, %v3647_v34  ;;  %v334_v47 = vmul.f32 %v3337_v35, %v331_v38  ;;  %vm340_vm0 = vweird.f32 %v3337_v35  ;;  %v306_v38 = vld [vmem:[#allocation8 + $0x7] ss:$0 sm:$0xff] }
 0x2d8   :  { %vm341_vm5 = vmor %vm339_vm2, %vm340_vm0 }
 0x2d9   :  { %v328_v36 = vsub.f32 %v324_v31, %v326_v32  ;;  %v335_v51 = vmul.f32 %v3337_v35, %v334_v47 }
 0x2db   :  { %v332_v39 = vadd.f32 1e-05, %v328_v36  ;;  %v336_v59 = vmul.f32 0.5, %v335_v51 }
 0x2dd   :  { %3338 = vrsqrt.f32 %v332_v39  ;;  %v337_v1 = vsub.f32 1.5, %v336_v59  ;;  %vm349_vm6 = vweird.f32 %v332_v39 }
 0x2df   :  { %v338_v7 = vmul.f32 %v3337_v35, %v337_v1 }
 0x2e1   :  { %v342_v13 = vsel %vm341_vm5, %v3337_v35, %v338_v7 }
 0x2e2   :  { %v353_v21 = vmul.f32 %v342_v13, %v329_v17 }
 0x2e3   :  { %v3339_v37 = vpop.eup %3338 }
 0x2e4   :  { %v344_v48 = vmul.f32 %v3339_v37, %v332_v39  ;;  %vm350_vm3 = vweird.f32 %v3339_v37  ;;  %v355_v32 = vmul.f32 %v353_v21, %v305_v29 }
 0x2e5   :  { %vm351_vm7 = vmor %vm349_vm6, %vm350_vm3 }
 0x2e6   :  { %v345_v52 = vmul.f32 %v3339_v37, %v344_v48 }
 0x2e8   :  { %v346_v10 = vmul.f32 0.5, %v345_v52  ;;  %v3772_v52 = vld [vmem:[#allocation8 + $0x23] ss:$0 sm:$0xff] }
 0x2ea   :  { %v347_v3 = vsub.f32 1.5, %v346_v10 }
 0x2ec   :  { %v348_v8 = vmul.f32 %v3339_v37, %v347_v3 }
 0x2ee   :  { %v352_v14 = vsel %vm351_vm7, %v3339_v37, %v348_v8 }
 0x2ef   :  { %v354_v23 = vmul.f32 %v352_v14, %v330_v18 }
 0x2f1   :  { %v356_v33 = vmul.f32 %v354_v23, %v305_v29 }
 0x2f3   :  { %v358_v42 = vadd.f32 %v356_v33, %v306_v38 }
 0x309   :  { %v394_v53 = vpop.xlane.xlu0 %393 }
 0x30a   :  { %v396_v56 = vmul.f32 %v394_v53, %v3647_v34  ;;  %v525_v53 = vpop.f32.mrf.mxu3 }
 0x311   :  { %v375_v40 = vpop.xlane.xlu2 %374 }
 0x312   :  { %v3750_v41 = vmul.f32 %v375_v40, %v3647_v34 }
 0x313   :  { %v391_v43 = vpop.xlane.xlu1 %390 }
 0x314   :  { %v397_v6 = vmul.f32 %v3750_v41, %v3750_v41  ;;  %v395_v44 = vmul.f32 %v391_v43, %v3647_v34  ;;  %v401_v19 = vsub.f32 %v3692_v63, %v3750_v41  ;;  %v357_v41 = vadd.f32 %v355_v32, %v306_v38 }
 0x316   :  { %v399_v45 = vsub.f32 %v395_v44, %v397_v6  ;;  %v359_v6 = vmul.f32 0.01, %v357_v41  ;;  %v360_v44 = vmul.f32 0.01, %v358_v42 }
 0x318   :  { %v403_v49 = vadd.f32 1e-05, %v399_v45  ;;  %v361_v48 = vmax.f32 %v357_v41, %v359_v6 }
 0x319   :  { %v429_v26 = vpop.permute.xlu2 %428 }
 0x31a   :  { %3340 = vrsqrt.f32 %v403_v49  ;;  %vm411_vm8 = vweird.f32 %v403_v49 }
 0x31b   :  { %v378_v54 = vpop.xlane.xlu1 %377 }
 0x31c   :  { %v380_v55 = vmul.f32 %v378_v54, %v3647_v34  ;;  %v526_v54 = vadd.f32 %v525_v53, %v3772_v52 }
 0x31e   :  { %v398_v57 = vmul.f32 %v380_v55, %v380_v55  ;;  %v402_v28 = vsub.f32 %v3699_v2, %v380_v55  ;;  %550 = vrot.lane.b32.xlu0 %v526_v54, %s3543_s9  ;;  %v527_v55 = vpop.f32.mrf.mxu3 }
 0x320   :  { %v3341_v60 = vpop.eup %3340  ;;  %v400_v61 = vsub.f32 %v396_v56, %v398_v57  ;;  %v454_v56 = vld [vmem:[#allocation8 + $0x22] ss:$0 sm:$0xff] }
 0x321   :  { %v406_v62 = vmul.f32 %v3341_v60, %v403_v49  ;;  %vm412_vm4 = vweird.f32 %v3341_v60  ;;  %v362_v49 = vmax.f32 %v358_v42, %v360_v44 }
 0x322   :  { %v404_v0 = vadd.f32 1e-05, %v400_v61  ;;  %vm413_vm9 = vmor %vm411_vm8, %vm412_vm4 }
 0x323   :  { %v407_v4 = vmul.f32 %v3341_v60, %v406_v62 }
 0x324   :  { %3342 = vrsqrt.f32 %v404_v0  ;;  %vm421_vm11 = vweird.f32 %v404_v0 }
 0x325   :  { %v408_v5 = vmul.f32 0.5, %v407_v4 }
 0x327   :  { %v409_v9 = vsub.f32 1.5, %v408_v5 }
 0x329   :  { %v410_v11 = vmul.f32 %v3341_v60, %v409_v9 }
 0x32a   :  { %v3343_v12 = vpop.eup %3342 }
 0x32b   :  { %v416_v15 = vmul.f32 %v3343_v12, %v404_v0  ;;  %v414_v16 = vsel %vm413_vm9, %v3341_v60, %v410_v11  ;;  %vm422_vm10 = vweird.f32 %v3343_v12 }
 0x32c   :  { %v425_v24 = vmul.f32 %v414_v16, %v401_v19  ;;  %vm423_vm12 = vmor %vm421_vm11, %vm422_vm10 }
 0x32d   :  { %v417_v20 = vmul.f32 %v3343_v12, %v416_v15 }
 0x32e   :  { %v431_v31 = vmul.f32 %v429_v26, %v425_v24 }
 0x32f   :  { %v418_v27 = vmul.f32 0.5, %v417_v20 }
 0x331   :  { %v419_v30 = vsub.f32 1.5, %v418_v27 }
 0x333   :  { %v420_v36 = vmul.f32 %v3343_v12, %v419_v30  ;;  %v435_v25 = vpop.permute.xlu1 %434 }
 0x334   :  { %v437_v63 = vadd.f32 %v435_v25, %v431_v31 }
 0x335   :  { %v424_v39 = vsel %vm423_vm12, %v3343_v12, %v420_v36 }
 0x336   :  { %v426_v40 = vmul.f32 %v424_v39, %v402_v28  ;;  %v439_v43 = vmul.f32 0.01, %v437_v63 }
 0x338   :  { %v432_v35 = vmul.f32 %v429_v26, %v426_v40  ;;  %v441_v46 = vmax.f32 %v437_v63, %v439_v43 }
 0x33a   :  { %v438_v37 = vadd.f32 %v435_v25, %v432_v35  ;;  %v443_v50 = vsel %vm107_vm1, %v361_v48, %v441_v46 }
 0x33c   :  { %v440_v45 = vmul.f32 0.01, %v438_v37 }
 0x33e   :  { %v442_v47 = vmax.f32 %v438_v37, %v440_v45 }
 0x340   :  { %v444_v2 = vsel %vm107_vm1, %v362_v49, %v442_v47 }
 0x341   :  { %v3768_v51 = vpack.c.bf16 %v444_v2, %v443_v50 }
 0x343   :  { %3105 = vmatmul.msk.bf16.vlgmr.msra.gmra.mxu2 %vm287_vm15, %v3768_v51 }
 0x390   :  { %v551_v11 = vpop.permute.xlu0 %550 }
 0x3c6   :  { %v491_v57 = vpop.f32.mrf.mxu2 }
 0x3c7   :  { %v3776_v58 = vadd.f32 %v491_v57, %v454_v56 }
 0x3c9   :  { %v529_v59 = vadd.f32 %v526_v54, %v3776_v58 }
 0x3cb   :  { %v3114_v10 = vmul.f32 -1.442695, %v529_v59 }
 0x3cd   :  { %3344 = vpow2.f32 %v3114_v10 }
 0x3ce   :  { %v493_v60 = vpop.f32.mrf.mxu2 }
 0x3cf   :  { %v3779_v61 = vadd.f32 %v493_v60, %v454_v56 }
 0x3d3   :  { %v3345_v62 = vpop.eup %3344 }
 0x3d4   :  { %v533_v0 = vadd.f32 1.0, %v3345_v62 }
 0x3d6   :  { %3346 = vrcp.f32 %v533_v0  ;;  %v545_v5 = vand.u32 2147483648, %v533_v0  ;;  %v543_v8 = vand.u32 2147483647, %v533_v0  ;;  %vm539_vm14 = vweird.f32 %v533_v0 }
 0x3d8   :  { %v546_v12 = vor.u32 1.1754944e-38, %v545_v5  ;;  %vm544_vm2 = vcmp.eq.f32.partialorder %v543_v8, 8.507059e+37 }
 0x3dc   :  { %v3347_v1 = vpop.eup %3346 }
 0x3dd   :  { %v535_v3 = vmul.f32 %v3347_v1, %v533_v0  ;;  %vm540_vm13 = vweird.f32 %v3347_v1 }
 0x3de   :  { %vm541_vm0 = vmor %vm539_vm14, %vm540_vm13 }
 0x3df   :  { %v536_v4 = vsub.f32 1.0, %v535_v3 }
 0x3e1   :  { %v537_v7 = vmul.f32 %v3347_v1, %v536_v4 }
 0x3e3   :  { %v538_v9 = vadd.f32 %v3347_v1, %v537_v7 }
 0x3e5   :  { %v542_v13 = vsel %vm541_vm0, %v3347_v1, %v538_v9 }
 0x3e6   :  { %v547_v14 = vsel %vm544_vm2, %v546_v12, %v542_v13 }
 0x3e7   :  { %v553_v15 = vmul.f32 %v551_v11, %v547_v14  ;;  %v560_v19 = vsub.f32 1.0, %v547_v14  ;;  %v566_v21 = vmul.f32 0.0, %v547_v14 }
 0x3e9   :  { %555 = vrot.lane.b32.xlu2 %v553_v15, %s3543_s9 }
 0x443   :  { %v556_v16 = vpop.permute.xlu2 %555 }
 0x444   :  { %v558_v17 = vadd.f32 %v556_v16, %v3776_v58 }
 0x446   :  { %3348 = vtanh.f32 %v558_v17 }
 0x44c   :  { %v3349_v18 = vpop.eup %3348 }
 0x44d   :  { %562 = vrot.lane.b32.xlu0 %v3349_v18, %s3549_s21 }
 0x4bf   :  { %v563_v20 = vpop.permute.xlu0 %562 }
 0x4c0   :  { %v565_v23 = vmul.f32 %v563_v20, %v560_v19 }
 0x4c2   :  { %v3784_v24 = vadd.f32 %v566_v21, %v565_v23 }
 0x4c4   :  { %v574_v26 = vpack.c.bf16 %v3784_v24, %v3784_v24  ;;  %v633_v50 = vrot.slane %v3784_v24, 6 }
 0x4c6   :  { %576 = vrot.lane.b32.xlu1 %v574_v26, %s3549_s21 }
 0x538   :  { %v577_v27 = vpop.permute.xlu1 %576 }
 0x539   :  { %3115 = vmatmul.msk.bf16.vlgmr.msrb.gmra.mxu0 %vm107_vm1, %v577_v27 }
 0x5b6   :  { %v590_v29 = vpop.f32.mrf.mxu0 }
 0x5b7   :  { %v591_v30 = vadd.f32 %v590_v29, %v3772_v52 }
 0x5b9   :  { %v595_v31 = vrot.slane %v591_v30, 6 }
 0x5bb   :  { %617 = vrot.lane.b32.xlu2 %v595_v31, %s3543_s9  ;;  %v597_v33 = vadd.f32 %v595_v31, %v3776_v58 }
 0x5bd   :  { %v3116_v36 = vmul.f32 -1.442695, %v597_v33 }
 0x5be   :  { %v592_v32 = vpop.f32.mrf.mxu0 }
 0x5bf   :  { %3350 = vpow2.f32 %v3116_v36 }
 0x5c5   :  { %v3351_v25 = vpop.eup %3350 }
 0x5c6   :  { %v601_v38 = vadd.f32 1.0, %v3351_v25 }
 0x5c8   :  { %3352 = vrcp.f32 %v601_v38  ;;  %v613_v42 = vand.u32 2147483648, %v601_v38  ;;  %vm607_vm4 = vweird.f32 %v601_v38  ;;  %v611_v35 = vand.u32 2147483647, %v601_v38 }
 0x5ca   :  { %v614_v37 = vor.u32 1.1754944e-38, %v613_v42  ;;  %vm612_vm6 = vcmp.eq.f32.partialorder %v611_v35, 8.507059e+37 }
 0x5ce   :  { %v3353_v28 = vpop.eup %3352 }
 0x5cf   :  { %v603_v63 = vmul.f32 %v3353_v28, %v601_v38  ;;  %vm608_vm3 = vweird.f32 %v3353_v28 }
 0x5d0   :  { %vm609_vm5 = vmor %vm607_vm4, %vm608_vm3 }
 0x5d1   :  { %v604_v39 = vsub.f32 1.0, %v603_v63 }
 0x5d3   :  { %v605_v40 = vmul.f32 %v3353_v28, %v604_v39 }
 0x5d5   :  { %v606_v41 = vadd.f32 %v3353_v28, %v605_v40 }
 0x5d7   :  { %v610_v43 = vsel %vm609_vm5, %v3353_v28, %v606_v41 }
 0x5d8   :  { %v615_v44 = vsel %vm612_vm6, %v614_v37, %v610_v43 }
 0x5d9   :  { %v627_v49 = vsub.f32 1.0, %v615_v44  ;;  %v635_v53 = vmul.f32 %v633_v50, %v615_v44 }
 0x615   :  { %v618_v6 = vpop.permute.xlu2 %617 }
 0x616   :  { %v620_v45 = vmul.f32 %v618_v6, %v615_v44 }
 0x618   :  { %622 = vrot.lane.b32.xlu0 %v620_v45, %s3543_s9 }
 0x68a   :  { %v623_v46 = vpop.permute.xlu0 %622 }
 0x68b   :  { %v625_v47 = vadd.f32 %v623_v46, %v3776_v58 }
 0x68d   :  { %3354 = vtanh.f32 %v625_v47 }
 0x693   :  { %v3355_v48 = vpop.eup %3354 }
 0x694   :  { %629 = vrot.lane.b32.xlu1 %v3355_v48, %s3549_s21 }
 0x706   :  { %v630_v2 = vpop.permute.xlu1 %629 }
 0x707   :  { %v632_v54 = vmul.f32 %v630_v2, %v627_v49 }
 0x709   :  { %v3797_v55 = vadd.f32 %v635_v53, %v632_v54 }
 0x70b   :  { %v643_v56 = vpack.c.bf16 %v3797_v55, %v3797_v55  ;;  %v703_v27 = vrot.slane %v3797_v55, 6 }
 0x70d   :  { %v645_v57 = vrot.slane %v643_v56, 1 }
 0x70f   :  { %646 = vrot.lane.b32.xlu2 %v645_v57, %s3549_s21 }
 0x769   :  { %v647_v59 = vpop.permute.xlu2 %646 }
 0x76a   :  { %3117 = vmatmul.msk.bf16.vlgmr.msrb.gmra.mxu3 %vm107_vm1, %v647_v59 }
 0x7ed   :  { %v660_v10 = vpop.f32.mrf.mxu3 }
 0x7ee   :  { %v661_v60 = vadd.f32 %v660_v10, %v3772_v52 }
 0x7f0   :  { %v665_v62 = vrot.slane %v661_v60, 4 }
 0x7f2   :  { %687 = vrot.lane.b32.xlu0 %v665_v62, %s3543_s9  ;;  %v667_v1 = vadd.f32 %v665_v62, %v3776_v58 }
 0x7f4   :  { %v3118_v3 = vmul.f32 -1.442695, %v667_v1 }
 0x7f5   :  { %v662_v0 = vpop.f32.mrf.mxu3 }
 0x7f6   :  { %3356 = vpow2.f32 %v3118_v3 }
 0x7fc   :  { %v3357_v4 = vpop.eup %3356 }
 0x7fd   :  { %v671_v5 = vadd.f32 1.0, %v3357_v4 }
 0x7ff   :  { %3358 = vrcp.f32 %v671_v5  ;;  %v683_v13 = vand.u32 2147483648, %v671_v5  ;;  %vm677_vm8 = vweird.f32 %v671_v5  ;;  %v681_v14 = vand.u32 2147483647, %v671_v5 }
 0x801   :  { %v684_v16 = vor.u32 1.1754944e-38, %v683_v13  ;;  %vm682_vm10 = vcmp.eq.f32.partialorder %v681_v14, 8.507059e+37 }
 0x805   :  { %v3359_v7 = vpop.eup %3358 }
 0x806   :  { %v673_v8 = vmul.f32 %v3359_v7, %v671_v5  ;;  %vm678_vm7 = vweird.f32 %v3359_v7 }
 0x807   :  { %vm679_vm9 = vmor %vm677_vm8, %vm678_vm7 }
 0x808   :  { %v674_v9 = vsub.f32 1.0, %v673_v8 }
 0x80a   :  { %v675_v11 = vmul.f32 %v3359_v7, %v674_v9 }
 0x80c   :  { %v676_v12 = vadd.f32 %v3359_v7, %v675_v11 }
 0x80e   :  { %v680_v15 = vsel %vm679_vm9, %v3359_v7, %v676_v12 }
 0x80f   :  { %v685_v18 = vsel %vm682_vm10, %v684_v16, %v680_v15 }
 0x810   :  { %v697_v26 = vsub.f32 1.0, %v685_v18  ;;  %v705_v30 = vmul.f32 %v703_v27, %v685_v18 }
 0x864   :  { %v688_v17 = vpop.permute.xlu0 %687 }
 0x865   :  { %v690_v19 = vmul.f32 %v688_v17, %v685_v18 }
 0x867   :  { %692 = vrot.lane.b32.xlu1 %v690_v19, %s3543_s9 }
 0x8d9   :  { %v693_v20 = vpop.permute.xlu1 %692 }
 0x8da   :  { %v695_v21 = vadd.f32 %v693_v20, %v3776_v58 }
 0x8dc   :  { %3360 = vtanh.f32 %v695_v21 }
 0x8e2   :  { %v3361_v23 = vpop.eup %3360 }
 0x8e3   :  { %699 = vrot.lane.b32.xlu2 %v3361_v23, %s3549_s21 }
 0x93d   :  { %v700_v29 = vpop.permute.xlu2 %699 }
 0x93e   :  { %v702_v31 = vmul.f32 %v700_v29, %v697_v26 }
 0x940   :  { %v3810_v32 = vadd.f32 %v705_v30, %v702_v31 }
 0x942   :  { %v713_v33 = vpack.c.bf16 %v3810_v32, %v3810_v32  ;;  %v773_v10 = vrot.slane %v3810_v32, 6 }
 0x944   :  { %v715_v36 = vrot.slane %v713_v33, 2 }
 0x946   :  { %716 = vrot.lane.b32.xlu0 %v715_v36, %s3549_s21 }
 0x9b8   :  { %v717_v25 = vpop.permute.xlu0 %716 }
 0x9b9   :  { %3119 = vmatmul.msk.bf16.vlgmr.msrb.gmra.mxu1 %vm107_vm1, %v717_v25 }
 0xa36   :  { %v730_v38 = vpop.f32.mrf.mxu1 }
 0xa37   :  { %v731_v28 = vadd.f32 %v730_v38, %v3772_v52 }
 0xa39   :  { %v735_v63 = vrot.slane %v731_v28, 2 }
 0xa3b   :  { %757 = vrot.lane.b32.xlu1 %v735_v63, %s3543_s9  ;;  %v737_v40 = vadd.f32 %v735_v63, %v3776_v58 }
 0xa3d   :  { %v3120_v41 = vmul.f32 -1.442695, %v737_v40 }
 0xa3e   :  { %v732_v39 = vpop.f32.mrf.mxu1 }
 0xa3f   :  { %3362 = vpow2.f32 %v3120_v41  ;;  %v3286_v41 = vld [vmem:[%s4890_s4 + $0x18] sm:$0xff] }
 0xa40   :  { %1128 = vmatpush.bf16.msrb.mxu0 %v3286_v41 }
 0xa45   :  { %v3363_v42 = vpop.eup %3362 }
 0xa46   :  { %v741_v35 = vadd.f32 1.0, %v3363_v42  ;;  %v3285_v42 = vld [vmem:[%s4890_s4 + $0x10] sm:$0xff] }
 0xa47   :  { %1129 = vmatpush.bf16.msrb.mxu0 %v3285_v42 }
 0xa48   :  { %3364 = vrcp.f32 %v741_v35  ;;  %v753_v46 = vand.u32 2147483648, %v741_v35  ;;  %vm747_vm12 = vweird.f32 %v741_v35  ;;  %v751_v47 = vand.u32 2147483647, %v741_v35 }
 0xa4a   :  { %v754_v49 = vor.u32 1.1754944e-38, %v753_v46  ;;  %vm752_vm14 = vcmp.eq.f32.partialorder %v751_v47, 8.507059e+37 }
 0xa4e   :  { %v3365_v43 = vpop.eup %3364 }
 0xa4f   :  { %v743_v37 = vmul.f32 %v3365_v43, %v741_v35  ;;  %vm748_vm11 = vweird.f32 %v3365_v43  ;;  %v3284_v35 = vld [vmem:[%s4890_s4 + $0x8] sm:$0xff] }
 0xa50   :  { %vm749_vm13 = vmor %vm747_vm12, %vm748_vm11  ;;  %1130 = vmatpush.bf16.msrb.mxu0 %v3284_v35 }
 0xa51   :  { %v744_v6 = vsub.f32 1.0, %v743_v37 }
 0xa53   :  { %v745_v44 = vmul.f32 %v3365_v43, %v744_v6 }
 0xa55   :  { %v746_v45 = vadd.f32 %v3365_v43, %v745_v44 }
 0xa57   :  { %v750_v48 = vsel %vm749_vm13, %v3365_v43, %v746_v45  ;;  %v3283_v43 = vld [vmem:[%s4890_s4] sm:$0xff] }
 0xa58   :  { %v755_v2 = vsel %vm752_vm14, %v754_v49, %v750_v48  ;;  %1131 = vmatpush.bf16.msrb.mxu0 %v3283_v43 }
 0xa59   :  { %v767_v59 = vsub.f32 1.0, %v755_v2  ;;  %v775_v62 = vmul.f32 %v773_v10, %v755_v2 }
 0xaad   :  { %v758_v50 = vpop.permute.xlu1 %757 }
 0xaae   :  { %v760_v53 = vmul.f32 %v758_v50, %v755_v2 }
 0xab0   :  { %762 = vrot.lane.b32.xlu2 %v760_v53, %s3543_s9 }
 0xb0a   :  { %v763_v54 = vpop.permute.xlu2 %762 }
 0xb0b   :  { %v765_v56 = vadd.f32 %v763_v54, %v3776_v58 }
 0xb0d   :  { %3366 = vtanh.f32 %v765_v56 }
 0xb13   :  { %v3367_v57 = vpop.eup %3366 }
 0xb14   :  { %769 = vrot.lane.b32.xlu0 %v3367_v57, %s3549_s21 }
 0xb86   :  { %v770_v60 = vpop.permute.xlu0 %769 }
 0xb87   :  { %v772_v0 = vmul.f32 %v770_v60, %v767_v59 }
 0xb89   :  { %v3823_v1 = vadd.f32 %v775_v62, %v772_v0 }
 0xb8b   :  { %v783_v3 = vpack.c.bf16 %v3823_v1, %v3823_v1  ;;  %v841_v25 = vrot.slane %v3823_v1, 6 }
 0xb8d   :  { %v785_v4 = vrot.slane %v783_v3, 3 }
 0xb8f   :  { %786 = vrot.lane.b32.xlu1 %v785_v4, %s3549_s21 }
 0xc01   :  { %v787_v5 = vpop.permute.xlu1 %786 }
 0xc02   :  { %3121 = vmatmul.msk.bf16.vlgmr.msrb.gmra.mxu2 %vm107_vm1, %v787_v5 }
 0xc85   :  { %v800_v58 = vpop.f32.mrf.mxu2 }
 0xc86   :  { %v801_v7 = vadd.f32 %v800_v58, %v3772_v52 }
 0xc88   :  { %825 = vrot.lane.b32.xlu2 %v801_v7, %s3543_s9  ;;  %v804_v9 = vadd.f32 %v801_v7, %v3779_v61 }
 0xc8a   :  { %v3122_v11 = vmul.f32 -1.442695, %v804_v9 }
 0xc8c   :  { %3368 = vpow2.f32 %v3122_v11 }
 0xc8d   :  { %v802_v8 = vpop.f32.mrf.mxu2 }
 0xc92   :  { %v3369_v12 = vpop.eup %3368 }
 0xc93   :  { %v808_v13 = vadd.f32 1.0, %v3369_v12 }
 0xc95   :  { %3370 = vrcp.f32 %v808_v13  ;;  %v820_v19 = vand.u32 2147483648, %v808_v13  ;;  %vm814_vm2 = vweird.f32 %v808_v13  ;;  %v818_v20 = vand.u32 2147483647, %v808_v13 }
 0xc97   :  { %v821_v23 = vor.u32 1.1754944e-38, %v820_v19  ;;  %vm819_vm4 = vcmp.eq.f32.partialorder %v818_v20, 8.507059e+37 }
 0xc9b   :  { %v3371_v14 = vpop.eup %3370 }
 0xc9c   :  { %v810_v15 = vmul.f32 %v3371_v14, %v808_v13  ;;  %vm815_vm0 = vweird.f32 %v3371_v14 }
 0xc9d   :  { %vm816_vm3 = vmor %vm814_vm2, %vm815_vm0 }
 0xc9e   :  { %v811_v16 = vsub.f32 1.0, %v810_v15 }
 0xca0   :  { %v812_v17 = vmul.f32 %v3371_v14, %v811_v16 }
 0xca2   :  { %v813_v18 = vadd.f32 %v3371_v14, %v812_v17 }
 0xca4   :  { %v817_v21 = vsel %vm816_vm3, %v3371_v14, %v813_v18  ;;  %vm572_vm3 = vcmask 254976  }
 0xca5   :  { %v822_v27 = vsel %vm819_vm4, %v821_v23, %v817_v21  ;;  %vm781_vm4 = vcmask 261126  }
 0xca6   :  { %v835_v36 = vsub.f32 1.0, %v822_v27  ;;  %v843_v28 = vmul.f32 %v841_v25, %v822_v27 }
 0xce2   :  { %v826_v26 = vpop.permute.xlu2 %825 }
 0xce3   :  { %v828_v29 = vmul.f32 %v826_v26, %v822_v27 }
 0xce5   :  { %830 = vrot.lane.b32.xlu0 %v828_v29, %s3543_s9 }
 0xd57   :  { %v831_v30 = vpop.permute.xlu0 %830 }
 0xd58   :  { %v833_v31 = vadd.f32 %v831_v30, %v3779_v61 }
 0xd5a   :  { %3372 = vtanh.f32 %v833_v31 }
 0xd60   :  { %v3373_v33 = vpop.eup %3372 }
 0xd61   :  { %837 = vrot.lane.b32.xlu1 %v3373_v33, %s3549_s21 }
 0xdd3   :  { %v838_v38 = vpop.permute.xlu1 %837 }
 0xdd4   :  { %v840_v63 = vmul.f32 %v838_v38, %v835_v36 }
 0xdd6   :  { %v3836_v39 = vadd.f32 %v843_v28, %v840_v63 }
 0xdd8   :  { %v850_v40 = vpack.c.bf16 %v3836_v39, %v3836_v39  ;;  %v909_v8 = vrot.slane %v3836_v39, 6 }
 0xdda   :  { %852 = vrot.lane.b32.xlu2 %v850_v40, %s3549_s21 }
 0xe34   :  { %v853_v37 = vpop.permute.xlu2 %852 }
 0xe35   :  { %3123 = vmatmul.msk.bf16.vlgmr.msra.gmra.mxu0 %vm107_vm1, %v853_v37 }
 0xe45   :  { %3154 = vmatmul.msk.bf16.vlgmr.msrb.gmra.mxu0 %vm287_vm15, %v3768_v51 }
 0xeb2   :  { %v866_v6 = vpop.f32.mrf.mxu0 }
 0xeb3   :  { %v867_v44 = vadd.f32 %v866_v6, %v3772_v52 }
 0xeb5   :  { %v871_v45 = vrot.slane %v867_v44, 6 }
 0xeb7   :  { %893 = vrot.lane.b32.xlu0 %v871_v45, %s3543_s9  ;;  %v873_v47 = vadd.f32 %v871_v45, %v3779_v61 }
 0xeb9   :  { %v3124_v48 = vmul.f32 -1.442695, %v873_v47 }
 0xeba   :  { %v868_v46 = vpop.f32.mrf.mxu0 }
 0xebb   :  { %3374 = vpow2.f32 %v3124_v48 }
 0xec1   :  { %v3375_v49 = vpop.eup %3374 }
 0xec2   :  { %v877_v50 = vadd.f32 1.0, %v3375_v49 }
 0xec4   :  { %3376 = vrcp.f32 %v877_v50  ;;  %v889_v51 = vand.u32 2147483648, %v877_v50  ;;  %vm883_vm6 = vweird.f32 %v877_v50  ;;  %v887_v59 = vand.u32 2147483647, %v877_v50 }
 0xec6   :  { %v890_v60 = vor.u32 1.1754944e-38, %v889_v51  ;;  %vm888_vm8 = vcmp.eq.f32.partialorder %v887_v59, 8.507059e+37 }
 0xeca   :  { %v3377_v2 = vpop.eup %3376 }
 0xecb   :  { %v879_v53 = vmul.f32 %v3377_v2, %v877_v50  ;;  %vm884_vm5 = vweird.f32 %v3377_v2 }
 0xecc   :  { %vm885_vm7 = vmor %vm883_vm6, %vm884_vm5  ;;  %vm711_vm5 = vcmask 259076   ;;  %vm641_vm6 = vcmask 257026  }
 0xecd   :  { %v880_v54 = vsub.f32 1.0, %v879_v53 }
 0xecf   :  { %v881_v56 = vmul.f32 %v3377_v2, %v880_v54 }
 0xed1   :  { %v882_v57 = vadd.f32 %v3377_v2, %v881_v56 }
 0xed3   :  { %v886_v10 = vsel %vm885_vm7, %v3377_v2, %v882_v57 }
 0xed4   :  { %v891_v0 = vsel %vm888_vm8, %v890_v60, %v886_v10 }
 0xed5   :  { %v903_v7 = vsub.f32 1.0, %v891_v0  ;;  %v911_v11 = vmul.f32 %v909_v8, %v891_v0 }
 0xf29   :  { %v894_v62 = vpop.permute.xlu0 %893 }
 0xf2a   :  { %v896_v3 = vmul.f32 %v894_v62, %v891_v0 }
 0xf2c   :  { %898 = vrot.lane.b32.xlu1 %v896_v3, %s3543_s9 }
 0xf9e   :  { %v899_v4 = vpop.permute.xlu1 %898 }
 0xf9f   :  { %v901_v5 = vadd.f32 %v899_v4, %v3779_v61 }
 0xfa1   :  { %3378 = vtanh.f32 %v901_v5 }
 0xfa7   :  { %v3379_v58 = vpop.eup %3378 }
 0xfa8   :  { %905 = vrot.lane.b32.xlu2 %v3379_v58, %s3549_s21 }
0x1002   :  { %v906_v9 = vpop.permute.xlu2 %905 }
0x1003   :  { %v908_v12 = vmul.f32 %v906_v9, %v903_v7 }
0x1005   :  { %v3863_v13 = vadd.f32 %v911_v11, %v908_v12 }
0x1007   :  { %v918_v14 = vpack.c.bf16 %v3863_v13, %v3863_v13  ;;  %v978_v44 = vrot.slane %v3863_v13, 6 }
0x1009   :  { %v920_v15 = vrot.slane %v918_v14, 1 }
0x100b   :  { %921 = vrot.lane.b32.xlu0 %v920_v15, %s3549_s21 }
0x107d   :  { %v922_v16 = vpop.permute.xlu0 %921 }
0x107e   :  { %3125 = vmatmul.msk.bf16.vlgmr.msra.gmra.mxu3 %vm107_vm1, %v922_v16 }
0x1101   :  { %v935_v17 = vpop.f32.mrf.mxu3 }
0x1102   :  { %v936_v18 = vadd.f32 %v935_v17, %v3772_v52 }
0x1104   :  { %v940_v19 = vrot.slane %v936_v18, 4 }
0x1106   :  { %962 = vrot.lane.b32.xlu1 %v940_v19, %s3543_s9  ;;  %v942_v21 = vadd.f32 %v940_v19, %v3779_v61 }
0x1108   :  { %v3126_v23 = vmul.f32 -1.442695, %v942_v21 }
0x1109   :  { %v937_v20 = vpop.f32.mrf.mxu3 }
0x110a   :  { %3380 = vpow2.f32 %v3126_v23 }
0x1110   :  { %v3381_v26 = vpop.eup %3380 }
0x1111   :  { %v946_v27 = vadd.f32 1.0, %v3381_v26 }
0x1113   :  { %3382 = vrcp.f32 %v946_v27  ;;  %v958_v25 = vand.u32 2147483648, %v946_v27  ;;  %vm952_vm10 = vweird.f32 %v946_v27  ;;  %v956_v38 = vand.u32 2147483647, %v946_v27 }
0x1115   :  { %v959_v63 = vor.u32 1.1754944e-38, %v958_v25  ;;  %vm957_vm12 = vcmp.eq.f32.partialorder %v956_v38, 8.507059e+37  ;;  %v1138_v38 = vld [vmem:[#allocation8 + $0x24] ss:$0 sm:$0xff] }
0x1119   :  { %v3383_v29 = vpop.eup %3382 }
0x111a   :  { %v948_v30 = vmul.f32 %v3383_v29, %v946_v27  ;;  %vm953_vm9 = vweird.f32 %v3383_v29 }
0x111b   :  { %vm954_vm11 = vmor %vm952_vm10, %vm953_vm9 }
0x111c   :  { %v949_v31 = vsub.f32 1.0, %v948_v30 }
0x111e   :  { %v950_v33 = vmul.f32 %v3383_v29, %v949_v31 }
0x1120   :  { %v951_v36 = vadd.f32 %v3383_v29, %v950_v33 }
0x1122   :  { %v955_v28 = vsel %vm954_vm11, %v3383_v29, %v951_v36  ;;  %v1133_v36 = vpop.f32.mrf.mxu0 }
0x1123   :  { %v960_v41 = vsel %vm957_vm12, %v959_v63, %v955_v28 }
0x1124   :  { %v972_v6 = vsub.f32 1.0, %v960_v41  ;;  %v980_v46 = vmul.f32 %v978_v44, %v960_v41 }
0x1178   :  { %v963_v40 = vpop.permute.xlu1 %962 }
0x1179   :  { %v965_v42 = vmul.f32 %v963_v40, %v960_v41 }
0x117b   :  { %967 = vrot.lane.b32.xlu2 %v965_v42, %s3543_s9  ;;  %v1135_v42 = vpop.f32.mrf.mxu0 }
0x11d5   :  { %v968_v35 = vpop.permute.xlu2 %967 }
0x11d6   :  { %v970_v43 = vadd.f32 %v968_v35, %v3779_v61 }
0x11d8   :  { %3384 = vtanh.f32 %v970_v43 }
0x11de   :  { %v3385_v37 = vpop.eup %3384 }
0x11df   :  { %974 = vrot.lane.b32.xlu0 %v3385_v37, %s3549_s21 }
0x1251   :  { %v975_v45 = vpop.permute.xlu0 %974 }
0x1252   :  { %v977_v47 = vmul.f32 %v975_v45, %v972_v6 }
0x1254   :  { %v3876_v48 = vadd.f32 %v980_v46, %v977_v47 }
0x1256   :  { %v987_v49 = vpack.c.bf16 %v3876_v48, %v3876_v48  ;;  %v1047_v19 = vrot.slane %v3876_v48, 6 }
0x1258   :  { %v989_v50 = vrot.slane %v987_v49, 2 }
0x125a   :  { %990 = vrot.lane.b32.xlu1 %v989_v50, %s3549_s21 }
0x12cc   :  { %v991_v2 = vpop.permute.xlu1 %990 }
0x12cd   :  { %3127 = vmatmul.msk.bf16.vlgmr.msra.gmra.mxu1 %vm107_vm1, %v991_v2 }
0x134a   :  { %v1004_v53 = vpop.f32.mrf.mxu1 }
0x134b   :  { %v1005_v54 = vadd.f32 %v1004_v53, %v3772_v52 }
0x134d   :  { %v1009_v56 = vrot.slane %v1005_v54, 2 }
0x134f   :  { %1031 = vrot.lane.b32.xlu2 %v1009_v56, %s3543_s9  ;;  %v1011_v51 = vadd.f32 %v1009_v56, %v3779_v61 }
0x1351   :  { %v3128_v59 = vmul.f32 -1.442695, %v1011_v51  ;;  %v1199_v51 = vld [vmem:[#allocation8 + $0x27] ss:$0 sm:$0xff] }
0x1352   :  { %v1006_v57 = vpop.f32.mrf.mxu1 }
0x1353   :  { %3386 = vpow2.f32 %v3128_v59  ;;  %v1200_v59 = vld [vmem:[#allocation8 + $0x40] ss:$0 sm:$0xff] }
0x1357   :  { %569 = vrot.lane.b32.xlu2 %v3784_v24, %s3549_s21 }
0x1359   :  { %v3387_v10 = vpop.eup %3386 }
0x135a   :  { %v1015_v60 = vadd.f32 1.0, %v3387_v10 }
0x135c   :  { %3388 = vrcp.f32 %v1015_v60  ;;  %v1027_v24 = vand.u32 2147483648, %v1015_v60  ;;  %vm1021_vm14 = vweird.f32 %v1015_v60  ;;  %v1025_v5 = vand.u32 2147483647, %v1015_v60 }
0x135e   :  { %v1028_v58 = vor.u32 1.1754944e-38, %v1027_v24  ;;  %vm1026_vm2 = vcmp.eq.f32.partialorder %v1025_v5, 8.507059e+37 }
0x135f   :  { %778 = vrot.lane.b32.xlu2 %v3823_v1, %s3549_s21 }
0x1362   :  { %v3389_v52 = vpop.eup %3388 }
0x1363   :  { %v1017_v62 = vmul.f32 %v3389_v52, %v1015_v60  ;;  %vm1022_vm13 = vweird.f32 %v3389_v52 }
0x1364   :  { %vm1023_vm0 = vmor %vm1021_vm14, %vm1022_vm13 }
0x1365   :  { %v1018_v0 = vsub.f32 1.0, %v1017_v62 }
0x1367   :  { %983 = vrot.lane.b32.xlu2 %v3876_v48, %s3549_s21  ;;  %v1019_v3 = vmul.f32 %v3389_v52, %v1018_v0 }
0x1369   :  { %v1020_v4 = vadd.f32 %v3389_v52, %v1019_v3 }
0x136b   :  { %v1024_v1 = vsel %vm1023_vm0, %v3389_v52, %v1020_v4 }
0x136c   :  { %v1029_v8 = vsel %vm1026_vm2, %v1028_v58, %v1024_v1 }
0x136d   :  { %v1049_v21 = vmul.f32 %v1047_v19, %v1029_v8 }
0x13a9   :  { %v1032_v7 = vpop.permute.xlu2 %1031 }
0x13aa   :  { %v1034_v9 = vmul.f32 %v1032_v7, %v1029_v8 }
0x13ac   :  { %1036 = vrot.lane.b32.xlu0 %v1034_v9, %s3543_s9 }
0x13b1   :  { %v570_v11 = vpop.permute.xlu2 %569 }
0x13b2   :  { %573 = vst.msk [vmem:[#allocation2] sm:$0x3] %vm572_vm3, %v570_v11 }
0x13b4   :  { %638 = vrot.lane.b32.xlu0 %v3797_v55, %s3549_s21 }
0x13b9   :  { %v779_v12 = vpop.permute.xlu2 %778 }
0x13ba   :  { %782 = vst.msk [vmem:[#allocation2] sm:$0xc0] %vm781_vm4, %v779_v12  ;;  %v3292_v12 = vld [vmem:[%s4888_s2 + $0x38] sm:$0xff] }
0x13bb   :  { %1322 = vmatpush.bf16.msrb.mxu3 %v3292_v12 }
0x13bc   :  { %846 = vrot.lane.b32.xlu0 %v3836_v39, %s3549_s21  ;;  %v1041_v39 = vsub.f32 1.0, %v1029_v8 }
0x13c1   :  { %v984_v14 = vpop.permute.xlu2 %983 }
0x13c2   :  { %986 = vst.msk [vmem:[#allocation2 + $0x8] sm:$0x30] %vm711_vm5, %v984_v14 }
0x141e   :  { %v1037_v15 = vpop.permute.xlu0 %1036 }
0x141f   :  { %v1039_v16 = vadd.f32 %v1037_v15, %v3779_v61  ;;  %v3288_v61 = vld [vmem:[%s4890_s4 + $0x28] sm:$0xff] }
0x1420   :  { %1092 = vmatpush.bf16.msra.mxu2 %v3288_v61  ;;  %v3291_v61 = vld [vmem:[%s4888_s2 + $0x30] sm:$0xff] }
0x1421   :  { %3390 = vtanh.f32 %v1039_v16  ;;  %1323 = vmatpush.bf16.msrb.mxu3 %v3291_v61 }
0x1426   :  { %v639_v17 = vpop.permute.xlu0 %638 }
0x1427   :  { %v3391_v18 = vpop.eup %3390  ;;  %642 = vst.msk [vmem:[#allocation2] sm:$0xc] %vm641_vm6, %v639_v17 }
0x1428   :  { %1043 = vrot.lane.b32.xlu1 %v3391_v18, %s3549_s21 }
0x142e   :  { %v847_v55 = vpop.permute.xlu0 %846 }
0x142f   :  { %849 = vst.msk [vmem:[#allocation2 + $0x8] sm:$0x3] %vm572_vm3, %v847_v55 }
0x1430   :  { %708 = vrot.lane.b32.xlu1 %v3810_v32, %s3549_s21 }
0x1438   :  { %914 = vrot.lane.b32.xlu1 %v3863_v13, %s3549_s21  ;;  %v3287_v13 = vld [vmem:[%s4890_s4 + $0x20] sm:$0xff] }
0x1439   :  { %1093 = vmatpush.bf16.msra.mxu2 %v3287_v13 }
0x149a   :  { %v1044_v20 = vpop.permute.xlu1 %1043 }
0x149b   :  { %v1046_v23 = vmul.f32 %v1044_v20, %v1041_v39 }
0x149d   :  { %v1050_v26 = vadd.f32 %v1049_v21, %v1046_v23  ;;  %v3290_v21 = vld [vmem:[%s4888_s2 + $0x28] sm:$0xff] }
0x149e   :  { %1324 = vmatpush.bf16.msrb.mxu3 %v3290_v21 }
0x149f   :  { %1052 = vrot.lane.b32.xlu0 %v1050_v26, %s3549_s21 }
0x14a2   :  { %v709_v27 = vpop.permute.xlu1 %708 }
0x14a3   :  { %712 = vst.msk [vmem:[#allocation2] sm:$0x30] %vm711_vm5, %v709_v27 }
0x14aa   :  { %v915_v32 = vpop.permute.xlu1 %914  ;;  %v1056_v30 = vld [vmem:[#allocation2] sm:$0xff] }
0x14ab   :  { %917 = vst.msk [vmem:[#allocation2 + $0x8] sm:$0xc] %vm641_vm6, %v915_v32 }
0x1511   :  { %v1053_v29 = vpop.permute.xlu0 %1052 }
0x1512   :  { %1055 = vst.msk [vmem:[#allocation2 + $0x8] sm:$0xc0] %vm781_vm4, %v1053_v29 }
0x1519   :  { %v1057_v31 = vld [vmem:[#allocation2 + $0x8] sm:$0xff] }
0x151a   :  { %v1066_v33 = vpack.c.bf16 %v1057_v31, %v1056_v30  ;;  %v3289_v31 = vld [vmem:[%s4888_s2 + $0x20] sm:$0xff] }
0x151b   :  { %1325 = vmatpush.bf16.msrb.mxu3 %v3289_v31 }
0x151c   :  { %3137 = vmatmul.msk.bf16.vlgmr.msra.gmra.mxu2 %vm107_vm1, %v1066_v33 }
0x159f   :  { %v1095_v25 = vpop.f32.mrf.mxu2 }
0x15a0   :  { %v1134_v28 = vadd.f32 %v1133_v36, %v1095_v25 }
0x15a2   :  { %v3919_v63 = vadd.f32 %v1138_v38, %v1134_v28 }
0x15a4   :  { %1203 = vrot.lane.b32.xlu1 %v3919_v63, %s3549_s21  ;;  %v1143_v40 = vsel %vm107_vm1, %v3919_v63, 0.0  ;;  %v1151_v41 = vmul.f32 %v3919_v63, %v3919_v63 }
0x15a5   :  { %1144 = vadd.xlane.f32.xlu2 %v1143_v40 }
0x15a6   :  { %1219 = vrot.lane.b32.xlu0 %v1151_v41, %s3549_s21  ;;  %v1153_v44 = vsel %vm107_vm1, %v1151_v41, 0.0 }
0x15a7   :  { %v1097_v35 = vpop.f32.mrf.mxu2 }
0x15a8   :  { %v1136_v43 = vadd.f32 %v1135_v42, %v1097_v35 }
0x15aa   :  { %v3928_v37 = vadd.f32 %v1138_v38, %v1136_v43 }
0x15ac   :  { %v1152_v6 = vmul.f32 %v3928_v37, %v3928_v37  ;;  %v1146_v46 = vsel %vm107_vm1, %v3928_v37, 0.0 }
0x15ae   :  { %1221 = vrot.lane.b32.xlu1 %v1152_v6, %s3549_s21  ;;  %v1156_v45 = vsel %vm107_vm1, %v1152_v6, 0.0 }
0x15bd   :  { %1205 = vrot.lane.b32.xlu2 %v3928_v37, %s3549_s21 }
0x15d0   :  { %1154 = vadd.xlane.f32.xlu0 %v1153_v44 }
0x15d8   :  { %1157 = vadd.xlane.f32.xlu1 %v1156_v45  ;;  %1147 = vadd.xlane.f32.xlu0 %v1146_v46 }
0x1616   :  { %v1204_v47 = vpop.permute.xlu1 %1203 }
0x1617   :  { %v1209_v48 = vsel %vm107_vm1, %v1204_v47, 0.0 }
0x1618   :  { %v1220_v49 = vpop.permute.xlu0 %1219  ;;  %v1145_v50 = vpop.xlane.xlu2 %1144  ;;  %1210 = vadd.xlane.f32.xlu1 %v1209_v48 }
0x1619   :  { %v1225_v2 = vsel %vm107_vm1, %v1220_v49, 0.0  ;;  %v3949_v62 = vmul.f32 %v1145_v50, %v3647_v34 }
0x161a   :  { %1226 = vadd.xlane.f32.xlu2 %v1225_v2 }
0x161b   :  { %v1161_v24 = vmul.f32 %v3949_v62, %v3949_v62 }
0x1620   :  { %v1206_v53 = vpop.permute.xlu2 %1205  ;;  %v1222_v54 = vpop.permute.xlu1 %1221 }
0x1621   :  { %v1212_v56 = vsel %vm107_vm1, %v1206_v53, 0.0  ;;  %v1228_v57 = vsel %vm107_vm1, %v1222_v54, 0.0 }
0x1622   :  { %1213 = vadd.xlane.f32.xlu2 %v1212_v56  ;;  %1229 = vadd.xlane.f32.xlu0 %v1228_v57  ;;  %v1165_v57 = vsub.f32 %v3919_v63, %v3949_v62 }
0x1631   :  { %1264 = vrot.lane.b32.xlu1 %v1199_v51, %s3548_s17 }
0x163a   :  { %1270 = vrot.lane.b32.xlu2 %v1200_v59, %s3548_s17 }
0x1643   :  { %v1155_v10 = vpop.xlane.xlu0 %1154 }
0x1644   :  { %v1159_v0 = vmul.f32 %v1155_v10, %v3647_v34 }
0x1646   :  { %v1163_v1 = vsub.f32 %v1159_v0, %v1161_v24 }
0x1648   :  { %v1167_v7 = vadd.f32 1e-05, %v1163_v1 }
0x164a   :  { %3392 = vrsqrt.f32 %v1167_v7  ;;  %vm1175_vm8 = vweird.f32 %v1167_v7 }
0x164b   :  { %v1148_v60 = vpop.xlane.xlu0 %1147  ;;  %v1158_v3 = vpop.xlane.xlu1 %1157 }
0x164c   :  { %v3946_v52 = vmul.f32 %v1148_v60, %v3647_v34  ;;  %v1160_v5 = vmul.f32 %v1158_v3, %v3647_v34 }
0x164e   :  { %v1162_v4 = vmul.f32 %v3946_v52, %v3946_v52  ;;  %v1166_v51 = vsub.f32 %v3928_v37, %v3946_v52 }
0x1650   :  { %v1164_v58 = vsub.f32 %v1160_v5, %v1162_v4  ;;  %v3393_v14 = vpop.eup %3392  ;;  %v1141_v4 = vld [vmem:[#allocation8 + $0x25] ss:$0 sm:$0xff] }
0x1651   :  { %v1170_v39 = vmul.f32 %v3393_v14, %v1167_v7  ;;  %vm1176_vm7 = vweird.f32 %v3393_v14 }
0x1652   :  { %v1168_v8 = vadd.f32 1e-05, %v1164_v58  ;;  %vm3973_vm11 = vmor %vm1175_vm8, %vm1176_vm7 }
0x1653   :  { %v1171_v23 = vmul.f32 %v3393_v14, %v1170_v39 }
0x1654   :  { %3394 = vrsqrt.f32 %v1168_v8  ;;  %vm1185_vm12 = vweird.f32 %v1168_v8 }
0x1655   :  { %v1172_v33 = vmul.f32 0.5, %v1171_v23 }
0x1657   :  { %v1173_v41 = vsub.f32 1.5, %v1172_v33 }
0x1659   :  { %v1174_v6 = vmul.f32 %v3393_v14, %v1173_v41  ;;  %v1390_v41 = vld [vmem:[#allocation8 + $0x44] ss:$0 sm:$0xff] }
0x165a   :  { %v3395_v16 = vpop.eup %3394 }
0x165b   :  { %v1180_v19 = vmul.f32 %v3395_v16, %v1168_v8  ;;  %vm1186_vm9 = vweird.f32 %v3395_v16  ;;  %v1178_v2 = vsel %vm3973_vm11, %v3393_v14, %v1174_v6 }
0x165c   :  { %vm3977_vm13 = vmor %vm1185_vm12, %vm1186_vm9  ;;  %v1189_v0 = vmul.f32 %v1178_v2, %v1165_v57 }
0x165d   :  { %v1181_v26 = vmul.f32 %v3395_v16, %v1180_v19 }
0x165e   :  { %v1191_v7 = vmul.f32 %v1189_v0, %v1141_v4 }
0x165f   :  { %v1182_v36 = vmul.f32 0.5, %v1181_v26 }
0x1661   :  { %v1183_v42 = vsub.f32 1.5, %v1182_v36 }
0x1663   :  { %v1184_v44 = vmul.f32 %v3395_v16, %v1183_v42 }
0x1665   :  { %v1188_v53 = vsel %vm3977_vm13, %v3395_v16, %v1184_v44 }
0x1666   :  { %v1190_v3 = vmul.f32 %v1188_v53, %v1166_v51 }
0x1668   :  { %v1192_v8 = vmul.f32 %v1190_v3, %v1141_v4 }
0x168b   :  { %v1211_v9 = vpop.xlane.xlu1 %1210 }
0x168c   :  { %v1215_v11 = vmul.f32 %v1211_v9, %v3647_v34  ;;  %v1142_v9 = vld [vmem:[#allocation8 + $0x26] ss:$0 sm:$0xff] }
0x168d   :  { %v1227_v15 = vpop.xlane.xlu2 %1226  ;;  %v1193_v12 = vadd.f32 %v1191_v7, %v1142_v9  ;;  %v1194_v14 = vadd.f32 %v1192_v8, %v1142_v9 }
0x168e   :  { %v1233_v17 = vmul.f32 %v1215_v11, %v1215_v11  ;;  %v1231_v18 = vmul.f32 %v1227_v15, %v3647_v34  ;;  %v1237_v50 = vsub.f32 %v3919_v63, %v1215_v11 }
0x1690   :  { %v1235_v55 = vsub.f32 %v1231_v18, %v1233_v17  ;;  %v1195_v18 = vmul.f32 0.01, %v1193_v12 }
0x1692   :  { %v1239_v20 = vadd.f32 1e-05, %v1235_v55  ;;  %v1196_v55 = vmul.f32 0.01, %v1194_v14 }
0x1694   :  { %3396 = vrsqrt.f32 %v1239_v20  ;;  %vm1247_vm14 = vweird.f32 %v1239_v20  ;;  %v1198_v21 = vmax.f32 %v1194_v14, %v1196_v55 }
0x1695   :  { %v1214_v27 = vpop.xlane.xlu2 %1213  ;;  %v1230_v32 = vpop.xlane.xlu0 %1229 }
0x1696   :  { %v1216_v13 = vmul.f32 %v1214_v27, %v3647_v34  ;;  %v1232_v30 = vmul.f32 %v1230_v32, %v3647_v34  ;;  %v1290_v32 = vld [vmem:[#allocation8 + $0x41] ss:$0 sm:$0xff] }
0x1698   :  { %v1234_v29 = vmul.f32 %v1216_v13, %v1216_v13  ;;  %v1238_v63 = vsub.f32 %v3928_v37, %v1216_v13 }
0x169a   :  { %v3397_v25 = vpop.eup %3396  ;;  %v1236_v38 = vsub.f32 %v1232_v30, %v1234_v29 }
0x169b   :  { %v1242_v28 = vmul.f32 %v3397_v25, %v1239_v20  ;;  %vm1248_vm10 = vweird.f32 %v3397_v25  ;;  %v1197_v20 = vmax.f32 %v1193_v12, %v1195_v18 }
0x169c   :  { %v1240_v40 = vadd.f32 1e-05, %v1236_v38  ;;  %vm1249_vm0 = vmor %vm1247_vm14, %vm1248_vm10 }
0x169d   :  { %v1243_v35 = vmul.f32 %v3397_v25, %v1242_v28  ;;  %v1271_v58 = vpop.permute.xlu2 %1270 }
0x169e   :  { %3398 = vrsqrt.f32 %v1240_v40  ;;  %vm1257_vm3 = vweird.f32 %v1240_v40 }
0x169f   :  { %v1244_v43 = vmul.f32 0.5, %v1243_v35 }
0x16a1   :  { %v1245_v45 = vsub.f32 1.5, %v1244_v43 }
0x16a3   :  { %v1246_v48 = vmul.f32 %v3397_v25, %v1245_v45  ;;  %v1265_v60 = vpop.permute.xlu1 %1264 }
0x16a4   :  { %v3399_v49 = vpop.eup %3398 }
0x16a5   :  { %v1252_v54 = vmul.f32 %v3399_v49, %v1240_v40  ;;  %v1250_v56 = vsel %vm1249_vm0, %v3397_v25, %v1246_v48  ;;  %vm1258_vm2 = vweird.f32 %v3399_v49 }
0x16a6   :  { %v1261_v59 = vmul.f32 %v1250_v56, %v1237_v50  ;;  %vm1259_vm4 = vmor %vm1257_vm3, %vm1258_vm2 }
0x16a7   :  { %v1253_v10 = vmul.f32 %v3399_v49, %v1252_v54 }
0x16a8   :  { %v1267_v5 = vmul.f32 %v1265_v60, %v1261_v59 }
0x16a9   :  { %v1254_v24 = vmul.f32 0.5, %v1253_v10 }
0x16aa   :  { %v1273_v52 = vadd.f32 %v1271_v58, %v1267_v5 }
0x16ab   :  { %v1255_v1 = vsub.f32 1.5, %v1254_v24 }
0x16ac   :  { %v1275_v17 = vmul.f32 0.01, %v1273_v52 }
0x16ad   :  { %v1256_v11 = vmul.f32 %v3399_v49, %v1255_v1 }
0x16ae   :  { %v1277_v19 = vmax.f32 %v1273_v52, %v1275_v17  ;;  %v3232_v52 = vld [vmem:[%s4891_s5 + $0x78] sm:$0xf0]  ;;  %v3224_v17 = vld [vmem:[%s4891_s5 + $0x70] sm:$0xf0] }
0x16af   :  { %v1260_v62 = vsel %vm1259_vm4, %v3399_v49, %v1256_v11  ;;  %v1391_v49 = vld [vmem:[#allocation8 + $0x45] ss:$0 sm:$0xff] }
0x16b0   :  { %v1262_v15 = vmul.f32 %v1260_v62, %v1238_v63  ;;  %v1279_v26 = vsel %vm107_vm1, %v1197_v20, %v1277_v19  ;;  %v3306_v63 = vld [vmem:[%s4891_s5 + $0x6c] sm:$0xf]  ;;  %v3222_v62 = vld [vmem:[%s4891_s5 + $0x60] sm:$0xf] }
0x16b1   :  { %v3235_v14 = vor.u32 %v3306_v63, %v3232_v52 }
0x16b2   :  { %v1268_v16 = vmul.f32 %v1265_v60, %v1262_v15  ;;  %v3307_v15 = vld [vmem:[%s4891_s5 + $0x6c] sm:$0xf0] }
0x16b3   :  { %v3223_v18 = vor.u32 %v3307_v15, %v3222_v62  ;;  %1629 = vmatpush.bf16.msra.mxu3 %v3235_v14  ;;  %v3174_v62 = vld [vmem:[%s4891_s5] sm:$0xf]  ;;  %v3295_v14 = vld [vmem:[%s4891_s5 + $0xc] sm:$0xf0]  ;;  %v3293_v15 = vld [vmem:[%s4891_s5 + $0x4] sm:$0xf] }
0x16b4   :  { %v1274_v61 = vadd.f32 %v1271_v58, %v1268_v16  ;;  %v3305_v16 = vld [vmem:[%s4891_s5 + $0x64] sm:$0xf] }
0x16b5   :  { %v3227_v55 = vor.u32 %v3305_v16, %v3224_v17  ;;  %1587 = vmatpush.bf16.msrb.mxu1 %v3223_v18  ;;  %v3175_v16 = vor.u32 %v3295_v14, %v3174_v62  ;;  %v3182_v17 = vld [vmem:[%s4891_s5 + $0x8] sm:$0xf]  ;;  %v3296_v18 = vld [vmem:[%s4891_s5 + $0x14] sm:$0xf0] }
0x16b6   :  { %v1276_v39 = vmul.f32 0.01, %v1274_v61 }
0x16b7   :  { %1601 = vmatpush.bf16.msrb.mxu2 %v3227_v55 }
0x16b8   :  { %v1278_v23 = vmax.f32 %v1274_v61, %v1276_v39  ;;  %v3230_v61 = vld [vmem:[%s4891_s5 + $0x68] sm:$0xf]  ;;  %v3308_v39 = vld [vmem:[%s4891_s5 + $0x74] sm:$0xf0] }
0x16b9   :  { %v3231_v20 = vor.u32 %v3308_v39, %v3230_v61  ;;  %v3183_v39 = vor.u32 %v3296_v18, %v3182_v17 }
0x16ba   :  { %v1280_v37 = vsel %vm107_vm1, %v1198_v21, %v1278_v23  ;;  %v3302_v23 = vld [vmem:[%s4891_s5 + $0x4c] sm:$0xf] }
0x16bb   :  { %v1281_v27 = vpack.c.bf16 %v1280_v37, %v1279_v26  ;;  %v3216_v26 = vld [vmem:[%s4891_s5 + $0x58] sm:$0xf0]  ;;  %v3206_v37 = vld [vmem:[%s4891_s5 + $0x40] sm:$0xf]  ;;  %1615 = vmatpush.bf16.msra.mxu0 %v3231_v20 }
0x16bd   :  { %3171 = vmatmul.msk.bf16.vlgmr.msrb.gmra.mxu3 %vm287_vm15, %v1281_v27 }
0x1740   :  { %v1327_v13 = vpop.f32.mrf.mxu3 }
0x1741   :  { %v3994_v29 = vadd.f32 %v1327_v13, %v1290_v32  ;;  %v3303_v13 = vld [vmem:[%s4891_s5 + $0x4c] sm:$0xf0] }
0x1743   :  { %1394 = vrot.lane.b32.xlu0 %v3994_v29, %s3549_s21  ;;  %v1334_v30 = vsel %vm107_vm1, %v3994_v29, 0.0  ;;  %v1342_v36 = vmul.f32 %v3994_v29, %v3994_v29 }
0x1744   :  { %1335 = vadd.xlane.f32.xlu1 %v1334_v30  ;;  %v3301_v30 = vld [vmem:[%s4891_s5 + $0x44] sm:$0xf] }
0x1745   :  { %v1344_v28 = vsel %vm107_vm1, %v1342_v36, 0.0 }
0x1748   :  { %v1329_v31 = vpop.f32.mrf.mxu3 }
0x1749   :  { %v4000_v33 = vadd.f32 %v1329_v31, %v1290_v32  ;;  %v3219_v32 = vor.u32 %v3302_v23, %v3216_v26  ;;  %v3208_v31 = vld [vmem:[%s4891_s5 + $0x50] sm:$0xf0] }
0x174b   :  { %1410 = vrot.lane.b32.xlu0 %v1342_v36, %s3549_s21  ;;  %v1343_v25 = vmul.f32 %v4000_v33, %v4000_v33  ;;  %v1337_v38 = vsel %vm107_vm1, %v4000_v33, 0.0  ;;  %1630 = vmatpush.bf16.msra.mxu3 %v3219_v32 }
0x174d   :  { %1412 = vrot.lane.b32.xlu2 %v1343_v25, %s3549_s21  ;;  %v1347_v40 = vsel %vm107_vm1, %v1343_v25, 0.0  ;;  %v3207_v25 = vor.u32 %v3303_v13, %v3206_v37 }
0x174f   :  { %1588 = vmatpush.bf16.msrb.mxu1 %v3207_v25 }
0x175d   :  { %1396 = vrot.lane.b32.xlu1 %v4000_v33, %s3549_s21 }
0x1775   :  { %1338 = vadd.xlane.f32.xlu0 %v1337_v38  ;;  %v3211_v38 = vor.u32 %v3301_v30, %v3208_v31 }
0x1776   :  { %1345 = vadd.xlane.f32.xlu2 %v1344_v28  ;;  %v3214_v28 = vld [vmem:[%s4891_s5 + $0x48] sm:$0xf] }
0x1777   :  { %1602 = vmatpush.bf16.msrb.mxu2 %v3211_v38 }
0x177d   :  { %1348 = vadd.xlane.f32.xlu0 %v1347_v40  ;;  %v3304_v40 = vld [vmem:[%s4891_s5 + $0x54] sm:$0xf0] }
0x1791   :  { %1455 = vrot.lane.b32.xlu0 %v1390_v41, %s3548_s17 }
0x17a7   :  { %v1413_v43 = vpop.permute.xlu2 %1412 }
0x17a8   :  { %v1419_v44 = vsel %vm107_vm1, %v1413_v43, 0.0 }
0x17b5   :  { %v1395_v42 = vpop.permute.xlu0 %1394 }
0x17b6   :  { %v1400_v35 = vsel %vm107_vm1, %v1395_v42, 0.0  ;;  %v3215_v42 = vor.u32 %v3304_v40, %v3214_v28 }
0x17b7   :  { %1401 = vadd.xlane.f32.xlu2 %v1400_v35  ;;  %v1336_v46 = vpop.xlane.xlu1 %1335 }
0x17b8   :  { %v4021_v53 = vmul.f32 %v1336_v46, %v3647_v34  ;;  %1616 = vmatpush.bf16.msra.mxu0 %v3215_v42  ;;  %v1332_v42 = vld [vmem:[#allocation8 + $0x42] ss:$0 sm:$0xff] }
0x17ba   :  { %v1352_v59 = vmul.f32 %v4021_v53, %v4021_v53  ;;  %v1356_v25 = vsub.f32 %v3994_v29, %v4021_v53  ;;  %v1333_v53 = vld [vmem:[#allocation8 + $0x43] ss:$0 sm:$0xff] }
0x17bd   :  { %v1411_v6 = vpop.permute.xlu0 %1410 }
0x17be   :  { %v1416_v45 = vsel %vm107_vm1, %v1411_v6, 0.0  ;;  %v3298_v6 = vld [vmem:[%s4891_s5 + $0x2c] sm:$0xf] }
0x17bf   :  { %1420 = vadd.xlane.f32.xlu2 %v1419_v44  ;;  %1417 = vadd.xlane.f32.xlu1 %v1416_v45  ;;  %v3200_v44 = vld [vmem:[%s4891_s5 + $0x38] sm:$0xf0]  ;;  %v3190_v45 = vld [vmem:[%s4891_s5 + $0x20] sm:$0xf] }
0x17c0   :  { %v3203_v46 = vor.u32 %v3298_v6, %v3200_v44 }
0x17c2   :  { %1631 = vmatpush.bf16.msra.mxu3 %v3203_v46 }
0x17cf   :  { %v1397_v47 = vpop.permute.xlu1 %1396 }
0x17d0   :  { %v1403_v48 = vsel %vm107_vm1, %v1397_v47, 0.0  ;;  %v3299_v47 = vld [vmem:[%s4891_s5 + $0x2c] sm:$0xf0] }
0x17d1   :  { %1404 = vadd.xlane.f32.xlu1 %v1403_v48  ;;  %v3297_v48 = vld [vmem:[%s4891_s5 + $0x24] sm:$0xf] }
0x17e8   :  { %v1339_v50 = vpop.xlane.xlu0 %1338 }
0x17e9   :  { %v1346_v2 = vpop.xlane.xlu2 %1345  ;;  %v4024_v56 = vmul.f32 %v1339_v50, %v3647_v34 }
0x17ea   :  { %1461 = vrot.lane.b32.xlu1 %v1391_v49, %s3548_s17  ;;  %v1350_v57 = vmul.f32 %v1346_v2, %v3647_v34  ;;  %v3192_v49 = vld [vmem:[%s4891_s5 + $0x30] sm:$0xf0] }
0x17eb   :  { %v1353_v10 = vmul.f32 %v4024_v56, %v4024_v56  ;;  %v1357_v38 = vsub.f32 %v4000_v33, %v4024_v56 }
0x17ec   :  { %v1354_v60 = vsub.f32 %v1350_v57, %v1352_v59  ;;  %v3195_v57 = vor.u32 %v3297_v48, %v3192_v49  ;;  %v3300_v59 = vld [vmem:[%s4891_s5 + $0x34] sm:$0xf0] }
0x17ee   :  { %v4035_v24 = vadd.f32 1e-05, %v1354_v60  ;;  %1603 = vmatpush.bf16.msrb.mxu2 %v3195_v57 }
0x17f0   :  { %v1349_v54 = vpop.xlane.xlu0 %1348  ;;  %3400 = vrsqrt.f32 %v4035_v24  ;;  %vm1366_vm6 = vweird.f32 %v4035_v24 }
0x17f1   :  { %v1351_v51 = vmul.f32 %v1349_v54, %v3647_v34  ;;  %v3191_v54 = vor.u32 %v3299_v47, %v3190_v45 }
0x17f3   :  { %v1355_v3 = vsub.f32 %v1351_v51, %v1353_v10  ;;  %v3198_v51 = vld [vmem:[%s4891_s5 + $0x28] sm:$0xf]  ;;  %1589 = vmatpush.bf16.msrb.mxu1 %v3191_v54 }
0x17f5   :  { %v4037_v5 = vadd.f32 1e-05, %v1355_v3 }
0x17f6   :  { %v4047_v11 = vpop.eup %3400 }
0x17f7   :  { %3402 = vrsqrt.f32 %v4037_v5  ;;  %v1361_v19 = vmul.f32 %v4047_v11, %v4035_v24  ;;  %1590 = vmatpush.bf16.msrb.mxu1 %v3175_v16  ;;  %vm1367_vm5 = vweird.f32 %v4047_v11  ;;  %vm1376_vm10 = vweird.f32 %v4037_v5 }
0x17f8   :  { %vm1368_vm9 = vmor %vm1366_vm6, %vm1367_vm5 }
0x17f9   :  { %v1362_v41 = vmul.f32 %v4047_v11, %v1361_v19 }
0x17fb   :  { %v1363_v10 = vmul.f32 0.5, %v1362_v41 }
0x17fd   :  { %v4058_v12 = vpop.eup %3402  ;;  %v1364_v20 = vsub.f32 1.5, %v1363_v10 }
0x17fe   :  { %v1371_v21 = vmul.f32 %v4058_v12, %v4037_v5  ;;  %vm1377_vm7 = vweird.f32 %v4058_v12 }
0x17ff   :  { %v1365_v26 = vmul.f32 %v4047_v11, %v1364_v20  ;;  %vm1378_vm11 = vmor %vm1376_vm10, %vm1377_vm7 }
0x1800   :  { %v1372_v35 = vmul.f32 %v4058_v12, %v1371_v21 }
0x1801   :  { %v1369_v24 = vsel %vm1368_vm9, %v4047_v11, %v1365_v26 }
0x1802   :  { %v1373_v3 = vmul.f32 0.5, %v1372_v35 }
0x1803   :  { %v1456_v11 = vpop.permute.xlu0 %1455 }
0x1804   :  { %v1374_v21 = vsub.f32 1.5, %v1373_v3 }
0x1806   :  { %v1375_v37 = vmul.f32 %v4058_v12, %v1374_v21 }
0x1808   :  { %v1379_v30 = vsel %vm1378_vm11, %v4058_v12, %v1375_v37 }
0x1809   :  { %v1381_v40 = vmul.f32 %v1379_v30, %v1357_v38 }
0x182a   :  { %v1402_v0 = vpop.xlane.xlu2 %1401 }
0x182b   :  { %v4033_v4 = vmul.f32 %v1402_v0, %v3647_v34  ;;  %v3199_v0 = vor.u32 %v3300_v59, %v3198_v51 }
0x182d   :  { %v1424_v58 = vmul.f32 %v4033_v4, %v4033_v4  ;;  %1617 = vmatpush.bf16.msra.mxu0 %v3199_v0  ;;  %v1428_v5 = vsub.f32 %v3994_v29, %v4033_v4 }
0x1831   :  { %1618 = vmatpush.bf16.msra.mxu0 %v3183_v39 }
0x1832   :  { %v1418_v1 = vpop.xlane.xlu1 %1417  ;;  %v1421_v50 = vpop.xlane.xlu2 %1420 }
0x1833   :  { %v1422_v7 = vmul.f32 %v1418_v1, %v3647_v34 }
0x1835   :  { %v1426_v8 = vsub.f32 %v1422_v7, %v1424_v58  ;;  %v3294_v58 = vld [vmem:[%s4891_s5 + $0xc] sm:$0xf]  ;;  %v3184_v7 = vld [vmem:[%s4891_s5 + $0x18] sm:$0xf0] }
0x1836   :  { %v3187_v52 = vor.u32 %v3294_v58, %v3184_v7  ;;  %v4190_v58 = vld [vmem:[#allocation8 + $0x46] ss:$8 sm:$0xf] }
0x1837   :  { %v4044_v9 = vadd.f32 1e-05, %v1426_v8  ;;  %v1423_v8 = vmul.f32 %v1421_v50, %v3647_v34  ;;  %v1494_v7 = vperm.slane %v4190_v58, 2  ;;  %v1495_v62 = vperm.slane %v4190_v58, 3 }
0x1838   :  { %1632 = vmatpush.bf16.msra.mxu3 %v3187_v52 }
0x1839   :  { %3404 = vrsqrt.f32 %v4044_v9  ;;  %vm1438_vm12 = vweird.f32 %v4044_v9 }
0x183f   :  { %v4088_v27 = vpop.eup %3404 }
0x1840   :  { %v1433_v36 = vmul.f32 %v4088_v27, %v4044_v9  ;;  %vm1439_vm8 = vweird.f32 %v4088_v27  ;;  %v1380_v9 = vmul.f32 %v1369_v24, %v1356_v25 }
0x1841   :  { %vm1440_vm13 = vmor %vm1438_vm12, %vm1439_vm8 }
0x1842   :  { %v1434_v43 = vmul.f32 %v4088_v27, %v1433_v36 }
0x1844   :  { %v1405_v2 = vpop.xlane.xlu1 %1404  ;;  %v1435_v1 = vmul.f32 0.5, %v1434_v43  ;;  %v1382_v43 = vmul.f32 %v1380_v9, %v1332_v42 }
0x1845   :  { %v4135_v60 = vmul.f32 %v1405_v2, %v3647_v34  ;;  %v3176_v34 = vld [vmem:[%s4891_s5 + $0x10] sm:$0xf0]  ;;  %s3558_s5 = smov [#allocation9]  }
0x1846   :  { %v3179_v61 = vor.u32 %v3293_v15, %v3176_v34  ;;  %v1436_v23 = vsub.f32 1.5, %v1435_v1  ;;  %v1384_v47 = vadd.f32 %v1382_v43, %v1333_v53  ;;  %s3051_s10 = sshll.u32 %s3558_s5, 4  ;;  %s3052_s10 = int_to_ptr.vmem [resolvable:$true] %s3051_s10 }
0x1847   :  { %v1425_v63 = vmul.f32 %v4135_v60, %v4135_v60  ;;  %v1429_v56 = vsub.f32 %v4000_v33, %v4135_v60 }
0x1848   :  { %1604 = vmatpush.bf16.msrb.mxu2 %v3179_v61  ;;  %v1437_v32 = vmul.f32 %v4088_v27, %v1436_v23  ;;  %v1386_v2 = vmul.f32 0.01, %v1384_v47 }
0x1849   :  { %v1427_v55 = vsub.f32 %v1423_v8, %v1425_v63 }
0x184a   :  { %v1441_v36 = vsel %vm1440_vm13, %v4088_v27, %v1437_v32  ;;  %v1383_v27 = vmul.f32 %v1381_v40, %v1332_v42  ;;  %v1388_v10 = vmax.f32 %v1384_v47, %v1386_v2 }
0x184b   :  { %v1431_v19 = vadd.f32 1e-05, %v1427_v55  ;;  %v1452_v41 = vmul.f32 %v1441_v36, %v1428_v5 }
0x184c   :  { %v1385_v48 = vadd.f32 %v1383_v27, %v1333_v53 }
0x184d   :  { %3406 = vrsqrt.f32 %v1431_v19  ;;  %v1458_v6 = vmul.f32 %v1456_v11, %v1452_v41  ;;  %vm1448_vm0 = vweird.f32 %v1431_v19 }
0x184e   :  { %v1387_v54 = vmul.f32 0.01, %v1385_v48 }
0x1850   :  { %v1389_v0 = vmax.f32 %v1385_v48, %v1387_v54 }
0x1853   :  { %v3407_v13 = vpop.eup %3406 }
0x1854   :  { %v1443_v31 = vmul.f32 %v3407_v13, %v1431_v19  ;;  %vm1449_vm14 = vweird.f32 %v3407_v13 }
0x1855   :  { %vm1450_vm2 = vmor %vm1448_vm0, %vm1449_vm14 }
0x1856   :  { %v1444_v28 = vmul.f32 %v3407_v13, %v1443_v31 }
0x1858   :  { %v1445_v35 = vmul.f32 0.5, %v1444_v28 }
0x185a   :  { %v1446_v12 = vsub.f32 1.5, %v1445_v35 }
0x185c   :  { %v1447_v44 = vmul.f32 %v3407_v13, %v1446_v12  ;;  %v1462_v45 = vpop.permute.xlu1 %1461 }
0x185d   :  { %v1464_v29 = vadd.f32 %v1462_v45, %v1458_v6 }
0x185e   :  { %v1451_v4 = vsel %vm1450_vm2, %v3407_v13, %v1447_v44 }
0x185f   :  { %v1453_v46 = vmul.f32 %v1451_v4, %v1429_v56  ;;  %v1466_v50 = vmul.f32 0.01, %v1464_v29 }
0x1861   :  { %v1459_v49 = vmul.f32 %v1456_v11, %v1453_v46  ;;  %v1468_v59 = vmax.f32 %v1464_v29, %v1466_v50 }
0x1863   :  { %v1465_v57 = vadd.f32 %v1462_v45, %v1459_v49  ;;  %v1470_v1 = vsel %vm107_vm1, %v1388_v10, %v1468_v59  ;;  %v3553_v59 = vmov 2475754826  }
0x1865   :  { %v1467_v51 = vmul.f32 0.01, %v1465_v57 }
0x1867   :  { %v1469_v3 = vmax.f32 %v1465_v57, %v1467_v51  ;;  %v3552_v57 = vmov 683565275  }
0x1869   :  { %v1471_v33 = vsel %vm107_vm1, %v1389_v0, %v1469_v3 }
0x186a   :  { %v1472_v60 = vpack.c.bf16 %v1471_v33, %v1470_v1  ;;  %v3554_v1 = vmov 2131351028  }
0x186c   :  { %3236 = vmatmul.msk.bf16.vlgmr.msrb.gmra.mxu1 %vm287_vm15, %v1472_v60  ;;  %3237 = vmatmul.msk.bf16.vlgmr.msrb.gmra.mxu2 %vm287_vm15, %v1472_v60 }
0x186d   :  { %3238 = vmatmul.msk.bf16.vlgmr.msra.gmra.mxu0 %vm287_vm15, %v1472_v60  ;;  %3239 = vmatmul.msk.bf16.vlgmr.msra.gmra.mxu3 %vm287_vm15, %v1472_v60 }
0x18ea   :  { %v1620_v8 = vpop.f32.mrf.mxu0 }
0x18eb   :  { %v1621_v63 = vadd.f32 %v1620_v8, %v1494_v7 }
0x18ed   :  { %v3244_v52 = vmul.f32 -1.442695, %v1621_v63 }
0x18ef   :  { %3408 = vpow2.f32 %v3244_v52  ;;  %v3556_v52 = vmov 920167782  }
0x18f0   :  { %v1634_v14 = vpop.f32.mrf.mxu3 }
0x18f1   :  { %v1635_v15 = vadd.f32 %v1634_v14, %v1495_v62 }
0x18f2   :  { %v1622_v19 = vpop.f32.mrf.mxu0 }
0x18f3   :  { %v3245_v16 = vmul.f32 -1.442695, %v1635_v15  ;;  %v1623_v23 = vadd.f32 %v1622_v19, %v1494_v7  ;;  %v3555_v7 = vmov 2102212464  }
0x18f5   :  { %v3409_v34 = vpop.eup %3408  ;;  %3410 = vpow2.f32 %v3245_v16  ;;  %v3246_v31 = vmul.f32 -1.442695, %v1623_v23  ;;  %v3557_v16 = vmov 1326507024  }
0x18f6   :  { %v1727_v17 = vadd.f32 1.0, %v3409_v34 }
0x18f8   :  { %3412 = vrcp.f32 %v1727_v17  ;;  %v1742_v21 = vand.u32 2147483648, %v1727_v17  ;;  %v1740_v37 = vand.u32 2147483647, %v1727_v17  ;;  %vm1736_vm15 = vweird.f32 %v1727_v17 }
0x18fa   :  { %v1743_v30 = vor.u32 1.1754944e-38, %v1742_v21  ;;  %vm1741_vm4 = vcmp.eq.f32.partialorder %v1740_v37, 8.507059e+37 }
0x18fb   :  { %v3411_v18 = vpop.eup %3410 }
0x18fc   :  { %v1728_v55 = vadd.f32 1.0, %v3411_v18 }
0x18fe   :  { %v3413_v61 = vpop.eup %3412  ;;  %3414 = vrcp.f32 %v1728_v55  ;;  %v1757_v9 = vand.u32 2147483648, %v1728_v55  ;;  %v1755_v40 = vand.u32 2147483647, %v1728_v55  ;;  %vm1751_vm6 = vweird.f32 %v1728_v55 }
0x18ff   :  { %v1732_v39 = vmul.f32 %v3413_v61, %v1727_v17  ;;  %vm1737_vm1 = vweird.f32 %v3413_v61  ;;  %3416 = vpow2.f32 %v3246_v31 }
0x1900   :  { %vm1738_vm3 = vmor %vm1736_vm15, %vm1737_vm1  ;;  %v1758_v12 = vor.u32 1.1754944e-38, %v1757_v9  ;;  %vm1756_vm8 = vcmp.eq.f32.partialorder %v1755_v40, 8.507059e+37 }
0x1901   :  { %v1733_v20 = vsub.f32 1.0, %v1732_v39 }
0x1903   :  { %v1734_v26 = vmul.f32 %v3413_v61, %v1733_v20 }
0x1904   :  { %v3415_v32 = vpop.eup %3414 }
0x1905   :  { %v1735_v13 = vadd.f32 %v3413_v61, %v1734_v26  ;;  %v1747_v24 = vmul.f32 %v3415_v32, %v1728_v55  ;;  %vm1752_vm5 = vweird.f32 %v3415_v32  ;;  %v3417_v44 = vpop.eup %3416 }
0x1906   :  { %vm1753_vm7 = vmor %vm1751_vm6, %vm1752_vm5  ;;  %v4205_v4 = vadd.f32 1.0, %v3417_v44 }
0x1907   :  { %v1739_v36 = vsel %vm1738_vm3, %v3413_v61, %v1735_v13  ;;  %v1748_v25 = vsub.f32 1.0, %v1747_v24 }
0x1908   :  { %v1744_v38 = vsel %vm1741_vm4, %v1743_v30, %v1739_v36  ;;  %3418 = vrcp.f32 %v4205_v4  ;;  %vm1766_vm6 = vweird.f32 %v4205_v4 }
0x1909   :  { %v4196_v5 = vmul.f32 6.2831855, %v1744_v38  ;;  %v1749_v28 = vmul.f32 %v3415_v32, %v1748_v25 }
0x190b   :  { %v1798_v41 = vand.u32 2139095040, %v4196_v5  ;;  %v1795_v42 = vand.u32 2147483647, %v4196_v5  ;;  %v1750_v11 = vadd.f32 %v3415_v32, %v1749_v28 }
0x190d   :  { %v1799_v35 = vshrl.u32 %v1798_v41, 23  ;;  %v1754_v43 = vsel %vm1753_vm7, %v3415_v32, %v1750_v11  ;;  %v1802_v53 = vand.u32 8388607, %v1795_v42 }
0x190e   :  { %v1759_v6 = vsel %vm1756_vm8, %v1758_v12, %v1754_v43  ;;  %v4236_v20 = vpop.eup %3418 }
0x190f   :  { %v3248_v27 = vadd.s32 4294967169, %v1799_v35  ;;  %v4202_v45 = vmul.f32 6.2831855, %v1759_v6  ;;  %v1803_v46 = vor.u32 8388608, %v1802_v53  ;;  %v1762_v11 = vmul.f32 %v4236_v20, %v4205_v4 }
0x1910   :  { %v1772_v35 = vand.u32 2147483648, %v4205_v4  ;;  %vm1767_vm3 = vweird.f32 %v4236_v20 }
0x1911   :  { %v1805_v56 = vadd.s32 1, %v3248_v27  ;;  %v1952_v29 = vand.u32 2139095040, %v4202_v45  ;;  %v4214_v0 = vshll.u32 %v1803_v46, 8  ;;  %v1949_v26 = vand.u32 2147483647, %v4202_v45 }
0x1912   :  { %v1770_v46 = vand.u32 2147483647, %v4205_v4 }
0x1913   :  { %vm1806_vm9 = vcmp.gt.s32.totalorder %v1805_v56, 0  ;;  %v1953_v48 = vshrl.u32 %v1952_v29, 23  ;;  %v1844_v30 = vand.u32 65535, %v4214_v0  ;;  %v1845_v25 = vshrl.u32 %v4214_v0, 16 }
0x1914   :  { %v1807_v47 = vsel %vm1806_vm9, %v1805_v56, 0  ;;  %v1956_v44 = vand.u32 8388607, %v1949_v26  ;;  %vm4355_vm9 = vcmp.eq.f32.partialorder %v1770_v46, 8.507059e+37 }
0x1915   :  { %v1809_v49 = vand.u32 31, %v1807_v47  ;;  %v3251_v2 = vadd.s32 4294967169, %v1953_v48  ;;  %v4210_v54 = vshrl.u32 %v1807_v47, 5 }
0x1917   :  { %v4207_v50 = vsub.s32 32, %v1809_v49  ;;  %v1812_v51 = vshll.u32 %v3552_v57, %v1809_v49  ;;  %v1815_v10 = vshll.u32 %v3553_v59, %v1809_v49  ;;  %v1818_v60 = vshll.u32 %v3554_v1, %v1809_v49 }
0x1918   :  { %v1821_v63 = vshll.u32 %v3555_v7, %v1809_v49  ;;  %v1824_v15 = vshll.u32 %v3556_v52, %v1809_v49  ;;  %v1959_v61 = vadd.s32 1, %v3251_v2  ;;  %vm1827_vm10 = vcmp.lt.s32.totalorder %v4210_v54, 1 }
0x1919   :  { %v1813_v3 = vshrl.u32 %v3553_v59, %v4207_v50  ;;  %v1816_v33 = vshrl.u32 %v3554_v1, %v4207_v50  ;;  %v1819_v8 = vshrl.u32 %v3555_v7, %v4207_v50  ;;  %v1822_v14 = vshrl.u32 %v3556_v52, %v4207_v50 }
0x191a   :  { %v1825_v34 = vshrl.u32 %v3557_v16, %v4207_v50  ;;  %vm1830_vm11 = vcmp.lt.s32.totalorder %v4210_v54, 4  ;;  %vm1829_vm12 = vcmp.lt.s32.totalorder %v4210_v54, 3  ;;  %vm1960_vm13 = vcmp.gt.s32.totalorder %v1959_v61, 0 }
0x191b   :  { %v4229_v17 = vor.u32 %v1813_v3, %v1812_v51  ;;  %v4231_v18 = vor.u32 %v1816_v33, %v1815_v10  ;;  %v4233_v55 = vor.u32 %v1819_v8, %v1818_v60  ;;  %v1823_v39 = vor.u32 %v1822_v14, %v1821_v63 }
0x191c   :  { %v1826_v19 = vor.u32 %v1825_v34, %v1824_v15  ;;  %vm1828_vm14 = vcmp.lt.s32.totalorder %v4210_v54, 2  ;;  %v1961_v38 = vsel %vm1960_vm13, %v1959_v61, 0  ;;  %v1763_v49 = vsub.f32 1.0, %v1762_v11 }
0x191d   :  { %v1835_v21 = vsel %vm1827_vm10, %v4229_v17, %v4231_v18  ;;  %v1839_v23 = vsel %vm1827_vm10, %v4231_v18, %v4233_v55  ;;  %v1836_v37 = vsel %vm1830_vm11, %v1823_v39, 920167782  ;;  %v1963_v27 = vand.u32 31, %v1961_v38 }
0x191e   :  { %v1840_v32 = vsel %vm1830_vm11, %v1826_v19, 1326507024  ;;  %v1837_v13 = vsel %vm1829_vm12, %v4233_v55, %v1836_v37  ;;  %v4281_v2 = vor.u32 1.1754944e-38, %v1772_v35  ;;  %v1957_v8 = vor.u32 8388608, %v1956_v44 }
0x191f   :  { %v1841_v24 = vsel %vm1829_vm12, %v1823_v39, %v1840_v32  ;;  %v1838_v31 = vsel %vm1828_vm14, %v1835_v21, %v1837_v13  ;;  %v4284_v3 = vsub.s32 32, %v1963_v27  ;;  %v4291_v61 = vshrl.u32 %v1961_v38, 5 }
0x1920   :  { %v1842_v36 = vsel %vm1828_vm14, %v1839_v23, %v1841_v24  ;;  %v1868_v40 = vand.u32 65535, %v1838_v31  ;;  %v1869_v41 = vshrl.u32 %v1838_v31, 16  ;;  %v1966_v39 = vshll.u32 %v3552_v57, %v1963_v27 }
0x1921   :  { %v1846_v28 = vand.u32 65535, %v1842_v36  ;;  %v1847_v9 = vshrl.u32 %v1842_v36, 16  ;;  %v1969_v19 = vshll.u32 %v3553_v59, %v1963_v27  ;;  %v1967_v23 = vshrl.u32 %v3553_v59, %v4284_v3 }
0x1922   :  { %v4272_v6 = vmul.u32 %v1869_v41, %v1844_v30  ;;  %v4277_v29 = vmul.u32 %v1868_v40, %v1845_v25  ;;  %v1870_v47 = vmul.u32 %v1868_v40, %v1844_v30  ;;  %v1873_v34 = vmul.u32 %v1869_v41, %v1845_v25 }
0x1923   :  { %v4268_v12 = vmul.u32 %v1847_v9, %v1844_v30  ;;  %v4270_v43 = vmul.u32 %v1846_v28, %v1845_v25  ;;  %v1848_v53 = vmul.u32 %v1846_v28, %v1844_v30  ;;  %v1851_v63 = vmul.u32 %v1847_v9, %v1845_v25 }
0x1924   :  { %v1874_v48 = vshll.u32 %v4272_v6, 16  ;;  %v1876_v14 = vshll.u32 %v4277_v29, 16  ;;  %v1970_v37 = vshrl.u32 %v3554_v1, %v4284_v3  ;;  %v1972_v24 = vshll.u32 %v3554_v1, %v1963_v27 }
0x1925   :  { %v1852_v56 = vshll.u32 %v4268_v12, 16  ;;  %v1854_v51 = vshll.u32 %v4270_v43, 16  ;;  %v1973_v30 = vshrl.u32 %v3555_v7, %v4284_v3  ;;  %v4306_v31 = vor.u32 %v1967_v23, %v1966_v39 }
0x1926   :  { %vm1878_vm2 = vc.u32 %v1870_v47, %v1874_v48  ;;  %v4287_v60 = vadd.s32 %v1874_v48, %v1870_v47  ;;  %v4308_v36 = vor.u32 %v1970_v37, %v1969_v19  ;;  %v1975_v25 = vshll.u32 %v3555_v7, %v1963_v27 }
0x1927   :  { %vm1856_vm0 = vc.u32 %v1848_v53, %v1852_v56  ;;  %v1858_v10 = vadd.s32 %v1852_v56, %v1848_v53  ;;  %v1879_v15 = vsel %vm1878_vm2, 1, %v3551_v22  ;;  %v1976_v38 = vshrl.u32 %v3556_v52, %v4284_v3 }
0x1928   :  { %v1857_v33 = vsel %vm1856_vm0, 1, %v3551_v22  ;;  %vm1882_vm15 = vc.u32 %v4287_v60, %v1876_v14  ;;  %v1881_v13 = vadd.s32 %v1879_v15, %v1873_v34  ;;  %v4314_v9 = vor.u32 %v1973_v30, %v1972_v24 }
0x1929   :  { %vm1860_vm1 = vc.u32 %v1858_v10, %v1854_v51  ;;  %v1859_v21 = vadd.s32 %v1857_v33, %v1851_v63  ;;  %v1883_v28 = vsel %vm1882_vm15, 1, %v3551_v22  ;;  %v1978_v40 = vshll.u32 %v3556_v52, %v1963_v27 }
0x192a   :  { %v1861_v32 = vsel %vm1860_vm1, 1, %v3551_v22  ;;  %v1979_v41 = vshrl.u32 %v3557_v16, %v4284_v3  ;;  %v1811_v11 = vshrl.u32 %v3552_v57, %v4207_v50  ;;  %v1977_v35 = vor.u32 %v1976_v38, %v1975_v25 }
0x192b   :  { %vm1981_vm4 = vcmp.lt.s32.totalorder %v4291_v61, 1  ;;  %v1764_v44 = vmul.f32 %v4236_v20, %v1763_v49  ;;  %vm1984_vm5 = vcmp.lt.s32.totalorder %v4291_v61, 4  ;;  %v4329_v56 = vshll.u32 %v1957_v8, 8 }
0x192c   :  { %v1980_v53 = vor.u32 %v1979_v41, %v1978_v40  ;;  %v1989_v27 = vsel %vm1981_vm4, %v4306_v31, %v4308_v36  ;;  %v1863_v47 = vadd.s32 %v1861_v32, %v1859_v21  ;;  %v1885_v48 = vadd.s32 %v1883_v28, %v1881_v13 }
0x192d   :  { %vm1983_vm7 = vcmp.lt.s32.totalorder %v4291_v61, 3  ;;  %v1990_v50 = vsel %vm1984_vm5, %v1977_v35, 920167782  ;;  %v1832_v49 = vsel %vm1830_vm11, %v4233_v55, 2102212464  ;;  %vm1982_vm8 = vcmp.lt.s32.totalorder %v4291_v61, 2 }
0x192e   :  { %v1991_v51 = vsel %vm1983_vm7, %v4314_v9, %v1990_v50  ;;  %v1993_v10 = vsel %vm1981_vm4, %v4308_v36, %v4314_v9  ;;  %v1853_v33 = vshrl.u32 %v4268_v12, 16  ;;  %v1875_v8 = vshrl.u32 %v4272_v6, 16 }
0x192f   :  { %v1992_v63 = vsel %vm1982_vm8, %v1989_v27, %v1991_v51  ;;  %v1994_v55 = vsel %vm1984_vm5, %v1980_v53, 1326507024  ;;  %v1998_v34 = vand.u32 65535, %v4329_v56  ;;  %v1999_v37 = vshrl.u32 %v4329_v56, 16 }
0x1930   :  { %v1995_v15 = vsel %vm1983_vm7, %v1977_v35, %v1994_v55  ;;  %v2022_v39 = vand.u32 65535, %v1992_v63  ;;  %v2023_v19 = vshrl.u32 %v1992_v63, 16  ;;  %v1864_v12 = vadd.s32 %v1863_v47, %v1853_v33 }
0x1931   :  { %v1886_v23 = vadd.s32 %v1885_v48, %v1875_v8  ;;  %v1996_v6 = vsel %vm1982_vm8, %v1993_v10, %v1995_v15  ;;  %v1765_v30 = vadd.f32 %v4236_v20, %v1764_v44  ;;  %v1831_v25 = vsel %vm1827_vm10, %v1811_v11, %v4229_v17  ;;  %vm4382_vm10 = vmor %vm1766_vm6, %vm1767_vm3 }
0x1932   :  { %v2000_v32 = vand.u32 65535, %v1996_v6  ;;  %v2001_v13 = vshrl.u32 %v1996_v6, 16  ;;  %v2025_v24 = vmul.u32 %v2023_v19, %v1998_v34  ;;  %v1855_v46 = vshrl.u32 %v4270_v43, 16 }
0x1933   :  { %v1877_v38 = vshrl.u32 %v4277_v29, 16  ;;  %v2026_v28 = vmul.u32 %v2022_v39, %v1999_v37  ;;  %v1833_v40 = vsel %vm1829_vm12, %v4231_v18, %v1832_v49  ;;  %v4374_v41 = vadd.s32 %v4287_v60, %v1876_v14 }
0x1934   :  { %v2003_v35 = vmul.u32 %v2001_v13, %v1998_v34  ;;  %v2004_v44 = vmul.u32 %v2000_v32, %v1999_v37  ;;  %v4376_v53 = vadd.s32 %v1864_v12, %v1855_v46  ;;  %v2024_v17 = vmul.u32 %v2022_v39, %v1998_v34 }
0x1935   :  { %v1887_v27 = vadd.s32 %v1886_v23, %v1877_v38  ;;  %v2028_v11 = vshll.u32 %v2025_v24, 16  ;;  %v2002_v18 = vmul.u32 %v2000_v32, %v1998_v34  ;;  %v2027_v47 = vmul.u32 %v2023_v19, %v1999_v37 }
0x1936   :  { %v2006_v29 = vshll.u32 %v2003_v35, 16  ;;  %v1769_v60 = vsel %vm4382_vm10, %v4236_v20, %v1765_v30  ;;  %v2005_v14 = vmul.u32 %v2001_v13, %v1999_v37  ;;  %v2008_v48 = vshll.u32 %v2004_v44, 16 }
0x1937   :  { %v2030_v50 = vshll.u32 %v2026_v28, 16  ;;  %vm2032_vm11 = vc.u32 %v2024_v17, %v2028_v11  ;;  %v2034_v4 = vadd.s32 %v2028_v11, %v2024_v17  ;;  %vm1890_vm13 = vc.u32 %v4376_v53, %v4374_v41 }
0x1938   :  { %vm2010_vm12 = vc.u32 %v2002_v18, %v2006_v29  ;;  %v2012_v49 = vadd.s32 %v2006_v29, %v2002_v18  ;;  %v2033_v51 = vsel %vm2032_vm11, 1, %v3551_v22  ;;  %v1891_v10 = vadd.s32 1, %v1887_v27 }
0x1939   :  { %v2011_v33 = vsel %vm2010_vm12, 1, %v3551_v22  ;;  %v1774_v8 = vsel %vm4355_vm9, %v4281_v2, %v1769_v60  ;;  %v2035_v63 = vadd.s32 %v2033_v51, %v2027_v47  ;;  %vm2036_vm2 = vc.u32 %v2034_v4, %v2030_v50 }
0x193a   :  { %v2013_v20 = vadd.s32 %v2011_v33, %v2005_v14  ;;  %vm2014_vm0 = vc.u32 %v2012_v49, %v2008_v48  ;;  %v1834_v55 = vsel %vm1828_vm14, %v1831_v25, %v1833_v40  ;;  %v2037_v34 = vsel %vm2036_vm2, 1, %v3551_v22 }
0x193b   :  { %v2015_v15 = vsel %vm2014_vm0, 1, %v3551_v22  ;;  %v4400_v39 = vmul.f32 6.2831855, %v1774_v8  ;;  %v1892_v19 = vsel %vm1890_vm13, %v1891_v10, %v1887_v27  ;;  %v1888_v12 = vmul.u32 %v4214_v0, %v1834_v55 }
0x193c   :  { %v2017_v23 = vadd.s32 %v2015_v15, %v2013_v20  ;;  %v2039_v6 = vadd.s32 %v2037_v34, %v2035_v63  ;;  %v2007_v21 = vshrl.u32 %v2003_v35, 16  ;;  %v2029_v2 = vshrl.u32 %v2025_v24, 16 }
0x193d   :  { %v2106_v37 = vand.u32 2139095040, %v4400_v39  ;;  %v1893_v32 = vadd.s32 %v1892_v19, %v1888_v12  ;;  %v1986_v54 = vsel %vm1984_vm5, %v4314_v9, 2102212464  ;;  %v2009_v13 = vshrl.u32 %v2004_v44, 16 }
0x193e   :  { %v2018_v30 = vadd.s32 %v2017_v23, %v2007_v21  ;;  %v2031_v25 = vshrl.u32 %v2026_v28, 16  ;;  %v2040_v46 = vadd.s32 %v2039_v6, %v2029_v2  ;;  %v1965_v40 = vshrl.u32 %v3552_v57, %v4284_v3 }
0x193f   :  { %v2107_v38 = vshrl.u32 %v2106_v37, 23  ;;  %v1987_v9 = vsel %vm1983_vm7, %v4308_v36, %v1986_v54  ;;  %v4417_v44 = vadd.s32 %v2034_v4, %v2030_v50  ;;  %v1894_v28 = vadd.s32 536870912, %v1893_v32 }
0x1940   :  { %v4409_v0 = vadd.s32 %v2018_v30, %v2009_v13  ;;  %v2041_v27 = vadd.s32 %v2040_v46, %v2031_v25  ;;  %v1985_v24 = vsel %vm1981_vm4, %v1965_v40, %v4306_v31  ;;  %v2103_v48 = vand.u32 2147483647, %v4400_v39 }
0x1941   :  { %v3254_v35 = vadd.s32 4294967169, %v2107_v38  ;;  %v1988_v3 = vsel %vm1982_vm8, %v1985_v24, %v1987_v9  ;;  %v4423_v18 = vshrl.u32 %v1894_v28, 30 }
0x1942   :  { %v2045_v17 = vadd.s32 1, %v2041_v27  ;;  %vm2044_vm14 = vc.u32 %v4409_v0, %v4417_v44  ;;  %v2042_v47 = vmul.u32 %v4329_v56, %v1988_v3  ;;  %v2110_v10 = vand.u32 8388607, %v2103_v48 }
0x1943   :  { %v2113_v11 = vadd.s32 1, %v3254_v35  ;;  %v1896_v14 = vshll.u32 %v4423_v18, 30 }
0x1944   :  { %v2046_v31 = vsel %vm2044_vm14, %v2045_v17, %v2041_v27  ;;  %v2111_v37 = vor.u32 8388608, %v2110_v10  ;;  %vm1797_vm14 = vcmp.lt.s32.totalorder %v4196_v5, 0 }
0x1945   :  { %vm2114_vm1 = vcmp.gt.s32.totalorder %v2113_v11, 0  ;;  %v2047_v36 = vadd.s32 %v2046_v31, %v2042_v47  ;;  %v4436_v4 = vsub.s32 %v1893_v32, %v1896_v14  ;;  %v1492_v47 = vperm.slane %v4190_v58, 0 }
0x1946   :  { %v2115_v43 = vsel %vm2114_vm1, %v2113_v11, 0  ;;  %v4480_v40 = vshll.u32 %v2111_v37, 8 }
0x1947   :  { %v2117_v29 = vand.u32 31, %v2115_v43  ;;  %v2048_v50 = vadd.s32 536870912, %v2047_v36  ;;  %v4445_v63 = vshrl.u32 %v2115_v43, 5  ;;  %v1899_v2 = vsub.s32 0, %v4436_v4 }
0x1948   :  { %vm1898_vm15 = vcmp.lt.s32.totalorder %v4436_v4, 0  ;;  %v2152_v11 = vand.u32 65535, %v4480_v40 }
0x1949   :  { %v4426_v60 = vsub.s32 32, %v2117_v29  ;;  %v2120_v33 = vshll.u32 %v3552_v57, %v2117_v29  ;;  %v2123_v8 = vshll.u32 %v3553_v59, %v2117_v29  ;;  %v2129_v20 = vshll.u32 %v3555_v7, %v2117_v29 }
0x194a   :  { %v2126_v55 = vshll.u32 %v3554_v1, %v2117_v29  ;;  %v4450_v34 = vshrl.u32 %v2048_v50, 30  ;;  %v2132_v21 = vshll.u32 %v3556_v52, %v2117_v29  ;;  %vm2135_vm3 = vcmp.lt.s32.totalorder %v4445_v63, 1  ;;  %v1592_v50 = vpop.f32.mrf.mxu1 }
0x194b   :  { %v2121_v61 = vshrl.u32 %v3553_v59, %v4426_v60  ;;  %v2124_v49 = vshrl.u32 %v3554_v1, %v4426_v60  ;;  %v2130_v51 = vshrl.u32 %v3556_v52, %v4426_v60  ;;  %v2127_v56 = vshrl.u32 %v3555_v7, %v4426_v60 }
0x194c   :  { %v2133_v15 = vshrl.u32 %v3557_v16, %v4426_v60  ;;  %vm2138_vm4 = vcmp.lt.s32.totalorder %v4445_v63, 4  ;;  %v2050_v54 = vshll.u32 %v4450_v34, 30  ;;  %vm2137_vm5 = vcmp.lt.s32.totalorder %v4445_v63, 3 }
0x194d   :  { %v4452_v19 = vor.u32 %v2121_v61, %v2120_v33  ;;  %v4454_v12 = vor.u32 %v2124_v49, %v2123_v8  ;;  %v2131_v23 = vor.u32 %v2130_v51, %v2129_v20  ;;  %v4456_v6 = vor.u32 %v2127_v56, %v2126_v55 }
0x194e   :  { %v2134_v32 = vor.u32 %v2133_v15, %v2132_v21  ;;  %v1900_v46 = vsel %vm1898_vm15, %v1899_v2, %v4436_v4  ;;  %vm2136_vm6 = vcmp.lt.s32.totalorder %v4445_v63, 2  ;;  %v4486_v24 = vsub.s32 %v2047_v36, %v2050_v54  ;;  %v1636_v2 = vpop.f32.mrf.mxu3 }
0x194f   :  { %v2143_v13 = vsel %vm2135_vm3, %v4452_v19, %v4454_v12  ;;  %v2144_v30 = vsel %vm2138_vm4, %v2131_v23, 920167782  ;;  %v2147_v38 = vsel %vm2135_vm3, %v4454_v12, %v4456_v6  ;;  %v1901_v28 = vclz %v1900_v46 }
0x1950   :  { %v2145_v25 = vsel %vm2137_vm5, %v4456_v6, %v2144_v30  ;;  %v2148_v35 = vsel %vm2138_vm4, %v2134_v32, 1326507024  ;;  %v2153_v29 = vshrl.u32 %v4480_v40, 16  ;;  %v2053_v14 = vsub.s32 0, %v4486_v24 }
0x1951   :  { %v2146_v27 = vsel %vm2136_vm6, %v2143_v13, %v2145_v25  ;;  %v2149_v9 = vsel %vm2137_vm5, %v2131_v23, %v2148_v35  ;;  %v3249_v61 = vadd.s32 4294967294, %v1901_v28  ;;  %vm2052_vm7 = vcmp.lt.s32.totalorder %v4486_v24, 0 }
0x1952   :  { %v2150_v17 = vsel %vm2136_vm6, %v2147_v38, %v2149_v9  ;;  %v2177_v31 = vshrl.u32 %v2146_v27, 16  ;;  %v2176_v10 = vand.u32 65535, %v2146_v27  ;;  %v1593_v8 = vadd.f32 %v1592_v50, %v1492_v47 }
0x1953   :  { %v2154_v3 = vand.u32 65535, %v2150_v17  ;;  %v2155_v43 = vshrl.u32 %v2150_v17, 16  ;;  %v2054_v20 = vsel %vm2052_vm7, %v2053_v14, %v4486_v24  ;;  %vm3250_vm9 = vcmp.lt.s32.totalorder %v3249_v61, 0  ;;  %v1606_v17 = vpop.f32.mrf.mxu2 }
0x1954   :  { %v2179_v33 = vmul.u32 %v2177_v31, %v2152_v11  ;;  %v2180_v32 = vmul.u32 %v2176_v10, %v2153_v29  ;;  %v2055_v13 = vclz %v2054_v20  ;;  %v4501_v30 = vsel %vm3250_vm9, 0, %v3249_v61 }
0x1955   :  { %v2157_v36 = vmul.u32 %v2155_v43, %v2152_v11  ;;  %v2158_v49 = vmul.u32 %v2154_v3, %v2153_v29  ;;  %v2156_v51 = vmul.u32 %v2154_v3, %v2152_v11  ;;  %v2159_v55 = vmul.u32 %v2155_v43, %v2153_v29 }
0x1956   :  { %v2182_v54 = vshll.u32 %v2179_v33, 16  ;;  %v2178_v46 = vmul.u32 %v2176_v10, %v2152_v11  ;;  %v1637_v38 = vadd.f32 %v1636_v2, %v1495_v62  ;;  %v3240_v27 = vmul.f32 -1.442695, %v1593_v8 }
0x1957   :  { %v2160_v56 = vshll.u32 %v2157_v36, 16  ;;  %v2162_v15 = vshll.u32 %v2158_v49, 16  ;;  %v1493_v35 = vperm.slane %v4190_v58, 1  ;;  %v2161_v9 = vshrl.u32 %v2157_v36, 16 }
0x1958   :  { %v2181_v3 = vmul.u32 %v2177_v31, %v2153_v29  ;;  %v2184_v43 = vshll.u32 %v2180_v32, 16  ;;  %vm2186_vm11 = vc.u32 %v2178_v46, %v2182_v54  ;;  %v2188_v14 = vadd.s32 %v2182_v54, %v2178_v46 }
0x1959   :  { %vm2164_vm8 = vc.u32 %v2156_v51, %v2160_v56  ;;  %v2166_v21 = vadd.s32 %v2160_v56, %v2156_v51  ;;  %v1909_v50 = vsub.s32 4294967266, %v4501_v30  ;;  %v3252_v61 = vadd.s32 4294967294, %v2055_v13  ;;  %v1594_v13 = vpop.f32.mrf.mxu1 }
0x195a   :  { %v2165_v23 = vsel %vm2164_vm8, 1, %v3551_v22  ;;  %v2187_v56 = vsel %vm2186_vm11, 1, %v3551_v22  ;;  %v2140_v62 = vsel %vm2138_vm4, %v4456_v6, 2102212464  ;;  %vm2190_vm12 = vc.u32 %v2188_v14, %v2184_v43 }
0x195b   :  { %v2167_v37 = vadd.s32 %v2165_v23, %v2159_v55  ;;  %vm2168_vm10 = vc.u32 %v2166_v21, %v2162_v15  ;;  %v2189_v11 = vadd.s32 %v2187_v56, %v2181_v3  ;;  %v3247_v10 = vmul.f32 -1.442695, %v1637_v38 }
0x195c   :  { %v2169_v25 = vsel %vm2168_vm10, 1, %v3551_v22  ;;  %v1607_v36 = vadd.f32 %v1606_v17, %v1493_v35  ;;  %v2119_v31 = vshrl.u32 %v3552_v57, %v4426_v60  ;;  %v2163_v29 = vshrl.u32 %v2158_v49, 16 }
0x195d   :  { %v2171_v28 = vadd.s32 %v2169_v25, %v2167_v37  ;;  %v2191_v8 = vsel %vm2190_vm12, 1, %v3551_v22  ;;  %3420 = vpow2.f32 %v3240_v27  ;;  %v2183_v20 = vshrl.u32 %v2179_v33, 16 }
0x195e   :  { %v2193_v55 = vadd.s32 %v2191_v8, %v2189_v11  ;;  %vm3253_vm13 = vcmp.lt.s32.totalorder %v3252_v61, 0  ;;  %v2139_v6 = vsel %vm2135_vm3, %v2119_v31, %v4452_v19  ;;  %v2141_v15 = vsel %vm2137_vm5, %v4454_v12, %v2140_v62 }
0x195f   :  { %v2172_v51 = vadd.s32 %v2171_v28, %v2161_v9  ;;  %v1910_v21 = vadd.s32 127, %v1909_v50  ;;  %v2185_v2 = vshrl.u32 %v2180_v32, 16  ;;  %3422 = vpow2.f32 %v3247_v10 }
0x1960   :  { %v2194_v60 = vadd.s32 %v2193_v55, %v2183_v20  ;;  %v3241_v49 = vmul.f32 -1.442695, %v1607_v36  ;;  %v4525_v37 = vadd.s32 %v2188_v14, %v2184_v43  ;;  %v1905_v33 = vsub.s32 32, %v4501_v30 }
0x1961   :  { %v4523_v23 = vadd.s32 %v2172_v51, %v2163_v29  ;;  %v2058_v54 = vsel %vm3253_vm13, 0, %v3252_v61  ;;  %v2142_v19 = vsel %vm2136_vm6, %v2139_v6, %v2141_v15  ;;  %v1889_v32 = vadd.s32 %v4374_v41, %v4376_v53 }
0x1962   :  { %v2195_v25 = vadd.s32 %v2194_v60, %v2185_v2  ;;  %v1911_v46 = vshll.u32 %v1910_v21, 23  ;;  %v2063_v27 = vsub.s32 4294967266, %v2058_v54  ;;  %v1595_v9 = vadd.f32 %v1594_v13, %v1492_v47 }
0x1963   :  { %vm2198_vm0 = vc.u32 %v4523_v23, %v4525_v37  ;;  %v3421_v12 = vpop.eup %3420  ;;  %v2196_v28 = vmul.u32 %v4480_v40, %v2142_v19  ;;  %v1907_v3 = vshrl.u32 %v1889_v32, %v1905_v33  ;;  %3424 = vpow2.f32 %v3241_v49 }
0x1964   :  { %v2199_v38 = vadd.s32 1, %v2195_v25  ;;  %v4537_v43 = vadd.f32 1.0, %v3421_v12  ;;  %v1906_v50 = vshll.u32 %v4436_v4, %v4501_v30  ;;  %v1912_v61 = vor.u32 4788187, %v1911_v46 }
0x1965   :  { %v3423_v17 = vpop.eup %3422  ;;  %v2064_v53 = vadd.s32 127, %v2063_v27  ;;  %v3242_v51 = vmul.f32 -1.442695, %v1595_v9  ;;  %v2059_v40 = vsub.s32 32, %v2058_v54  ;;  %v2043_v36 = vadd.s32 %v4417_v44, %v4409_v0 }
0x1966   :  { %v2200_v63 = vsel %vm2198_vm0, %v2199_v38, %v2195_v25  ;;  %v1730_v41 = vadd.f32 1.0, %v3423_v17  ;;  %v1908_v62 = vor.u32 %v1907_v3, %v1906_v50  ;;  %v1913_v10 = vand.u32 2147483647, %v1912_v61 }
0x1967   :  { %v2201_v14 = vadd.s32 %v2200_v63, %v2196_v28  ;;  %v2065_v31 = vshll.u32 %v2064_v53, 23  ;;  %v2061_v8 = vshrl.u32 %v2043_v36, %v2059_v40  ;;  %v2060_v21 = vshll.u32 %v4486_v24, %v2058_v54 }
0x1968   :  { %3426 = vrcp.f32 %v1730_v41  ;;  %v1915_v30 = vcvt.s32.f32 %v1908_v62  ;;  %v1787_v54 = vand.u32 2147483648, %v1730_v41  ;;  %v1785_v9 = vand.u32 2147483647, %v1730_v41 }
0x1969   :  { %v2202_v56 = vadd.s32 536870912, %v2201_v14  ;;  %3428 = vrcp.f32 %v4537_v43  ;;  %v3425_v11 = vpop.eup %3424  ;;  %v2066_v2 = vor.u32 4788187, %v2065_v31  ;;  %v2062_v44 = vor.u32 %v2061_v8, %v2060_v21 }
0x196a   :  { %3430 = vpow2.f32 %v3242_v51  ;;  %v4547_v29 = vadd.f32 1.0, %v3425_v11  ;;  %v1916_v6 = vmul.f32 %v1915_v30, %v1913_v10  ;;  %vm4560_vm15 = vcmp.le.f32.partialorder %v1795_v42, 0.7853982 }
0x196b   :  { %v4542_v47 = vshrl.u32 %v2202_v56, 30  ;;  %v2067_v32 = vand.u32 2147483647, %v2066_v2  ;;  %v2069_v38 = vcvt.s32.f32 %v2062_v44  ;;  %vm1781_vm4 = vweird.f32 %v1730_v41 }
0x196c   :  { %3432 = vrcp.f32 %v4547_v29  ;;  %v1917_v19 = vxor.u32 2147483648, %v1916_v6  ;;  %v2197_v53 = vadd.s32 %v4525_v37, %v4523_v23  ;;  %v1788_v42 = vor.u32 1.1754944e-38, %v1787_v54 }
0x196d   :  { %v2204_v4 = vshll.u32 %v4542_v47, 30  ;;  %vm1786_vm6 = vcmp.eq.f32.partialorder %v1785_v9, 8.507059e+37  ;;  %v1666_v21 = vand.u32 2147483648, %v4537_v43  ;;  %vm1951_vm8 = vcmp.lt.s32.totalorder %v4202_v45, 0 }
0x196e   :  { %v3427_v55 = vpop.eup %3426  ;;  %v1918_v3 = vsel %vm1797_vm14, %v1917_v19, %v1916_v6  ;;  %v1664_v6 = vand.u32 2147483647, %v4537_v43  ;;  %vm4598_vm9 = vcmp.le.f32.partialorder %v1949_v26, 0.7853982  ;;  %vm1660_vm10 = vweird.f32 %v4537_v43 }
0x196f   :  { %v2205_v20 = vsub.s32 %v2201_v14, %v2204_v4  ;;  %v4549_v15 = vpop.eup %3428  ;;  %v1777_v49 = vmul.f32 %v3427_v55, %v1730_v41  ;;  %vm1782_vm1 = vweird.f32 %v3427_v55  ;;  %v2070_v14 = vmul.f32 %v2069_v38, %v2067_v32 }
0x1970   :  { %v3431_v0 = vpop.eup %3430  ;;  %v1656_v13 = vmul.f32 %v4549_v15, %v4537_v43  ;;  %vm1783_vm5 = vmor %vm1781_vm4, %vm1782_vm1  ;;  %v4573_v62 = vsel %vm4560_vm15, %v4196_v5, %v1918_v3  ;;  %vm1661_vm7 = vweird.f32 %v4549_v15  ;;  %vm4605_vm11 = vcmp.eq.f32.partialorder %v1664_v6, 8.507059e+37 }
0x1971   :  { %vm2206_vm2 = vcmp.lt.s32.totalorder %v2205_v20, 0  ;;  %v2207_v60 = vsub.s32 0, %v2205_v20  ;;  %v1778_v12 = vsub.f32 1.0, %v1777_v49  ;;  %v4556_v46 = vadd.f32 1.0, %v3431_v0  ;;  %vm4616_vm12 = vmor %vm1660_vm10, %vm1661_vm7 }
0x1972   :  { %v1657_v28 = vsub.f32 1.0, %v1656_v13  ;;  %v4566_v63 = vpop.eup %3432  ;;  %v2071_v37 = vxor.u32 2147483648, %v2070_v14  ;;  %v1919_v13 = vsub.s32 4, %v4423_v18  ;;  %vm4651_vm0 = vcmp.le.f32.partialorder %v2103_v48, 0.7853982 }
0x1973   :  { %v2208_v33 = vsel %vm2206_vm2, %v2207_v60, %v2205_v20  ;;  %v1779_v27 = vmul.f32 %v3427_v55, %v1778_v12  ;;  %3434 = vrcp.f32 %v4556_v46  ;;  %v1671_v23 = vmul.f32 %v4566_v63, %v4547_v29 }
0x1974   :  { %v2209_v25 = vclz %v2208_v33  ;;  %v1658_v31 = vmul.f32 %v4549_v15, %v1657_v28  ;;  %v2072_v44 = vsel %vm1951_vm8, %v2071_v37, %v2070_v14  ;;  %vm2105_vm2 = vcmp.lt.s32.totalorder %v4400_v39, 0 }
0x1975   :  { %v1780_v61 = vadd.f32 %v3427_v55, %v1779_v27  ;;  %v1672_v0 = vsub.f32 1.0, %v1671_v23  ;;  %v1667_v27 = vor.u32 1.1754944e-38, %v1666_v21  ;;  %v4612_v26 = vsel %vm4598_vm9, %v4202_v45, %v2072_v44 }
0x1976   :  { %v3255_v24 = vadd.s32 4294967294, %v2209_v25  ;;  %v1659_v49 = vadd.f32 %v4549_v15, %v1658_v31  ;;  %vm1675_vm1 = vweird.f32 %v4547_v29 }
0x1977   :  { %v1784_v40 = vsel %vm1783_vm5, %v3427_v55, %v1780_v61  ;;  %v4584_v55 = vmul.f32 %v4573_v62, %v4573_v62  ;;  %v1673_v28 = vmul.f32 %v4566_v63, %v1672_v0 }
0x1978   :  { %vm3256_vm3 = vcmp.lt.s32.totalorder %v3255_v24, 0  ;;  %v1789_v41 = vsel %vm1786_vm6, %v1788_v42, %v1784_v40  ;;  %v1663_v61 = vsel %vm4616_vm12, %v4549_v15, %v1659_v49  ;;  %v4634_v40 = vmul.f32 %v4612_v26, %v4612_v26 }
0x1979   :  { %v2212_v50 = vsel %vm3256_vm3, 0, %v3255_v24  ;;  %v4579_v4 = vmul.f32 6.2831855, %v1789_v41  ;;  %v4590_v60 = vpop.eup %3434  ;;  %v1931_v32 = vmul.f32 -0.00019511016, %v4584_v55  ;;  %v4645_v31 = vadd.f32 %v4566_v63, %v1673_v28 }
0x197a   :  { %v2213_v51 = vsub.s32 32, %v2212_v50  ;;  %v2217_v56 = vsub.s32 4294967266, %v2212_v50  ;;  %v2214_v11 = vshll.u32 %v2205_v20, %v2212_v50  ;;  %v1686_v14 = vmul.f32 %v4590_v60, %v4556_v46 }
0x197b   :  { %v2260_v20 = vand.u32 2139095040, %v4579_v4  ;;  %v4894_v24 = vand.u32 2147483647, %v4579_v4  ;;  %v1932_v42 = vadd.f32 0.008332121, %v1931_v32 }
0x197c   :  { %v2215_v10 = vshrl.u32 %v2197_v53, %v2213_v51  ;;  %v2218_v36 = vadd.s32 127, %v2217_v56  ;;  %v1920_v53 = vsel %vm1797_vm14, %v1919_v13, %v4423_v18  ;;  %v1924_v51 = vmul.f32 -0.001358992, %v4584_v55 }
0x197d   :  { %v2261_v33 = vshrl.u32 %v2260_v20, 23  ;;  %v4642_v18 = vsel %vm4605_vm11, %v1667_v27, %v1663_v61  ;;  %v1687_v23 = vsub.f32 1.0, %v1686_v14  ;;  %v1933_v20 = vmul.f32 %v1932_v42, %v4584_v55 }
0x197e   :  { %v2216_v30 = vor.u32 %v2215_v10, %v2214_v11  ;;  %v2219_v8 = vshll.u32 %v2218_v36, 23  ;;  %v2264_v11 = vand.u32 8388607, %v4894_v24  ;;  %v2085_v21 = vmul.f32 -0.00019511016, %v4634_v40 }
0x197f   :  { %v3257_v54 = vadd.s32 4294967169, %v2261_v33  ;;  %vm1676_vm14 = vweird.f32 %v4566_v63  ;;  %v1688_v28 = vmul.f32 %v4590_v60, %v1687_v23 }
0x1980   :  { %v2220_v2 = vor.u32 4788187, %v2219_v8  ;;  %v2223_v12 = vcvt.s32.f32 %v2216_v30  ;;  %v1922_v30 = vsel %vm4560_vm15, 0, %v1920_v53  ;;  %v1925_v8 = vadd.f32 0.041655596, %v1924_v51  ;;  %vm4735_vm6 = vmor %vm1675_vm1, %vm1676_vm14 }
0x1981   :  { %v2267_v50 = vadd.s32 1, %v3257_v54  ;;  %v2563_v61 = vadd.s32 3, %v1922_v30 }
0x1982   :  { %v2221_v25 = vand.u32 2147483647, %v2220_v2  ;;  %v2265_v2 = vor.u32 8388608, %v2264_v11 }
0x1983   :  { %vm2268_vm13 = vcmp.gt.s32.totalorder %v2267_v50, 0 }
0x1984   :  { %v2224_v9 = vmul.f32 %v2223_v12, %v2221_v25  ;;  %v2269_v41 = vsel %vm2268_vm13, %v2267_v50, 0  ;;  %v4704_v42 = vshll.u32 %v2265_v2, 8 }
0x1985   :  { %v2271_v37 = vand.u32 31, %v2269_v41  ;;  %v4663_v0 = vshrl.u32 %v2269_v41, 5 }
0x1986   :  { %v2225_v36 = vxor.u32 2147483648, %v2224_v9 }
0x1987   :  { %v4658_v49 = vsub.s32 32, %v2271_v37  ;;  %v2274_v48 = vshll.u32 %v3552_v57, %v2271_v37  ;;  %v2277_v44 = vshll.u32 %v3553_v59, %v2271_v37  ;;  %v2280_v25 = vshll.u32 %v3554_v1, %v2271_v37 }
0x1988   :  { %v2226_v17 = vsel %vm2105_vm2, %v2225_v36, %v2224_v9  ;;  %v2283_v32 = vshll.u32 %v3555_v7, %v2271_v37  ;;  %v2286_v38 = vshll.u32 %v3556_v52, %v2271_v37  ;;  %vm2289_vm15 = vcmp.lt.s32.totalorder %v4663_v0, 1 }
0x1989   :  { %v2275_v33 = vshrl.u32 %v3553_v59, %v4658_v49  ;;  %v2278_v13 = vshrl.u32 %v3554_v1, %v4658_v49  ;;  %v2281_v12 = vshrl.u32 %v3555_v7, %v4658_v49  ;;  %v2284_v54 = vshrl.u32 %v3556_v52, %v4658_v49 }
0x198a   :  { %v2287_v59 = vshrl.u32 %v3557_v16, %v4658_v49  ;;  %v4684_v27 = vsel %vm4651_vm0, %v4400_v39, %v2226_v17  ;;  %v1934_v7 = vadd.f32 -0.16666654, %v1933_v20  ;;  %v1926_v52 = vmul.f32 %v1925_v8, %v4584_v55 }
0x198b   :  { %v4686_v1 = vor.u32 %v2275_v33, %v2274_v48  ;;  %v4688_v9 = vor.u32 %v2278_v13, %v2277_v44  ;;  %v4690_v43 = vor.u32 %v2281_v12, %v2280_v25  ;;  %v2285_v14 = vor.u32 %v2284_v54, %v2283_v32 }
0x198c   :  { %v2288_v50 = vor.u32 %v2287_v59, %v2286_v38  ;;  %v2086_v16 = vadd.f32 0.008332121, %v2085_v21  ;;  %v4697_v53 = vmul.f32 %v4684_v27, %v4684_v27  ;;  %vm2292_vm3 = vcmp.lt.s32.totalorder %v4663_v0, 4 }
0x198d   :  { %v2297_v51 = vsel %vm2289_vm15, %v4686_v1, %v4688_v9  ;;  %vm2291_vm4 = vcmp.lt.s32.totalorder %v4663_v0, 3  ;;  %v2298_v11 = vsel %vm2292_vm3, %v2285_v14, 920167782  ;;  %v2301_v36 = vsel %vm2289_vm15, %v4688_v9, %v4690_v43 }
0x198e   :  { %v2302_v41 = vsel %vm2292_vm3, %v2288_v50, 1326507024  ;;  %v1935_v23 = vmul.f32 %v1934_v7, %v4584_v55  ;;  %v2073_v37 = vsub.s32 4, %v4450_v34  ;;  %vm2290_vm5 = vcmp.lt.s32.totalorder %v4663_v0, 2 }
0x198f   :  { %v2299_v8 = vsel %vm2291_vm4, %v4690_v43, %v2298_v11  ;;  %v1927_v20 = vadd.f32 -0.4999988, %v1926_v52  ;;  %v2078_v21 = vmul.f32 -0.001358992, %v4634_v40  ;;  %v2303_v17 = vsel %vm2291_vm4, %v2285_v14, %v2302_v41 }
0x1990   :  { %v2300_v2 = vsel %vm2290_vm5, %v2297_v51, %v2299_v8  ;;  %v2087_v48 = vmul.f32 %v2086_v16, %v4634_v40  ;;  %v2304_v44 = vsel %vm2290_vm5, %v2301_v36, %v2303_v17  ;;  %v2306_v33 = vand.u32 65535, %v4704_v42 }
0x1991   :  { %v2307_v13 = vshrl.u32 %v4704_v42, 16  ;;  %v2239_v12 = vmul.f32 -0.00019511016, %v4697_v53  ;;  %v2308_v32 = vand.u32 65535, %v2304_v44  ;;  %v2309_v54 = vshrl.u32 %v2304_v44, 16 }
0x1992   :  { %v2331_v38 = vshrl.u32 %v2300_v2, 16  ;;  %v1936_v59 = vadd.f32 1.0, %v1935_v23  ;;  %v4745_v14 = vadd.f32 %v4590_v60, %v1688_v28  ;;  %v2330_v50 = vand.u32 65535, %v2300_v2 }
0x1993   :  { %v4747_v52 = vand.u32 3, %v1922_v30  ;;  %v4749_v16 = vand.u32 3, %v2563_v61  ;;  %v2311_v51 = vmul.u32 %v2309_v54, %v2306_v33  ;;  %v2312_v11 = vmul.u32 %v2308_v32, %v2307_v13 }
0x1994   :  { %v2074_v36 = vsel %vm1951_vm8, %v2073_v37, %v4450_v34  ;;  %v2079_v41 = vadd.f32 0.041655596, %v2078_v21  ;;  %v2088_v23 = vadd.f32 -0.16666654, %v2087_v48  ;;  %v2333_v8 = vmul.u32 %v2331_v38, %v2306_v33 }
0x1995   :  { %v1928_v17 = vmul.f32 %v1927_v20, %v4584_v55  ;;  %v2240_v44 = vadd.f32 0.008332121, %v2239_v12  ;;  %v2310_v24 = vmul.u32 %v2308_v32, %v2306_v33  ;;  %v2314_v28 = vshll.u32 %v2311_v51, 16 }
0x1996   :  { %v4756_v2 = vmul.f32 %v1936_v59, %v4573_v62  ;;  %v2232_v30 = vmul.f32 -0.001358992, %v4697_v53  ;;  %v2334_v61 = vmul.u32 %v2330_v50, %v2307_v13  ;;  %v2336_v15 = vshll.u32 %v2333_v8, 16 }
0x1997   :  { %v2313_v10 = vmul.u32 %v2309_v54, %v2307_v13  ;;  %v2316_v7 = vshll.u32 %v2312_v11, 16  ;;  %vm2318_vm7 = vc.u32 %v2310_v24, %v2314_v28  ;;  %v2320_v3 = vadd.s32 %v2314_v28, %v2310_v24 }
0x1998   :  { %v2080_v34 = vmul.f32 %v2079_v41, %v4634_v40  ;;  %v2089_v37 = vmul.f32 %v2088_v23, %v4634_v40  ;;  %v2319_v55 = vsel %vm2318_vm7, 1, %v3551_v22  ;;  %v2332_v20 = vmul.u32 %v2330_v50, %v2306_v33 }
0x1999   :  { %v2241_v21 = vmul.f32 %v2240_v44, %v4697_v53  ;;  %v2321_v48 = vadd.s32 %v2319_v55, %v2313_v10  ;;  %vm2322_vm8 = vc.u32 %v2320_v3, %v2316_v7  ;;  %v2335_v62 = vmul.u32 %v2331_v38, %v2307_v13 }
0x199a   :  { %v2323_v12 = vsel %vm2322_vm8, 1, %v3551_v22  ;;  %v2338_v32 = vshll.u32 %v2334_v61, 16  ;;  %vm2340_vm10 = vc.u32 %v2332_v20, %v2336_v15  ;;  %v2342_v54 = vadd.s32 %v2336_v15, %v2332_v20 }
0x199b   :  { %v2233_v59 = vadd.f32 0.041655596, %v2232_v30  ;;  %v2315_v56 = vshrl.u32 %v2311_v51, 16  ;;  %v2325_v24 = vadd.s32 %v2323_v12, %v2321_v48  ;;  %v2341_v41 = vsel %vm2340_vm10, 1, %v3551_v22 }
0x199c   :  { %v2273_v23 = vshrl.u32 %v3552_v57, %v4658_v49  ;;  %v2294_v33 = vsel %vm2292_vm3, %v4690_v43, 2102212464  ;;  %v2343_v10 = vadd.s32 %v2341_v41, %v2335_v62  ;;  %vm2344_vm11 = vc.u32 %v2342_v54, %v2338_v32 }
0x199d   :  { %v2242_v3 = vadd.f32 -0.16666654, %v2241_v21  ;;  %v2317_v13 = vshrl.u32 %v2312_v11, 16  ;;  %v2326_v38 = vadd.s32 %v2325_v24, %v2315_v56  ;;  %v2345_v7 = vsel %vm2344_vm11, 1, %v3551_v22 }
0x199e   :  { %vm1941_vm12 = vcmp.eq.s32.totalorder %v4747_v52, 0  ;;  %v2081_v15 = vadd.f32 -0.4999988, %v2080_v34  ;;  %v2227_v50 = vsub.s32 4, %v4542_v47  ;;  %v2337_v51 = vshrl.u32 %v2333_v8, 16 }
0x199f   :  { %v2347_v44 = vadd.s32 %v2345_v7, %v2343_v10  ;;  %v2234_v57 = vmul.f32 %v2233_v59, %v4697_v53  ;;  %v2293_v49 = vsel %vm2289_vm15, %v2273_v23, %v4686_v1  ;;  %v2295_v43 = vsel %vm2291_vm4, %v4688_v9, %v2294_v33  ;;  %v1608_v1 = vpop.f32.mrf.mxu2 }
0x19a0   :  { %v4780_v56 = vadd.s32 %v2326_v38, %v2317_v13  ;;  %vm1944_vm13 = vcmp.eq.s32.totalorder %v4747_v52, 2  ;;  %v2090_v22 = vadd.f32 1.0, %v2089_v37  ;;  %v2339_v11 = vshrl.u32 %v2334_v61, 16 }
0x19a1   :  { %v2348_v28 = vadd.s32 %v2347_v44, %v2337_v51  ;;  %v1929_v30 = vadd.f32 1.0, %v1928_v17  ;;  %vm1940_vm14 = vcmp.lt.s32.totalorder %v4747_v52, 2  ;;  %v2076_v8 = vsel %vm4598_vm9, 0, %v2074_v36 }
0x19a2   :  { %v2243_v34 = vmul.f32 %v2242_v3, %v4697_v53  ;;  %v4787_v55 = vadd.s32 %v2342_v54, %v2338_v32  ;;  %v1942_v9 = vxor.u32 2147483648, %v4756_v2  ;;  %vm2565_vm1 = vcmp.lt.s32.totalorder %v4749_v16, 2 }
0x19a3   :  { %v2296_v37 = vsel %vm2290_vm5, %v2293_v49, %v2295_v43  ;;  %v2349_v61 = vadd.s32 %v2348_v28, %v2339_v11  ;;  %v2082_v17 = vmul.f32 %v2081_v15, %v4634_v40  ;;  %v2228_v19 = vsel %vm2105_vm2, %v2227_v50, %v4542_v47 }
0x19a4   :  { %v2235_v36 = vadd.f32 -0.4999988, %v2234_v57  ;;  %vm2352_vm9 = vc.u32 %v4780_v56, %v4787_v55  ;;  %v2091_v20 = vmul.f32 %v2090_v22, %v4612_v26  ;;  %v2718_v21 = vadd.s32 3, %v2076_v8 }
0x19a5   :  { %v1609_v48 = vadd.f32 %v1608_v1, %v1493_v35  ;;  %v2353_v62 = vadd.s32 1, %v2349_v61  ;;  %vm1938_vm15 = vweird.f32 %v4196_v5  ;;  %v1945_v0 = vxor.u32 2147483648, %v1929_v30 }
0x19a6   :  { %vm2566_vm3 = vcmp.eq.s32.totalorder %v4749_v16, 0  ;;  %v2244_v40 = vadd.f32 1.0, %v2243_v34  ;;  %v2350_v12 = vmul.u32 %v4704_v42, %v2296_v37  ;;  %vm2569_vm2 = vcmp.eq.s32.totalorder %v4749_v16, 2 }
0x19a7   :  { %v2093_v47 = vand.u32 3, %v2076_v8  ;;  %v2230_v32 = vsel %vm4651_vm0, 0, %v2228_v19  ;;  %v2354_v26 = vsel %vm2352_vm9, %v2353_v62, %v2349_v61  ;;  %v1943_v58 = vsel %vm1941_vm12, %v1929_v30, %v1942_v9 }
0x19a8   :  { %v2083_v35 = vadd.f32 1.0, %v2082_v17  ;;  %v2236_v54 = vmul.f32 %v2235_v36, %v4697_v53  ;;  %v2355_v59 = vadd.s32 %v2354_v26, %v2350_v12  ;;  %v2568_v24 = vsel %vm2566_vm3, %v1929_v30, %v1942_v9 }
0x19a9   :  { %v2096_v41 = vxor.u32 2147483648, %v2091_v20  ;;  %v2719_v23 = vand.u32 3, %v2718_v21  ;;  %v3243_v33 = vmul.f32 -1.442695, %v1609_v48  ;;  %v1946_v42 = vsel %vm1944_vm13, %v1945_v0, %v4756_v2 }
0x19aa   :  { %v2245_v10 = vmul.f32 %v2244_v40, %v4684_v27  ;;  %v2873_v6 = vadd.s32 3, %v2230_v32  ;;  %v2356_v3 = vadd.s32 536870912, %v2355_v59  ;;  %v1947_v13 = vsel %vm1940_vm14, %v1943_v58, %v1946_v42 }
0x19ab   :  { %v2571_v53 = vsel %vm2569_vm2, %v1945_v0, %v4756_v2  ;;  %vm2094_vm0 = vcmp.lt.s32.totalorder %v2093_v47, 2  ;;  %vm2095_vm4 = vcmp.eq.s32.totalorder %v2093_v47, 0  ;;  %vm1691_vm5 = vweird.f32 %v4590_v60 }
0x19ac   :  { %v2572_v38 = vsel %vm2565_vm1, %v2568_v24, %v2571_v53  ;;  %v2099_v7 = vxor.u32 2147483648, %v2083_v35  ;;  %v2237_v15 = vadd.f32 1.0, %v2236_v54  ;;  %v4823_v50 = vshrl.u32 %v2356_v3, 30 }
0x19ad   :  { %vm2092_vm7 = vweird.f32 %v4202_v45  ;;  %v2097_v27 = vsel %vm2095_vm4, %v2083_v35, %v2096_v41  ;;  %vm2098_vm8 = vcmp.eq.s32.totalorder %v2093_v47, 2  ;;  %vm2721_vm10 = vcmp.eq.s32.totalorder %v2719_v23, 0 }
0x19ae   :  { %vm1690_vm11 = vweird.f32 %v4556_v46  ;;  %v2247_v52 = vand.u32 3, %v2230_v32  ;;  %v2723_v2 = vsel %vm2721_vm10, %v2083_v35, %v2096_v41  ;;  %v2250_v51 = vxor.u32 2147483648, %v2245_v10 }
0x19af   :  { %v2874_v44 = vand.u32 3, %v2873_v6  ;;  %v2358_v57 = vshll.u32 %v4823_v50, 30  ;;  %v1948_v16 = vsel %vm1938_vm15, nan, %v1947_v13  ;;  %v2573_v49 = vsel %vm1938_vm15, nan, %v2572_v38 }
0x19b0   :  { %vm2720_vm12 = vcmp.lt.s32.totalorder %v2719_v23, 2  ;;  %vm2724_vm13 = vcmp.eq.s32.totalorder %v2719_v23, 2  ;;  %v2100_v43 = vsel %vm2098_vm8, %v2099_v7, %v2091_v20  ;;  %v2253_v11 = vxor.u32 2147483648, %v2237_v15 }
0x19b1   :  { %v2726_v22 = vsel %vm2724_vm13, %v2099_v7, %v2091_v20  ;;  %v2359_v28 = vsub.s32 %v2355_v59, %v2358_v57  ;;  %v2101_v30 = vsel %vm2094_vm0, %v2097_v27, %v2100_v43  ;;  %vm2249_vm14 = vcmp.eq.s32.totalorder %v2247_v52, 0  ;;  %vm4845_vm0 = vmor %vm1690_vm11, %vm1691_vm5 }
0x19b2   :  { %v2727_v8 = vsel %vm2720_vm12, %v2723_v2, %v2726_v22  ;;  %3436 = vpow2.f32 %v3243_v33  ;;  %v2251_v34 = vsel %vm2249_vm14, %v2237_v15, %v2250_v51  ;;  %vm2876_vm1 = vcmp.eq.s32.totalorder %v2874_v44, 0 }
0x19b3   :  { %vm2360_vm9 = vcmp.lt.s32.totalorder %v2359_v28, 0  ;;  %v2361_v1 = vsub.s32 0, %v2359_v28  ;;  %vm2252_vm3 = vcmp.eq.s32.totalorder %v2247_v52, 2  ;;  %v2878_v9 = vsel %vm2876_vm1, %v2237_v15, %v2250_v51 }
0x19b4   :  { %v2411_v5 = vmul.f32 %v1948_v16, %v4642_v18  ;;  %v3039_v37 = vmul.f32 %v2573_v49, %v4642_v18  ;;  %vm2248_vm15 = vcmp.lt.s32.totalorder %v2247_v52, 2  ;;  %v2254_v61 = vsel %vm2252_vm3, %v2253_v11, %v2245_v10 }
0x19b5   :  { %vm2879_vm2 = vcmp.eq.s32.totalorder %v2874_v44, 2  ;;  %v2362_v17 = vsel %vm2360_vm9, %v2361_v1, %v2359_v28  ;;  %v2255_v19 = vsel %vm2248_vm15, %v2251_v34, %v2254_v61  ;;  %vm2875_vm4 = vcmp.lt.s32.totalorder %v2874_v44, 2 }
0x19b6   :  { %v2881_v36 = vsel %vm2879_vm2, %v2253_v11, %v2245_v10  ;;  %v2363_v20 = vclz %v2362_v17  ;;  %2415 = vst [vmem:[#allocation9] sm:$0xff] %v2411_v5  ;;  %v4917_v21 = vand.u32 2147483648, %v4547_v29  ;;  %v2102_v62 = vsel %vm2092_vm7, nan, %v2101_v30 }
0x19b7   :  { %v2728_v0 = vsel %vm2092_vm7, nan, %v2727_v8  ;;  %v2882_v40 = vsel %vm2875_vm4, %v2878_v9, %v2881_v36  ;;  %3043 = vst [vmem:[#allocation9 + $0x10] sm:$0xff] %v3039_v37  ;;  %v4920_v47 = vand.u32 2147483647, %v4547_v29  ;;  %v1693_v45 = vsel %vm4845_vm0, %v4590_v60, %v4745_v14 }
0x19b8   :  { %v1682_v48 = vor.u32 1.1754944e-38, %v4917_v21  ;;  %v3437_v12 = vpop.eup %3436  ;;  %vm2246_vm7 = vweird.f32 %v4400_v39  ;;  %v3258_v32 = vadd.s32 4294967294, %v2363_v20  ;;  %v4921_v26 = vsel %vm4735_vm6, %v4566_v63, %v4645_v31 }
0x19b9   :  { %vm1680_vm8 = vcmp.eq.f32.partialorder %v4920_v47, 8.507059e+37  ;;  %v4922_v35 = vand.u32 2147483647, %v4556_v46  ;;  %v4923_v29 = vand.u32 2147483648, %v4556_v46  ;;  %v2256_v59 = vsel %vm2246_vm7, nan, %v2255_v19 }
0x19ba   :  { %v1683_v58 = vsel %vm1680_vm8, %v1682_v48, %v4921_v26  ;;  %v2883_v24 = vsel %vm2246_vm7, nan, %v2882_v40  ;;  %vm3259_vm10 = vcmp.lt.s32.totalorder %v3258_v32, 0  ;;  %v2351_v25 = vadd.s32 %v4787_v55, %v4780_v56 }
0x19bb   :  { %vm1695_vm5 = vcmp.eq.f32.partialorder %v4922_v35, 8.507059e+37  ;;  %v1697_v54 = vor.u32 1.1754944e-38, %v4923_v29  ;;  %v2412_v41 = vmul.f32 %v2102_v62, %v1683_v58  ;;  %v3040_v60 = vmul.f32 %v2728_v0, %v1683_v58 }
0x19bc   :  { %v2366_v39 = vsel %vm3259_vm10, 0, %v3258_v32  ;;  %v1654_v6 = vadd.f32 1.0, %v3437_v12  ;;  %vm2259_vm6 = vcmp.lt.s32.totalorder %v4579_v4, 0  ;;  %v4924_v27 = vand.u32 2147483647, %v4579_v4 }
0x19bd   :  { %v1698_v14 = vsel %vm1695_vm5, %v1697_v54, %v1693_v45  ;;  %v2367_v23 = vsub.s32 32, %v2366_v39  ;;  %v2371_v33 = vsub.s32 4294967266, %v2366_v39  ;;  %2416 = vst [vmem:[#allocation9 + $0x8] sm:$0xff] %v2412_v41  ;;  %v2368_v42 = vshll.u32 %v2359_v28, %v2366_v39 }
0x19be   :  { %v2413_v63 = vmul.f32 %v2256_v59, %v1698_v14  ;;  %v3041_v31 = vmul.f32 %v2883_v24, %v1698_v14  ;;  %3044 = vst [vmem:[#allocation9 + $0x18] sm:$0xff] %v3040_v60  ;;  %3438 = vrcp.f32 %v1654_v6  ;;  %vm2258_vm11 = vcmp.le.f32.partialorder %v4924_v27, 0.7853982 }
0x19bf   :  { %v2369_v10 = vshrl.u32 %v2351_v25, %v2367_v23  ;;  %v2372_v46 = vadd.s32 127, %v2371_v33  ;;  %v2381_v2 = vsub.s32 4, %v4823_v50  ;;  %v1711_v19 = vand.u32 2147483648, %v1654_v6 }
0x19c0   :  { %2417 = vst [vmem:[#allocation9 + $0x20] sm:$0xff] %v2413_v63  ;;  %vm1705_vm13 = vweird.f32 %v1654_v6  ;;  %v1709_v40 = vand.u32 2147483647, %v1654_v6  ;;  %vm2400_vm8 = vweird.f32 %v4579_v4 }
0x19c1   :  { %3045 = vst [vmem:[#allocation9 + $0x30] sm:$0xff] %v3041_v31  ;;  %v2370_v3 = vor.u32 %v2369_v10, %v2368_v42  ;;  %v2373_v13 = vshll.u32 %v2372_v46, 23  ;;  %v2382_v43 = vsel %vm2259_vm6, %v2381_v2, %v4823_v50  ;;  %v1712_v12 = vor.u32 1.1754944e-38, %v1711_v19 }
0x19c2   :  { %v2384_v30 = vsel %vm2258_vm11, 0, %v2382_v43  ;;  %vm1710_vm0 = vcmp.eq.f32.partialorder %v1709_v40, 8.507059e+37 }
0x19c3   :  { %v2374_v53 = vor.u32 4788187, %v2373_v13  ;;  %v2377_v7 = vcvt.s32.f32 %v2370_v3  ;;  %v3028_v37 = vadd.s32 3, %v2384_v30  ;;  %v2401_v48 = vand.u32 3, %v2384_v30 }
0x19c4   :  { %v3439_v55 = vpop.eup %3438 }
0x19c5   :  { %v2375_v38 = vand.u32 2147483647, %v2374_v53  ;;  %v1701_v44 = vmul.f32 %v3439_v55, %v1654_v6  ;;  %vm1706_vm12 = vweird.f32 %v3439_v55  ;;  %v3029_v62 = vand.u32 3, %v3028_v37 }
0x19c6   :  { %vm4873_vm14 = vmor %vm1705_vm13, %vm1706_vm12  ;;  %vm2402_vm1 = vcmp.lt.s32.totalorder %v2401_v48, 2  ;;  %vm2403_vm9 = vcmp.eq.s32.totalorder %v2401_v48, 0  ;;  %vm2406_vm3 = vcmp.eq.s32.totalorder %v2401_v48, 2 }
0x19c7   :  { %v2378_v15 = vmul.f32 %v2377_v7, %v2375_v38  ;;  %v1702_v22 = vsub.f32 1.0, %v1701_v44  ;;  %vm3030_vm15 = vcmp.lt.s32.totalorder %v3029_v62, 2  ;;  %vm3031_vm2 = vcmp.eq.s32.totalorder %v3029_v62, 0 }
0x19c8   :  { %vm3034_vm4 = vcmp.eq.s32.totalorder %v3029_v62, 2 }
0x19c9   :  { %v2379_v56 = vxor.u32 2147483648, %v2378_v15  ;;  %v1703_v1 = vmul.f32 %v3439_v55, %v1702_v22 }
0x19cb   :  { %v2380_v52 = vsel %vm2259_vm6, %v2379_v56, %v2378_v15  ;;  %v1704_v36 = vadd.f32 %v3439_v55, %v1703_v1 }
0x19cc   :  { %v2383_v51 = vsel %vm2258_vm11, %v4579_v4, %v2380_v52 }
0x19cd   :  { %v2385_v57 = vmul.f32 %v2383_v51, %v2383_v51  ;;  %v1708_v47 = vsel %vm4873_vm14, %v3439_v55, %v1704_v36 }
0x19ce   :  { %v1713_v59 = vsel %vm1710_vm0, %v1712_v12, %v1708_v47 }
0x19cf   :  { %v2386_v16 = vmul.f32 -0.001358992, %v2385_v57  ;;  %v2393_v49 = vmul.f32 -0.00019511016, %v2385_v57 }
0x19d1   :  { %v2387_v11 = vadd.f32 0.041655596, %v2386_v16  ;;  %v2394_v28 = vadd.f32 0.008332121, %v2393_v49 }
0x19d3   :  { %v2388_v8 = vmul.f32 %v2387_v11, %v2385_v57  ;;  %v2395_v34 = vmul.f32 %v2394_v28, %v2385_v57 }
0x19d5   :  { %v2389_v9 = vadd.f32 -0.4999988, %v2388_v8  ;;  %v2396_v5 = vadd.f32 -0.16666654, %v2395_v34 }
0x19d7   :  { %v2390_v61 = vmul.f32 %v2389_v9, %v2385_v57  ;;  %v2397_v17 = vmul.f32 %v2396_v5, %v2385_v57 }
0x19d9   :  { %v2391_v20 = vadd.f32 1.0, %v2390_v61  ;;  %v2398_v21 = vadd.f32 1.0, %v2397_v17 }
0x19db   :  { %v2399_v50 = vmul.f32 %v2398_v21, %v2383_v51  ;;  %v2407_v0 = vxor.u32 2147483648, %v2391_v20 }
0x19dd   :  { %v2404_v45 = vxor.u32 2147483648, %v2399_v50  ;;  %v2408_v26 = vsel %vm2406_vm3, %v2407_v0, %v2399_v50  ;;  %v3036_v35 = vsel %vm3034_vm4, %v2407_v0, %v2399_v50 }
0x19df   :  { %v2405_v32 = vsel %vm2403_vm9, %v2391_v20, %v2404_v45  ;;  %v3033_v58 = vsel %vm3031_vm2, %v2391_v20, %v2404_v45 }
0x19e0   :  { %v2409_v29 = vsel %vm2402_vm1, %v2405_v32, %v2408_v26  ;;  %v3037_v54 = vsel %vm3030_vm15, %v3033_v58, %v3036_v35 }
0x19e1   :  { %v2410_v24 = vsel %vm2400_vm8, nan, %v2409_v29  ;;  %v3038_v41 = vsel %vm2400_vm8, nan, %v3037_v54 }
0x19e2   :  { %v2414_v60 = vmul.f32 %v2410_v24, %v1713_v59  ;;  %v3042_v14 = vmul.f32 %v3038_v41, %v1713_v59 }
0x19e4   :  { %2418 = vst [vmem:[#allocation9 + $0x28] sm:$0xff] %v2414_v60 }
0x19e5   :  { %3046 = vst [vmem:[#allocation9 + $0x38] sm:$0xff] %v3042_v14 }
0x19e6   :  { %3059 = dma.vmem_to_hbm [thread:$0]  %s3052_s10, 1024, %s3054_s13, [#allocation5], %s3547_s1, %s3547_s1, %s3548_s17  }
0x19e7   :  { %3540 = dma.done.wait [#allocation5], 1024  }
0x19e8   :  { %3541 = vsyncadd [#allocation5], 4294966272 }
0x19e9   :  { %3064 = vsyncpa [#allocation4], 1 }
0x19ea   :  { %3065 = vsyncpa [#allocation7], 1 }
0x19eb   :  { %3066 = vsyncpa [#allocation5], 1 }

</bundles_post_ra>
